<compile_context>
chip_gen: v6e
topology: v6e:2x2x1
jax: 0.10.0
libtpu: 0.0.40
codegen_flags: <defaults>
</compile_context>

<pallas_src>
import functools
import math

import jax
import jax.numpy as jnp
from jax.experimental import pallas as pl
from jax.experimental.pallas import tpu as pltpu


# ----------------------------- Pallas kernel -------------------------------
def ocr_kernel(apply_mask, *refs):
    if apply_mask:
        (x_ref, kT_ref, v_ref, kbias_ref,
         wp1_ref, bp1_ref, wp2_ref, bp2_ref,
         wu_ref, bu_ref, wfc_ref, wfx_ref, bfin_ref, out_ref) = refs
    else:
        (x_ref, kT_ref, v_ref,
         wp1_ref, bp1_ref, wp2_ref, bp2_ref,
         wu_ref, bu_ref, wfc_ref, wfx_ref, bfin_ref, out_ref) = refs
        kbias_ref = None

    f32 = jnp.float32
    bf16 = jnp.bfloat16

    def lin_relu(a, w_ref, b_ref):
        y = jnp.dot(a, w_ref[...], preferred_element_type=f32) + b_ref[...]
        return jnp.maximum(y, 0.0)

    # f_pixel (query); key_channels**-0.5 softmax scale is folded into wp2/bp2.
    h = lin_relu(x_ref[0], wp1_ref, bp1_ref).astype(bf16)          # (TQ, K)
    q = lin_relu(h, wp2_ref, bp2_ref).astype(bf16)                 # (TQ, K)

    # sim = q @ k^T with k pre-transposed in the wrapper -> plain NN matmul.
    sim = jnp.dot(q, kT_ref[0], preferred_element_type=f32)        # (TQ, M_pad)
    if kbias_ref is not None:
        sim = sim + kbias_ref[...]                                 # mask padded keys
    sim = sim - jnp.max(sim, axis=-1, keepdims=True)
    e = jnp.exp(sim)
    probs = e * pl.reciprocal(jnp.sum(e, axis=-1, keepdims=True), approx=True)

    ctx = jnp.dot(probs.astype(bf16), v_ref[0],
                  preferred_element_type=f32)                      # (TQ, K)
    ctx = lin_relu(ctx.astype(bf16), wu_ref, bu_ref).astype(bf16)  # (TQ, C)

    # conv_bn_dropout on concat([context, feats]) == split matmul; x is
    # re-read from the ref so its live range does not span q/sim/ctx.
    out = (jnp.dot(ctx, wfc_ref[...], preferred_element_type=f32)
           + jnp.dot(x_ref[0], wfx_ref[...], preferred_element_type=f32)
           + bfin_ref[...])
    out_ref[0] = jnp.maximum(out, 0.0).astype(out_ref.dtype)


# ------------------------------- wrapper ------------------------------------
def _round_up(a, b):
    return ((a + b - 1) // b) * b


def spatial_ocr_forward(feats, proxy, params, *, tq=2048):
    """feats: (N, C, H, W), proxy: (N, C, Hp, Wp) -> (N, out_channels, H, W)."""
    N, C, H, W = feats.shape
    _, _, Hp, Wp = proxy.shape
    HW, M = H * W, Hp * Wp
    Kc = params["wp2"].shape[-1]
    out_ch = params["wf_ctx"].shape[-1]
    scale = Kc ** -0.5
    bf16 = jnp.bfloat16

    # NCHW -> token-major (N, tokens, C); downcast fused into the transpose so
    # the HBM pass moves bf16, not f32.
    x_flat = jnp.transpose(feats.astype(bf16).reshape(N, C, HW), (0, 2, 1))
    p_flat = jnp.transpose(proxy.reshape(N, C, M), (0, 2, 1)).astype(jnp.float32)

    # Hoisted proxy-side projections (tiny: M x C); computed once in f32,
    # reused by every HW tile of every batch element.
    def lr(a, w, b):
        return jnp.maximum(a @ w + b, 0.0)

    k = lr(lr(p_flat, params["wo1"], params["bo1"]),
           params["wo2"], params["bo2"])                        # (N, M, Kc)
    v = lr(p_flat, params["wd"], params["bd"])                  # (N, M, Kc)

    # Pad M up to a multiple of 128 -> lane-dense sim; mask padded keys only
    # when padding is actually present.
    M_pad = _round_up(M, 128)
    apply_mask = (M_pad != M)
    k = jnp.pad(k, ((0, 0), (0, M_pad - M), (0, 0)))
    v = jnp.pad(v, ((0, 0), (0, M_pad - M), (0, 0))).astype(bf16)
    # Pre-transpose k (once, in XLA) so the kernel's sim matmul is plain NN.
    kT = jnp.transpose(k, (0, 2, 1)).astype(bf16)               # (N, Kc, M_pad)
    if apply_mask:
        kbias = jnp.where(jnp.arange(M_pad)[None, :] < M,
                          0.0, -1e30).astype(jnp.float32)       # (1, M_pad)

    # Token-axis tile: multiple of 256 (full MXU row groups / unmasked stores
    # on v6e/v7x; also 128-aligned for v5e).  Footprint stays well under VMEM
    # even on v7x at TQ=2048 for realistic OCR sizes.
    TQ = max(256, (min(tq, _round_up(HW, 256)) // 256) * 256)
    num_tiles = -(-HW // TQ)
    if N == 1 and num_tiles > 1 and num_tiles % 2 == 1:
        # v7x megacore: with batch=1 only the token axis can be split across
        # the 2 TensorCores, so keep its extent even.
        TQ = max(256, _round_up(-(-HW // (num_tiles + 1)), 256))
        num_tiles = -(-HW // TQ)
    HW_pad = num_tiles * TQ
    x_pad = jnp.pad(x_flat, ((0, 0), (0, HW_pad - HW), (0, 0)))

    # Weights: bf16 matrices, f32 biases; softmax scale folded into wp2/bp2
    # (positive scale commutes with ReLU).
    weights = [
        params["wp1"].astype(bf16), params["bp1"].astype(jnp.float32),
        (params["wp2"] * scale).astype(bf16),
        (params["bp2"] * scale).astype(jnp.float32),
        params["wu"].astype(bf16), params["bu"].astype(jnp.float32),
        params["wf_ctx"].astype(bf16), params["wf_x"].astype(bf16),
        params["bf"].astype(jnp.float32),
    ]

    def _estimate_vmem_bytes(single_buffer_consts):
        nb_const = 1 if single_buffer_consts else 2
        io = 2 * TQ * C * 2 + 2 * TQ * out_ch * 2                 # x/out tiles, double-buffered, bf16
        kv = nb_const * (2 * Kc * M_pad * 2 + (M_pad * 4 if apply_mask else 0))
        wb = nb_const * sum(int(w.size) * w.dtype.itemsize for w in weights)
        tmp = TQ * (2 * Kc * 2 + 3 * M_pad * 4 + C * 4 + out_ch * 4)
        est = int(1.5 * (io + kv + wb + tmp)) + (4 << 20)         # headroom for Mosaic scratch
        return min(max(est, 32 << 20), 120 << 20)

    def _build(single_buffer_consts):
        def const_spec(shape):
            nd = len(shape)
            idx = lambda b, t, _nd=nd: (0,) * _nd
            if single_buffer_consts:
                # Constant block index: DMA'd once, no pipelining needed.
                return pl.BlockSpec(shape, idx, pipeline_mode=pl.Buffered(1))
            return pl.BlockSpec(shape, idx)

        def batch_spec(shape):
            idx = lambda b, t: (b, 0, 0)
            if single_buffer_consts:
                # k/v only change per batch element; single buffer saves VMEM.
                return pl.BlockSpec(shape, idx, pipeline_mode=pl.Buffered(1))
            return pl.BlockSpec(shape, idx)

        in_specs = [pl.BlockSpec((1, TQ, C), lambda b, t: (b, t, 0)),
                    batch_spec((1, Kc, M_pad)),
                    batch_spec((1, M_pad, Kc))]
        if apply_mask:
            in_specs.append(const_spec((1, M_pad)))
        in_specs += [const_spec(w.shape) for w in weights]

        out_spec = pl.BlockSpec((1, TQ, out_ch), lambda b, t: (b, t, 0))

        return pl.pallas_call(
            functools.partial(ocr_kernel, apply_mask),
            out_shape=jax.ShapeDtypeStruct((N, HW_pad, out_ch), bf16),
            grid_spec=pltpu.PrefetchScalarGridSpec(
                num_scalar_prefetch=0,
                grid=(N, HW_pad // TQ),
                in_specs=in_specs,
                out_specs=out_spec,
            ),
            compiler_params=pltpu.CompilerParams(
                dimension_semantics=("parallel", "parallel"),
                vmem_limit_bytes=_estimate_vmem_bytes(single_buffer_consts),
            ),
        )

    args = (x_pad, kT, v) + ((kbias,) if apply_mask else ()) + tuple(weights)
    try:
        out_flat = _build(True)(*args)
    except Exception:
        # Fallback: identical kernel without single-buffered constant specs.
        out_flat = _build(False)(*args)

    out_flat = out_flat[:, :HW, :]
    # (N, HW, out) -> (N, out, H, W); transpose happens on bf16 data, then the
    # final cast restores the module's f32 output dtype.
    return jnp.transpose(out_flat, (0, 2, 1)).reshape(N, out_ch, H, W).astype(jnp.float32)


# -------------------------- deterministic params -----------------------------
def _fold_conv_bn(key, c_in, c_out, eps=1e-5):
    """1x1 conv (no bias) + BatchNorm2d(eval) folded into (W, b).

    Returns W of shape (c_in, c_out) and b of shape (1, c_out) such that
    relu(x @ W + b) == ReLU(BN(Conv1x1(x))) with x in (tokens, c_in) layout.
    """
    kw, kg, kb, km, kv = jax.random.split(key, 5)
    w = (jax.random.normal(kw, (c_in, c_out), jnp.float32)
         * (1.0 / math.sqrt(c_in)))
    gamma = 1.0 + 0.1 * jax.random.normal(kg, (c_out,), jnp.float32)
    beta = 0.1 * jax.random.normal(kb, (c_out,), jnp.float32)
    run_mean = 0.1 * jax.random.normal(km, (c_out,), jnp.float32)
    run_var = jnp.abs(jax.random.normal(kv, (c_out,), jnp.float32)) + 0.5
    scale = gamma / jnp.sqrt(run_var + eps)
    w_folded = w * scale[None, :]
    b_folded = (beta - run_mean * scale)[None, :]
    return w_folded, b_folded


def make_params(key, in_channels, key_channels, out_channels):
    ks = jax.random.split(key, 7)
    p = {}
    p["wp1"], p["bp1"] = _fold_conv_bn(ks[0], in_channels, key_channels)
    p["wp2"], p["bp2"] = _fold_conv_bn(ks[1], key_channels, key_channels)
    p["wo1"], p["bo1"] = _fold_conv_bn(ks[2], in_channels, key_channels)
    p["wo2"], p["bo2"] = _fold_conv_bn(ks[3], key_channels, key_channels)
    p["wd"], p["bd"] = _fold_conv_bn(ks[4], in_channels, key_channels)
    p["wu"], p["bu"] = _fold_conv_bn(ks[5], key_channels, in_channels)
    # final conv over concat([context, feats]) : (2*in_channels -> out_channels)
    wf, bf = _fold_conv_bn(ks[6], 2 * in_channels, out_channels)
    p["wf_ctx"] = wf[:in_channels, :]   # acts on context
    p["wf_x"] = wf[in_channels:, :]     # acts on feats
    p["bf"] = bf
    return p


# ------------------------------ reference ------------------------------------
def reference_forward(feats, proxy, params):
    N, C, H, W = feats.shape
    _, _, Hp, Wp = proxy.shape
    HW, M = H * W, Hp * Wp
    x = jnp.transpose(feats.reshape(N, C, HW), (0, 2, 1)).astype(jnp.float32)
    p = jnp.transpose(proxy.reshape(N, C, M), (0, 2, 1)).astype(jnp.float32)

    def lr(a, w, b):
        return jnp.maximum(a @ w + b, 0.0)

    q = lr(lr(x, params["wp1"], params["bp1"]), params["wp2"], params["bp2"])
    k = lr(lr(p, params["wo1"], params["bo1"]), params["wo2"], params["bo2"])
    v = lr(p, params["wd"], params["bd"])
    K = q.shape[-1]
    sim = jnp.einsum("nqk,npk->nqp", q, k) * (K ** -0.5)
    sim = jax.nn.softmax(sim, axis=-1)
    ctx = jnp.einsum("nqp,npk->nqk", sim, v)
    ctx = lr(ctx, params["wu"], params["bu"])
    out = jnp.maximum(ctx @ params["wf_ctx"] + x @ params["wf_x"] + params["bf"], 0.0)
    out_ch = params["wf_ctx"].shape[-1]
    return jnp.transpose(out, (0, 2, 1)).reshape(N, out_ch, H, W)


# --------------------------------- main ---------------------------------------
if __name__ == "__main__":
    N, C, K, OUT = 2, 32, 16, 32
    H = W = 8            # feats spatial
    Hp, Wp = 8, 1        # proxy: 8 "object region" descriptors

    root = jax.random.PRNGKey(0)
    k_feats, k_proxy, k_params = jax.random.split(root, 3)
    feats = jax.random.normal(k_feats, (N, C, H, W), jnp.float32)
    proxy = jax.random.normal(k_proxy, (N, C, Hp, Wp), jnp.float32)
    params = make_params(k_params, C, K, OUT)

    out = jax.block_until_ready(spatial_ocr_forward(feats, proxy, params))
    ref = jax.block_until_ready(reference_forward(feats, proxy, params))

    assert out.shape == (N, OUT, H, W)
    # bf16 MXU data path / bf16 kernel output (f32 accumulation) -> looser
    # tolerance vs the f32 reference.
    rel = float(jnp.max(jnp.abs(out - ref))) / (float(jnp.max(jnp.abs(ref))) + 1e-6)
    assert rel < 5e-2, f"mismatch vs reference: rel_err={rel:.4f}"

    print("KERNEL_OK")
</pallas_src>

<mosaic_0001>
module attributes {stable_mosaic.version = 11 : i64} {
  func.func @ocr_kernel(%arg0: i32, %arg1: i32, %arg2: memref<1x256x32xbf16, #tpu.memory_space<vmem>>, %arg3: memref<1x16x128xbf16, #tpu.memory_space<vmem>>, %arg4: memref<1x128x16xbf16, #tpu.memory_space<vmem>>, %arg5: memref<1x128xf32, #tpu.memory_space<vmem>>, %arg6: memref<32x16xbf16, #tpu.memory_space<vmem>>, %arg7: memref<1x16xf32, #tpu.memory_space<vmem>>, %arg8: memref<16x16xbf16, #tpu.memory_space<vmem>>, %arg9: memref<1x16xf32, #tpu.memory_space<vmem>>, %arg10: memref<16x32xbf16, #tpu.memory_space<vmem>>, %arg11: memref<1x32xf32, #tpu.memory_space<vmem>>, %arg12: memref<32x32xbf16, #tpu.memory_space<vmem>>, %arg13: memref<32x32xbf16, #tpu.memory_space<vmem>>, %arg14: memref<1x32xf32, #tpu.memory_space<vmem>>, %arg15: memref<1x256x32xbf16, #tpu.memory_space<vmem>>) attributes {dimension_semantics = [#tpu.dimension_semantics<parallel>, #tpu.dimension_semantics<parallel>], iteration_bounds = array<i64: 2, 1>, scalar_prefetch = 0 : i64, scratch_operands = 0 : i64, tpu.core_type = #tpu.core_type<tc>, window_params = [{transform_indices = @transform_0, window_bounds = array<i64: 1, 256, 32>}, {pipeline_mode = #tpu.pipeline_mode<synchronous>, transform_indices = @transform_1, window_bounds = array<i64: 1, 16, 128>}, {pipeline_mode = #tpu.pipeline_mode<synchronous>, transform_indices = @transform_2, window_bounds = array<i64: 1, 128, 16>}, {pipeline_mode = #tpu.pipeline_mode<synchronous>, transform_indices = @transform_3, window_bounds = array<i64: 1, 128>}, {pipeline_mode = #tpu.pipeline_mode<synchronous>, transform_indices = @transform_4, window_bounds = array<i64: 32, 16>}, {pipeline_mode = #tpu.pipeline_mode<synchronous>, transform_indices = @transform_5, window_bounds = array<i64: 1, 16>}, {pipeline_mode = #tpu.pipeline_mode<synchronous>, transform_indices = @transform_6, window_bounds = array<i64: 16, 16>}, {pipeline_mode = #tpu.pipeline_mode<synchronous>, transform_indices = @transform_7, window_bounds = array<i64: 1, 16>}, {pipeline_mode = #tpu.pipeline_mode<synchronous>, transform_indices = @transform_8, window_bounds = array<i64: 16, 32>}, {pipeline_mode = #tpu.pipeline_mode<synchronous>, transform_indices = @transform_9, window_bounds = array<i64: 1, 32>}, {pipeline_mode = #tpu.pipeline_mode<synchronous>, transform_indices = @transform_10, window_bounds = array<i64: 32, 32>}, {pipeline_mode = #tpu.pipeline_mode<synchronous>, transform_indices = @transform_11, window_bounds = array<i64: 32, 32>}, {pipeline_mode = #tpu.pipeline_mode<synchronous>, transform_indices = @transform_12, window_bounds = array<i64: 1, 32>}, {transform_indices = @transform_13, window_bounds = array<i64: 1, 256, 32>}]} {
    %c0 = arith.constant 0 : index
    %c0_0 = arith.constant 0 : index
    %c0_1 = arith.constant 0 : index
    %0 = vector.load %arg2[%c0, %c0_0, %c0_1] : memref<1x256x32xbf16, #tpu.memory_space<vmem>>, vector<1x256x32xbf16>
    %1 = vector.shape_cast %0 : vector<1x256x32xbf16> to vector<256x32xbf16>
    %c0_2 = arith.constant 0 : index
    %c0_3 = arith.constant 0 : index
    %2 = vector.load %arg6[%c0_2, %c0_3] : memref<32x16xbf16, #tpu.memory_space<vmem>>, vector<32x16xbf16>
    %cst = arith.constant dense<0.000000e+00> : vector<256x16xf32>
    %3 = tpu.matmul %1, %2, %cst {dimension_numbers = #tpu.dot_dimension_numbers<[1], [0], [0], [1], [0, 0, 1, 1], [], []>} : vector<256x32xbf16>, vector<32x16xbf16>, vector<256x16xf32> -> vector<256x16xf32>
    %c0_4 = arith.constant 0 : index
    %c0_5 = arith.constant 0 : index
    %4 = vector.load %arg7[%c0_4, %c0_5] : memref<1x16xf32, #tpu.memory_space<vmem>>, vector<1x16xf32>
    %5 = vector.broadcast %4 : vector<1x16xf32> to vector<256x16xf32>
    %6 = arith.addf %3, %5 : vector<256x16xf32>
    %cst_6 = arith.constant 0.000000e+00 : f32
    %7 = vector.broadcast %cst_6 : f32 to vector<256x16xf32>
    %8 = arith.maximumf %6, %7 : vector<256x16xf32>
    %9 = arith.truncf %8 : vector<256x16xf32> to vector<256x16xbf16>
    %c0_7 = arith.constant 0 : index
    %c0_8 = arith.constant 0 : index
    %10 = vector.load %arg8[%c0_7, %c0_8] : memref<16x16xbf16, #tpu.memory_space<vmem>>, vector<16x16xbf16>
    %cst_9 = arith.constant dense<0.000000e+00> : vector<256x16xf32>
    %11 = tpu.matmul %9, %10, %cst_9 {dimension_numbers = #tpu.dot_dimension_numbers<[1], [0], [0], [1], [0, 0, 1, 1], [], []>} : vector<256x16xbf16>, vector<16x16xbf16>, vector<256x16xf32> -> vector<256x16xf32>
    %c0_10 = arith.constant 0 : index
    %c0_11 = arith.constant 0 : index
    %12 = vector.load %arg9[%c0_10, %c0_11] : memref<1x16xf32, #tpu.memory_space<vmem>>, vector<1x16xf32>
    %13 = vector.broadcast %12 : vector<1x16xf32> to vector<256x16xf32>
    %14 = arith.addf %11, %13 : vector<256x16xf32>
    %cst_12 = arith.constant 0.000000e+00 : f32
    %15 = vector.broadcast %cst_12 : f32 to vector<256x16xf32>
    %16 = arith.maximumf %14, %15 : vector<256x16xf32>
    %17 = arith.truncf %16 : vector<256x16xf32> to vector<256x16xbf16>
    %c0_13 = arith.constant 0 : index
    %c0_14 = arith.constant 0 : index
    %c0_15 = arith.constant 0 : index
    %18 = vector.load %arg3[%c0_13, %c0_14, %c0_15] : memref<1x16x128xbf16, #tpu.memory_space<vmem>>, vector<1x16x128xbf16>
    %19 = vector.shape_cast %18 : vector<1x16x128xbf16> to vector<16x128xbf16>
    %cst_16 = arith.constant dense<0.000000e+00> : vector<256x128xf32>
    %20 = tpu.matmul %17, %19, %cst_16 {dimension_numbers = #tpu.dot_dimension_numbers<[1], [0], [0], [1], [0, 0, 1, 1], [], []>} : vector<256x16xbf16>, vector<16x128xbf16>, vector<256x128xf32> -> vector<256x128xf32>
    %c0_17 = arith.constant 0 : index
    %c0_18 = arith.constant 0 : index
    %21 = vector.load %arg5[%c0_17, %c0_18] : memref<1x128xf32, #tpu.memory_space<vmem>>, vector<1x128xf32>
    %22 = vector.broadcast %21 : vector<1x128xf32> to vector<256x128xf32>
    %23 = arith.addf %20, %22 : vector<256x128xf32>
    %cst_19 = arith.constant dense<0xFF800000> : vector<256xf32>
    %24 = vector.multi_reduction <maximumf>, %23, %cst_19 [1] : vector<256x128xf32> to vector<256xf32>
    %25 = vector.shape_cast %24 : vector<256xf32> to vector<256x1xf32>
    %26 = vector.broadcast %25 : vector<256x1xf32> to vector<256x128xf32>
    %27 = arith.subf %23, %26 : vector<256x128xf32>
    %28 = math.exp %27 : vector<256x128xf32>
    %cst_20 = arith.constant dense<0.000000e+00> : vector<256xf32>
    %29 = vector.multi_reduction <add>, %28, %cst_20 [1] : vector<256x128xf32> to vector<256xf32>
    %30 = vector.shape_cast %29 : vector<256xf32> to vector<256x1xf32>
    %31 = tpu.reciprocal %30 {approx = true} : vector<256x1xf32> -> vector<256x1xf32>
    %32 = vector.broadcast %31 : vector<256x1xf32> to vector<256x128xf32>
    %33 = arith.mulf %28, %32 : vector<256x128xf32>
    %34 = arith.truncf %33 : vector<256x128xf32> to vector<256x128xbf16>
    %c0_21 = arith.constant 0 : index
    %c0_22 = arith.constant 0 : index
    %c0_23 = arith.constant 0 : index
    %35 = vector.load %arg4[%c0_21, %c0_22, %c0_23] : memref<1x128x16xbf16, #tpu.memory_space<vmem>>, vector<1x128x16xbf16>
    %36 = vector.shape_cast %35 : vector<1x128x16xbf16> to vector<128x16xbf16>
    %cst_24 = arith.constant dense<0.000000e+00> : vector<256x16xf32>
    %37 = tpu.matmul %34, %36, %cst_24 {dimension_numbers = #tpu.dot_dimension_numbers<[1], [0], [0], [1], [0, 0, 1, 1], [], []>} : vector<256x128xbf16>, vector<128x16xbf16>, vector<256x16xf32> -> vector<256x16xf32>
    %38 = arith.truncf %37 : vector<256x16xf32> to vector<256x16xbf16>
    %c0_25 = arith.constant 0 : index
    %c0_26 = arith.constant 0 : index
    %39 = vector.load %arg10[%c0_25, %c0_26] : memref<16x32xbf16, #tpu.memory_space<vmem>>, vector<16x32xbf16>
    %cst_27 = arith.constant dense<0.000000e+00> : vector<256x32xf32>
    %40 = tpu.matmul %38, %39, %cst_27 {dimension_numbers = #tpu.dot_dimension_numbers<[1], [0], [0], [1], [0, 0, 1, 1], [], []>} : vector<256x16xbf16>, vector<16x32xbf16>, vector<256x32xf32> -> vector<256x32xf32>
    %c0_28 = arith.constant 0 : index
    %c0_29 = arith.constant 0 : index
    %41 = vector.load %arg11[%c0_28, %c0_29] : memref<1x32xf32, #tpu.memory_space<vmem>>, vector<1x32xf32>
    %42 = vector.broadcast %41 : vector<1x32xf32> to vector<256x32xf32>
    %43 = arith.addf %40, %42 : vector<256x32xf32>
    %cst_30 = arith.constant 0.000000e+00 : f32
    %44 = vector.broadcast %cst_30 : f32 to vector<256x32xf32>
    %45 = arith.maximumf %43, %44 : vector<256x32xf32>
    %46 = arith.truncf %45 : vector<256x32xf32> to vector<256x32xbf16>
    %c0_31 = arith.constant 0 : index
    %c0_32 = arith.constant 0 : index
    %47 = vector.load %arg12[%c0_31, %c0_32] : memref<32x32xbf16, #tpu.memory_space<vmem>>, vector<32x32xbf16>
    %cst_33 = arith.constant dense<0.000000e+00> : vector<256x32xf32>
    %48 = tpu.matmul %46, %47, %cst_33 {dimension_numbers = #tpu.dot_dimension_numbers<[1], [0], [0], [1], [0, 0, 1, 1], [], []>} : vector<256x32xbf16>, vector<32x32xbf16>, vector<256x32xf32> -> vector<256x32xf32>
    %c0_34 = arith.constant 0 : index
    %c0_35 = arith.constant 0 : index
    %c0_36 = arith.constant 0 : index
    %49 = vector.load %arg2[%c0_34, %c0_35, %c0_36] : memref<1x256x32xbf16, #tpu.memory_space<vmem>>, vector<1x256x32xbf16>
    %50 = vector.shape_cast %49 : vector<1x256x32xbf16> to vector<256x32xbf16>
    %c0_37 = arith.constant 0 : index
    %c0_38 = arith.constant 0 : index
    %51 = vector.load %arg13[%c0_37, %c0_38] : memref<32x32xbf16, #tpu.memory_space<vmem>>, vector<32x32xbf16>
    %cst_39 = arith.constant dense<0.000000e+00> : vector<256x32xf32>
    %52 = tpu.matmul %50, %51, %cst_39 {dimension_numbers = #tpu.dot_dimension_numbers<[1], [0], [0], [1], [0, 0, 1, 1], [], []>} : vector<256x32xbf16>, vector<32x32xbf16>, vector<256x32xf32> -> vector<256x32xf32>
    %53 = arith.addf %48, %52 : vector<256x32xf32>
    %c0_40 = arith.constant 0 : index
    %c0_41 = arith.constant 0 : index
    %54 = vector.load %arg14[%c0_40, %c0_41] : memref<1x32xf32, #tpu.memory_space<vmem>>, vector<1x32xf32>
    %55 = vector.broadcast %54 : vector<1x32xf32> to vector<256x32xf32>
    %56 = arith.addf %53, %55 : vector<256x32xf32>
    %cst_42 = arith.constant 0.000000e+00 : f32
    %57 = vector.broadcast %cst_42 : f32 to vector<256x32xf32>
    %58 = arith.maximumf %56, %57 : vector<256x32xf32>
    %59 = arith.truncf %58 : vector<256x32xf32> to vector<256x32xbf16>
    %c0_43 = arith.constant 0 : index
    %c0_44 = arith.constant 0 : index
    %c0_45 = arith.constant 0 : index
    %60 = vector.load %arg15[%c0_43, %c0_44, %c0_45] : memref<1x256x32xbf16, #tpu.memory_space<vmem>>, vector<1x256x32xbf16>
    %61 = vector.shape_cast %60 : vector<1x256x32xbf16> to vector<256x32xbf16>
    %62 = vector.shape_cast %59 : vector<256x32xbf16> to vector<1x256x32xbf16>
    tpu.vector_store %arg15[%c0_43, %c0_44, %c0_45], %62 {strides = array<i32>} : memref<1x256x32xbf16, #tpu.memory_space<vmem>>, vector<1x256x32xbf16>,
    return
  }
  func.func @transform_0(%arg0: i32, %arg1: i32) -> (i32, i32, i32) {
    %c0_i32 = arith.constant 0 : i32
    %c0_i32_0 = arith.constant 0 : i32
    return %arg0, %arg1, %c0_i32 : i32, i32, i32
  }
  func.func @transform_1(%arg0: i32, %arg1: i32) -> (i32, i32, i32) {
    %c0_i32 = arith.constant 0 : i32
    %c0_i32_0 = arith.constant 0 : i32
    %c0_i32_1 = arith.constant 0 : i32
    return %arg0, %c0_i32, %c0_i32_0 : i32, i32, i32
  }
  func.func @transform_2(%arg0: i32, %arg1: i32) -> (i32, i32, i32) {
    %c0_i32 = arith.constant 0 : i32
    %c0_i32_0 = arith.constant 0 : i32
    %c0_i32_1 = arith.constant 0 : i32
    return %arg0, %c0_i32, %c0_i32_0 : i32, i32, i32
  }
  func.func @transform_3(%arg0: i32, %arg1: i32) -> (i32, i32) {
    %c0_i32 = arith.constant 0 : i32
    %c0_i32_0 = arith.constant 0 : i32
    %c0_i32_1 = arith.constant 0 : i32
    return %c0_i32, %c0_i32_0 : i32, i32
  }
  func.func @transform_4(%arg0: i32, %arg1: i32) -> (i32, i32) {
    %c0_i32 = arith.constant 0 : i32
    %c0_i32_0 = arith.constant 0 : i32
    %c0_i32_1 = arith.constant 0 : i32
    return %c0_i32, %c0_i32_0 : i32, i32
  }
  func.func @transform_5(%arg0: i32, %arg1: i32) -> (i32, i32) {
    %c0_i32 = arith.constant 0 : i32
    %c0_i32_0 = arith.constant 0 : i32
    %c0_i32_1 = arith.constant 0 : i32
    return %c0_i32, %c0_i32_0 : i32, i32
  }
  func.func @transform_6(%arg0: i32, %arg1: i32) -> (i32, i32) {
    %c0_i32 = arith.constant 0 : i32
    %c0_i32_0 = arith.constant 0 : i32
    %c0_i32_1 = arith.constant 0 : i32
    return %c0_i32, %c0_i32_0 : i32, i32
  }
  func.func @transform_7(%arg0: i32, %arg1: i32) -> (i32, i32) {
    %c0_i32 = arith.constant 0 : i32
    %c0_i32_0 = arith.constant 0 : i32
    %c0_i32_1 = arith.constant 0 : i32
    return %c0_i32, %c0_i32_0 : i32, i32
  }
  func.func @transform_8(%arg0: i32, %arg1: i32) -> (i32, i32) {
    %c0_i32 = arith.constant 0 : i32
    %c0_i32_0 = arith.constant 0 : i32
    %c0_i32_1 = arith.constant 0 : i32
    return %c0_i32, %c0_i32_0 : i32, i32
  }
  func.func @transform_9(%arg0: i32, %arg1: i32) -> (i32, i32) {
    %c0_i32 = arith.constant 0 : i32
    %c0_i32_0 = arith.constant 0 : i32
    %c0_i32_1 = arith.constant 0 : i32
    return %c0_i32, %c0_i32_0 : i32, i32
  }
  func.func @transform_10(%arg0: i32, %arg1: i32) -> (i32, i32) {
    %c0_i32 = arith.constant 0 : i32
    %c0_i32_0 = arith.constant 0 : i32
    %c0_i32_1 = arith.constant 0 : i32
    return %c0_i32, %c0_i32_0 : i32, i32
  }
  func.func @transform_11(%arg0: i32, %arg1: i32) -> (i32, i32) {
    %c0_i32 = arith.constant 0 : i32
    %c0_i32_0 = arith.constant 0 : i32
    %c0_i32_1 = arith.constant 0 : i32
    return %c0_i32, %c0_i32_0 : i32, i32
  }
  func.func @transform_12(%arg0: i32, %arg1: i32) -> (i32, i32) {
    %c0_i32 = arith.constant 0 : i32
    %c0_i32_0 = arith.constant 0 : i32
    %c0_i32_1 = arith.constant 0 : i32
    return %c0_i32, %c0_i32_0 : i32, i32
  }
  func.func @transform_13(%arg0: i32, %arg1: i32) -> (i32, i32, i32) {
    %c0_i32 = arith.constant 0 : i32
    %c0_i32_0 = arith.constant 0 : i32
    return %arg0, %arg1, %c0_i32 : i32, i32, i32
  }
}

module attributes {stable_mosaic.version = 11 : i64} {
  func.func @ocr_kernel(%arg0: i32, %arg1: i32, %arg2: memref<1x256x32xbf16, #tpu.memory_space<vmem>>, %arg3: memref<1x16x128xbf16, #tpu.memory_space<vmem>>, %arg4: memref<1x128x16xbf16, #tpu.memory_space<vmem>>, %arg5: memref<1x128xf32, #tpu.memory_space<vmem>>, %arg6: memref<32x16xbf16, #tpu.memory_space<vmem>>, %arg7: memref<1x16xf32, #tpu.memory_space<vmem>>, %arg8: memref<16x16xbf16, #tpu.memory_space<vmem>>, %arg9: memref<1x16xf32, #tpu.memory_space<vmem>>, %arg10: memref<16x32xbf16, #tpu.memory_space<vmem>>, %arg11: memref<1x32xf32, #tpu.memory_space<vmem>>, %arg12: memref<32x32xbf16, #tpu.memory_space<vmem>>, %arg13: memref<32x32xbf16, #tpu.memory_space<vmem>>, %arg14: memref<1x32xf32, #tpu.memory_space<vmem>>, %arg15: memref<1x256x32xbf16, #tpu.memory_space<vmem>>) attributes {dimension_semantics = [#tpu.dimension_semantics<parallel>, #tpu.dimension_semantics<parallel>], iteration_bounds = array<i64: 2, 1>, scalar_prefetch = 0 : i64, scratch_operands = 0 : i64, tpu.core_type = #tpu.core_type<tc>, window_params = [{transform_indices = @transform_0, window_bounds = array<i64: 1, 256, 32>}, {transform_indices = @transform_1, window_bounds = array<i64: 1, 16, 128>}, {transform_indices = @transform_2, window_bounds = array<i64: 1, 128, 16>}, {pipeline_mode = #tpu.pipeline_mode<synchronous>, transform_indices = @transform_3, window_bounds = array<i64: 1, 128>}, {pipeline_mode = #tpu.pipeline_mode<synchronous>, transform_indices = @transform_4, window_bounds = array<i64: 32, 16>}, {pipeline_mode = #tpu.pipeline_mode<synchronous>, transform_indices = @transform_5, window_bounds = array<i64: 1, 16>}, {pipeline_mode = #tpu.pipeline_mode<synchronous>, transform_indices = @transform_6, window_bounds = array<i64: 16, 16>}, {pipeline_mode = #tpu.pipeline_mode<synchronous>, transform_indices = @transform_7, window_bounds = array<i64: 1, 16>}, {pipeline_mode = #tpu.pipeline_mode<synchronous>, transform_indices = @transform_8, window_bounds = array<i64: 16, 32>}, {pipeline_mode = #tpu.pipeline_mode<synchronous>, transform_indices = @transform_9, window_bounds = array<i64: 1, 32>}, {pipeline_mode = #tpu.pipeline_mode<synchronous>, transform_indices = @transform_10, window_bounds = array<i64: 32, 32>}, {pipeline_mode = #tpu.pipeline_mode<synchronous>, transform_indices = @transform_11, window_bounds = array<i64: 32, 32>}, {pipeline_mode = #tpu.pipeline_mode<synchronous>, transform_indices = @transform_12, window_bounds = array<i64: 1, 32>}, {transform_indices = @transform_13, window_bounds = array<i64: 1, 256, 32>}]} {
    %c0 = arith.constant 0 : index
    %c0_0 = arith.constant 0 : index
    %c0_1 = arith.constant 0 : index
    %0 = vector.load %arg2[%c0, %c0_0, %c0_1] : memref<1x256x32xbf16, #tpu.memory_space<vmem>>, vector<1x256x32xbf16>
    %1 = vector.shape_cast %0 : vector<1x256x32xbf16> to vector<256x32xbf16>
    %c0_2 = arith.constant 0 : index
    %c0_3 = arith.constant 0 : index
    %2 = vector.load %arg6[%c0_2, %c0_3] : memref<32x16xbf16, #tpu.memory_space<vmem>>, vector<32x16xbf16>
    %cst = arith.constant dense<0.000000e+00> : vector<256x16xf32>
    %3 = tpu.matmul %1, %2, %cst {dimension_numbers = #tpu.dot_dimension_numbers<[1], [0], [0], [1], [0, 0, 1, 1], [], []>} : vector<256x32xbf16>, vector<32x16xbf16>, vector<256x16xf32> -> vector<256x16xf32>
    %c0_4 = arith.constant 0 : index
    %c0_5 = arith.constant 0 : index
    %4 = vector.load %arg7[%c0_4, %c0_5] : memref<1x16xf32, #tpu.memory_space<vmem>>, vector<1x16xf32>
    %5 = vector.broadcast %4 : vector<1x16xf32> to vector<256x16xf32>
    %6 = arith.addf %3, %5 : vector<256x16xf32>
    %cst_6 = arith.constant 0.000000e+00 : f32
    %7 = vector.broadcast %cst_6 : f32 to vector<256x16xf32>
    %8 = arith.maximumf %6, %7 : vector<256x16xf32>
    %9 = arith.truncf %8 : vector<256x16xf32> to vector<256x16xbf16>
    %c0_7 = arith.constant 0 : index
    %c0_8 = arith.constant 0 : index
    %10 = vector.load %arg8[%c0_7, %c0_8] : memref<16x16xbf16, #tpu.memory_space<vmem>>, vector<16x16xbf16>
    %cst_9 = arith.constant dense<0.000000e+00> : vector<256x16xf32>
    %11 = tpu.matmul %9, %10, %cst_9 {dimension_numbers = #tpu.dot_dimension_numbers<[1], [0], [0], [1], [0, 0, 1, 1], [], []>} : vector<256x16xbf16>, vector<16x16xbf16>, vector<256x16xf32> -> vector<256x16xf32>
    %c0_10 = arith.constant 0 : index
    %c0_11 = arith.constant 0 : index
    %12 = vector.load %arg9[%c0_10, %c0_11] : memref<1x16xf32, #tpu.memory_space<vmem>>, vector<1x16xf32>
    %13 = vector.broadcast %12 : vector<1x16xf32> to vector<256x16xf32>
    %14 = arith.addf %11, %13 : vector<256x16xf32>
    %cst_12 = arith.constant 0.000000e+00 : f32
    %15 = vector.broadcast %cst_12 : f32 to vector<256x16xf32>
    %16 = arith.maximumf %14, %15 : vector<256x16xf32>
    %17 = arith.truncf %16 : vector<256x16xf32> to vector<256x16xbf16>
    %c0_13 = arith.constant 0 : index
    %c0_14 = arith.constant 0 : index
    %c0_15 = arith.constant 0 : index
    %18 = vector.load %arg3[%c0_13, %c0_14, %c0_15] : memref<1x16x128xbf16, #tpu.memory_space<vmem>>, vector<1x16x128xbf16>
    %19 = vector.shape_cast %18 : vector<1x16x128xbf16> to vector<16x128xbf16>
    %cst_16 = arith.constant dense<0.000000e+00> : vector<256x128xf32>
    %20 = tpu.matmul %17, %19, %cst_16 {dimension_numbers = #tpu.dot_dimension_numbers<[1], [0], [0], [1], [0, 0, 1, 1], [], []>} : vector<256x16xbf16>, vector<16x128xbf16>, vector<256x128xf32> -> vector<256x128xf32>
    %c0_17 = arith.constant 0 : index
    %c0_18 = arith.constant 0 : index
    %21 = vector.load %arg5[%c0_17, %c0_18] : memref<1x128xf32, #tpu.memory_space<vmem>>, vector<1x128xf32>
    %22 = vector.broadcast %21 : vector<1x128xf32> to vector<256x128xf32>
    %23 = arith.addf %20, %22 : vector<256x128xf32>
    %cst_19 = arith.constant dense<0xFF800000> : vector<256xf32>
    %24 = vector.multi_reduction <maximumf>, %23, %cst_19 [1] : vector<256x128xf32> to vector<256xf32>
    %25 = vector.shape_cast %24 : vector<256xf32> to vector<256x1xf32>
    %26 = vector.broadcast %25 : vector<256x1xf32> to vector<256x128xf32>
    %27 = arith.subf %23, %26 : vector<256x128xf32>
    %28 = math.exp %27 : vector<256x128xf32>
    %cst_20 = arith.constant dense<0.000000e+00> : vector<256xf32>
    %29 = vector.multi_reduction <add>, %28, %cst_20 [1] : vector<256x128xf32> to vector<256xf32>
    %30 = vector.shape_cast %29 : vector<256xf32> to vector<256x1xf32>
    %31 = tpu.reciprocal %30 {approx = true} : vector<256x1xf32> -> vector<256x1xf32>
    %32 = vector.broadcast %31 : vector<256x1xf32> to vector<256x128xf32>
    %33 = arith.mulf %28, %32 : vector<256x128xf32>
    %34 = arith.truncf %33 : vector<256x128xf32> to vector<256x128xbf16>
    %c0_21 = arith.constant 0 : index
    %c0_22 = arith.constant 0 : index
    %c0_23 = arith.constant 0 : index
    %35 = vector.load %arg4[%c0_21, %c0_22, %c0_23] : memref<1x128x16xbf16, #tpu.memory_space<vmem>>, vector<1x128x16xbf16>
    %36 = vector.shape_cast %35 : vector<1x128x16xbf16> to vector<128x16xbf16>
    %cst_24 = arith.constant dense<0.000000e+00> : vector<256x16xf32>
    %37 = tpu.matmul %34, %36, %cst_24 {dimension_numbers = #tpu.dot_dimension_numbers<[1], [0], [0], [1], [0, 0, 1, 1], [], []>} : vector<256x128xbf16>, vector<128x16xbf16>, vector<256x16xf32> -> vector<256x16xf32>
    %38 = arith.truncf %37 : vector<256x16xf32> to vector<256x16xbf16>
    %c0_25 = arith.constant 0 : index
    %c0_26 = arith.constant 0 : index
    %39 = vector.load %arg10[%c0_25, %c0_26] : memref<16x32xbf16, #tpu.memory_space<vmem>>, vector<16x32xbf16>
    %cst_27 = arith.constant dense<0.000000e+00> : vector<256x32xf32>
    %40 = tpu.matmul %38, %39, %cst_27 {dimension_numbers = #tpu.dot_dimension_numbers<[1], [0], [0], [1], [0, 0, 1, 1], [], []>} : vector<256x16xbf16>, vector<16x32xbf16>, vector<256x32xf32> -> vector<256x32xf32>
    %c0_28 = arith.constant 0 : index
    %c0_29 = arith.constant 0 : index
    %41 = vector.load %arg11[%c0_28, %c0_29] : memref<1x32xf32, #tpu.memory_space<vmem>>, vector<1x32xf32>
    %42 = vector.broadcast %41 : vector<1x32xf32> to vector<256x32xf32>
    %43 = arith.addf %40, %42 : vector<256x32xf32>
    %cst_30 = arith.constant 0.000000e+00 : f32
    %44 = vector.broadcast %cst_30 : f32 to vector<256x32xf32>
    %45 = arith.maximumf %43, %44 : vector<256x32xf32>
    %46 = arith.truncf %45 : vector<256x32xf32> to vector<256x32xbf16>
    %c0_31 = arith.constant 0 : index
    %c0_32 = arith.constant 0 : index
    %47 = vector.load %arg12[%c0_31, %c0_32] : memref<32x32xbf16, #tpu.memory_space<vmem>>, vector<32x32xbf16>
    %cst_33 = arith.constant dense<0.000000e+00> : vector<256x32xf32>
    %48 = tpu.matmul %46, %47, %cst_33 {dimension_numbers = #tpu.dot_dimension_numbers<[1], [0], [0], [1], [0, 0, 1, 1], [], []>} : vector<256x32xbf16>, vector<32x32xbf16>, vector<256x32xf32> -> vector<256x32xf32>
    %c0_34 = arith.constant 0 : index
    %c0_35 = arith.constant 0 : index
    %c0_36 = arith.constant 0 : index
    %49 = vector.load %arg2[%c0_34, %c0_35, %c0_36] : memref<1x256x32xbf16, #tpu.memory_space<vmem>>, vector<1x256x32xbf16>
    %50 = vector.shape_cast %49 : vector<1x256x32xbf16> to vector<256x32xbf16>
    %c0_37 = arith.constant 0 : index
    %c0_38 = arith.constant 0 : index
    %51 = vector.load %arg13[%c0_37, %c0_38] : memref<32x32xbf16, #tpu.memory_space<vmem>>, vector<32x32xbf16>
    %cst_39 = arith.constant dense<0.000000e+00> : vector<256x32xf32>
    %52 = tpu.matmul %50, %51, %cst_39 {dimension_numbers = #tpu.dot_dimension_numbers<[1], [0], [0], [1], [0, 0, 1, 1], [], []>} : vector<256x32xbf16>, vector<32x32xbf16>, vector<256x32xf32> -> vector<256x32xf32>
    %53 = arith.addf %48, %52 : vector<256x32xf32>
    %c0_40 = arith.constant 0 : index
    %c0_41 = arith.constant 0 : index
    %54 = vector.load %arg14[%c0_40, %c0_41] : memref<1x32xf32, #tpu.memory_space<vmem>>, vector<1x32xf32>
    %55 = vector.broadcast %54 : vector<1x32xf32> to vector<256x32xf32>
    %56 = arith.addf %53, %55 : vector<256x32xf32>
    %cst_42 = arith.constant 0.000000e+00 : f32
    %57 = vector.broadcast %cst_42 : f32 to vector<256x32xf32>
    %58 = arith.maximumf %56, %57 : vector<256x32xf32>
    %59 = arith.truncf %58 : vector<256x32xf32> to vector<256x32xbf16>
    %c0_43 = arith.constant 0 : index
    %c0_44 = arith.constant 0 : index
    %c0_45 = arith.constant 0 : index
    %60 = vector.load %arg15[%c0_43, %c0_44, %c0_45] : memref<1x256x32xbf16, #tpu.memory_space<vmem>>, vector<1x256x32xbf16>
    %61 = vector.shape_cast %60 : vector<1x256x32xbf16> to vector<256x32xbf16>
    %62 = vector.shape_cast %59 : vector<256x32xbf16> to vector<1x256x32xbf16>
    tpu.vector_store %arg15[%c0_43, %c0_44, %c0_45], %62 {strides = array<i32>} : memref<1x256x32xbf16, #tpu.memory_space<vmem>>, vector<1x256x32xbf16>,
    return
  }
  func.func @transform_0(%arg0: i32, %arg1: i32) -> (i32, i32, i32) {
    %c0_i32 = arith.constant 0 : i32
    %c0_i32_0 = arith.constant 0 : i32
    return %arg0, %arg1, %c0_i32 : i32, i32, i32
  }
  func.func @transform_1(%arg0: i32, %arg1: i32) -> (i32, i32, i32) {
    %c0_i32 = arith.constant 0 : i32
    %c0_i32_0 = arith.constant 0 : i32
    %c0_i32_1 = arith.constant 0 : i32
    return %arg0, %c0_i32, %c0_i32_0 : i32, i32, i32
  }
  func.func @transform_2(%arg0: i32, %arg1: i32) -> (i32, i32, i32) {
    %c0_i32 = arith.constant 0 : i32
    %c0_i32_0 = arith.constant 0 : i32
    %c0_i32_1 = arith.constant 0 : i32
    return %arg0, %c0_i32, %c0_i32_0 : i32, i32, i32
  }
  func.func @transform_3(%arg0: i32, %arg1: i32) -> (i32, i32) {
    %c0_i32 = arith.constant 0 : i32
    %c0_i32_0 = arith.constant 0 : i32
    %c0_i32_1 = arith.constant 0 : i32
    return %c0_i32, %c0_i32_0 : i32, i32
  }
  func.func @transform_4(%arg0: i32, %arg1: i32) -> (i32, i32) {
    %c0_i32 = arith.constant 0 : i32
    %c0_i32_0 = arith.constant 0 : i32
    %c0_i32_1 = arith.constant 0 : i32
    return %c0_i32, %c0_i32_0 : i32, i32
  }
  func.func @transform_5(%arg0: i32, %arg1: i32) -> (i32, i32) {
    %c0_i32 = arith.constant 0 : i32
    %c0_i32_0 = arith.constant 0 : i32
    %c0_i32_1 = arith.constant 0 : i32
    return %c0_i32, %c0_i32_0 : i32, i32
  }
  func.func @transform_6(%arg0: i32, %arg1: i32) -> (i32, i32) {
    %c0_i32 = arith.constant 0 : i32
    %c0_i32_0 = arith.constant 0 : i32
    %c0_i32_1 = arith.constant 0 : i32
    return %c0_i32, %c0_i32_0 : i32, i32
  }
  func.func @transform_7(%arg0: i32, %arg1: i32) -> (i32, i32) {
    %c0_i32 = arith.constant 0 : i32
    %c0_i32_0 = arith.constant 0 : i32
    %c0_i32_1 = arith.constant 0 : i32
    return %c0_i32, %c0_i32_0 : i32, i32
  }
  func.func @transform_8(%arg0: i32, %arg1: i32) -> (i32, i32) {
    %c0_i32 = arith.constant 0 : i32
    %c0_i32_0 = arith.constant 0 : i32
    %c0_i32_1 = arith.constant 0 : i32
    return %c0_i32, %c0_i32_0 : i32, i32
  }
  func.func @transform_9(%arg0: i32, %arg1: i32) -> (i32, i32) {
    %c0_i32 = arith.constant 0 : i32
    %c0_i32_0 = arith.constant 0 : i32
    %c0_i32_1 = arith.constant 0 : i32
    return %c0_i32, %c0_i32_0 : i32, i32
  }
  func.func @transform_10(%arg0: i32, %arg1: i32) -> (i32, i32) {
    %c0_i32 = arith.constant 0 : i32
    %c0_i32_0 = arith.constant 0 : i32
    %c0_i32_1 = arith.constant 0 : i32
    return %c0_i32, %c0_i32_0 : i32, i32
  }
  func.func @transform_11(%arg0: i32, %arg1: i32) -> (i32, i32) {
    %c0_i32 = arith.constant 0 : i32
    %c0_i32_0 = arith.constant 0 : i32
    %c0_i32_1 = arith.constant 0 : i32
    return %c0_i32, %c0_i32_0 : i32, i32
  }
  func.func @transform_12(%arg0: i32, %arg1: i32) -> (i32, i32) {
    %c0_i32 = arith.constant 0 : i32
    %c0_i32_0 = arith.constant 0 : i32
    %c0_i32_1 = arith.constant 0 : i32
    return %c0_i32, %c0_i32_0 : i32, i32
  }
  func.func @transform_13(%arg0: i32, %arg1: i32) -> (i32, i32, i32) {
    %c0_i32 = arith.constant 0 : i32
    %c0_i32_0 = arith.constant 0 : i32
    return %arg0, %arg1, %c0_i32 : i32, i32, i32
  }
}

</mosaic_0001>

<bundles_post_ra>
// kernel: tpu_custom_call.1
= control target key start
LH: loop header
LB: loop body
LE: loop exit
PB: predicated region body
PF: predicated region fallthrough
CT: control target
= control target key end

     0   :  { %s3880_s25 = smov 0   ;;  %s3882_s26 = smov 0   ;;  %s4641_s0 = inlined_call_operand.vmem [shape: bf16[2,256,32], index: 0, kind: input, shape index: {}]   ;;  %s4642_s1 = inlined_call_operand.vmem [shape: bf16[2,16,128], index: 1, kind: input, shape index: {}]   ;;  %s4643_s2 = inlined_call_operand.vmem [shape: bf16[2,128,16], index: 2, kind: input, shape index: {}]   ;;  %s4644_s3 = inlined_call_operand.vmem [shape: f32[1,128], index: 3, kind: input, shape index: {}]   ;;  %s4645_s4 = inlined_call_operand.vmem [shape: bf16[32,16], index: 4, kind: input, shape index: {}]   ;;  %s4646_s5 = inlined_call_operand.vmem [shape: f32[1,16], index: 5, kind: input, shape index: {}]   ;;  %s4647_s6 = inlined_call_operand.vmem [shape: bf16[16,16], index: 6, kind: input, shape index: {}]   ;;  %s4648_s7 = inlined_call_operand.vmem [shape: f32[1,16], index: 7, kind: input, shape index: {}]   ;;  %s4649_s8 = inlined_call_operand.vmem [shape: bf16[16,32], index: 8, kind: input, shape index: {}]   ;;  %s4650_s9 = inlined_call_operand.vmem [shape: f32[1,32], index: 9, kind: input, shape index: {}]   ;;  %s4651_s10 = inlined_call_operand.vmem [shape: bf16[32,32], index: 10, kind: input, shape index: {}]   ;;  %s4652_s11 = inlined_call_operand.vmem [shape: bf16[32,32], index: 11, kind: input, shape index: {}]   ;;  %s4653_s12 = inlined_call_operand.vmem [shape: f32[1,32], index: 12, kind: input, shape index: {}]   ;;  %s4654_s13 = inlined_call_operand.vmem [shape: bf16[2,256,32], index: 13, kind: output, shape index: {}]  }
   0x1   :  { %s3884_s27 = smov 0  }
   0x2 LB: > { %s35_s28 = sadd.s32 1, %s3804_s26  ;;  %p2983_p0 = scmp.ge.s32.totalorder %s3808_s27, 1  ;;  %s3808_s27 = sphi %s3884_s27, %s23_s27   ;;  %s3804_s26 = sphi %s3882_s26, %s4656_s26   ;;  %s3800_s25 = sphi %s3880_s25, %s4655_s25  }
   0x3   : > { %p37_p1 = scmp.ge.s32.totalorder %s35_s28, 2  ;;  %p428_p2 = scmp.lt.s32.totalorder %s3808_s27, 3 }
   0x5   : > { %s4658_s28 = smov (%p37_p1, %s35_s28), 0  ;;  %p429_p3 = pnand %p2983_p0, %p428_p2 }
   0x6   : > { %p491_p4 = scmp.lt.s32.totalorder (!%p429_p3), %s3800_s25, 1 }
   0x7   : > { %432 = sbr.rel (%p429_p3) target bundleno = 1622 (0x656), region = 72 }
   0xc   : > { %v3609_v0 = vld [vmem:[%s4645_s4 + $0x8] sm:$0xff]   ;;  %v3610_v1 = vld [vmem:[%s4645_s4] sm:$0xff]   ;;  %s4660_s25 = smov (!%p491_p4, %s3800_s25), 1  ;;  %vm656_vm0 = vcmask 261120   ;;  %vm929_vm1 = vcmask 130048   ;;  %vm2829_vm2 = vcmask 257024  }
   0xd   : > { %3325 = vmatprep.subr.bf16.mxu0 %v3609_v0  ;;  %s3160_s16 = sshll.u32 %s4660_s25, 7  ;;  %v3627_v18 = vld [vmem:[%s4647_s6] sm:$0xff]   ;;  %s3161_s22 = sshll.u32 %s4660_s25, 3 }
   0xe   : > { %3326 = vmatpush3.bf16.msra.mxu0 %v3609_v0  ;;  %s3912_s19 = scalar_lea.vmem %s4641_s0, %s3160_s16  ;;  %3361 = vmatprep.subr.bf16.mxu1 %v3627_v18  ;;  %s504_s29 = scalar_lea.vmem %s4642_s1, %s3161_s22  ;;  %v3956_v22 = vld [vmem:[%s4646_s5] ss:$0 sm:$0xff] }
   0xf   : > { %3327 = vmatprep.subr.bf16.mxu0 %v3610_v1  ;;  %v3611_v2 = vld [vmem:[%s3912_s19] sm:$0xff]   ;;  %v3612_v3 = vld [vmem:[%s3912_s19 + $0x8] sm:$0xff]   ;;  %v3613_v4 = vld [vmem:[%s3912_s19 + $0x10] sm:$0xff]   ;;  %3362 = vmatpush3.bf16.msra.mxu1 %v3627_v18  ;;  %s3162_s21 = sshll.u32 %s4660_s25, 6  ;;  %s4510_s17 = scalar_lea.vmem %s4654_s13, %s3160_s16 }
  0x10   : > { %3329 = vmatprep.mubr.msk.bf16.mxu0 %vm656_vm0, %v3611_v2  ;;  %v3614_v5 = vld [vmem:[%s3912_s19 + $0x18] sm:$0xff]   ;;  %v3615_v6 = vld [vmem:[%s3912_s19 + $0x20] sm:$0xff]   ;;  %v3616_v7 = vld [vmem:[%s3912_s19 + $0x28] sm:$0xff]   ;;  %s4196_s24 = scalar_lea.vmem %s4643_s2, %s3162_s21 }
  0x11   : > { %v3617_v8 = vld [vmem:[%s3912_s19 + $0x30] sm:$0xff]   ;;  %v3618_v9 = vld [vmem:[%s3912_s19 + $0x38] sm:$0xff]   ;;  %v3619_v10 = vld [vmem:[%s3912_s19 + $0x40] sm:$0xff]  }
  0x12   : > { %3328 = vmatpush3.bf16.msra.mxu0 %v3610_v1  ;;  %v3620_v11 = vld [vmem:[%s3912_s19 + $0x48] sm:$0xff]   ;;  %v3621_v12 = vld [vmem:[%s3912_s19 + $0x50] sm:$0xff]   ;;  %v3622_v13 = vld [vmem:[%s3912_s19 + $0x58] sm:$0xff]  }
  0x13   : > { %v3623_v14 = vld [vmem:[%s3912_s19 + $0x60] sm:$0xff]   ;;  %v3624_v15 = vld [vmem:[%s3912_s19 + $0x68] sm:$0xff]   ;;  %v3625_v16 = vld [vmem:[%s3912_s19 + $0x70] sm:$0xff]  }
  0x14   : > { %v3626_v17 = vld [vmem:[%s3912_s19 + $0x78] sm:$0xff]   ;;  %v3628_v19 = vld [vmem:[%s504_s29] sm:$0xff]  }
  0x15   : > { %3330 = vmatmul.mubr.msk.bf16.vlgmr.msra.gmra.mxu0 %vm656_vm0, %v3612_v3  ;;  %3395 = vmatprep.subr.bf16.mxu1 %v3628_v19 }
  0x16   : > { %3333 = vmatprep.mubr.msk.bf16.mxu0 %vm656_vm0, %v3613_v4 }
  0x1d   : > { %3334 = vmatmul.mubr.msk.bf16.gmra.mxu0 %vm656_vm0, %v3614_v5 }
  0x1e   : > { %3337 = vmatprep.mubr.msk.bf16.mxu0 %vm656_vm0, %v3615_v6 }
  0x25   : > { %3338 = vmatmul.mubr.msk.bf16.gmra.mxu0 %vm656_vm0, %v3616_v7 }
  0x26   : > { %3341 = vmatprep.mubr.msk.bf16.mxu0 %vm656_vm0, %v3617_v8 }
  0x2d   : > { %3342 = vmatmul.mubr.msk.bf16.gmra.mxu0 %vm656_vm0, %v3618_v9 }
  0x2e   : > { %3345 = vmatprep.mubr.msk.bf16.mxu0 %vm656_vm0, %v3619_v10 }
  0x35   : > { %3346 = vmatmul.mubr.msk.bf16.gmra.mxu0 %vm656_vm0, %v3620_v11 }
  0x36   : > { %3349 = vmatprep.mubr.msk.bf16.mxu0 %vm656_vm0, %v3621_v12 }
  0x3d   : > { %3350 = vmatmul.mubr.msk.bf16.gmra.mxu0 %vm656_vm0, %v3622_v13 }
  0x3e   : > { %3353 = vmatprep.mubr.msk.bf16.mxu0 %vm656_vm0, %v3623_v14 }
  0x45   : > { %3354 = vmatmul.mubr.msk.bf16.gmra.mxu0 %vm656_vm0, %v3624_v15 }
  0x46   : > { %3357 = vmatprep.mubr.msk.bf16.mxu0 %vm656_vm0, %v3625_v16 }
  0x4d   : > { %3358 = vmatmul.mubr.msk.bf16.gmra.mxu0 %vm656_vm0, %v3626_v17 }
  0xd5   : > { %v3331_v20 = vpop.f32.mrf.mxu0 }
  0xd6   : > { %v748_v26 = vadd.f32 %v3331_v20, %v3956_v22 }
  0xd7   : > { %v739_v21 = vpop.f32.mrf.mxu0 }
  0xd8   : > { %v740_v24 = vadd.f32 %v3956_v22, %v739_v21  ;;  %v868_v33 = vmax.f32 %v748_v26, 0.0 }
  0xd9   : > { %v3332_v23 = vpop.f32.mrf.mxu0 }
  0xda   : > { %v751_v25 = vadd.f32 %v3332_v23, %v3956_v22  ;;  %v866_v31 = vmax.f32 %v740_v24, 0.0 }
  0xdb   : > { %v742_v27 = vpop.f32.mrf.mxu0 }
  0xdc   : > { %v743_v28 = vadd.f32 %v3956_v22, %v742_v27  ;;  %v869_v29 = vmax.f32 %v751_v25, 0.0 }
  0xdd   : > { %v3335_v30 = vpop.f32.mrf.mxu0 }
  0xde   : > { %v867_v32 = vmax.f32 %v743_v28, 0.0  ;;  %v899_v36 = vpack.c.bf16 %v869_v29, %v868_v33  ;;  %v764_v40 = vadd.f32 %v3335_v30, %v3956_v22 }
  0xdf   : > { %v755_v34 = vpop.f32.mrf.mxu0 }
  0xe0   : > { %v898_v35 = vpack.c.bf16 %v867_v32, %v866_v31  ;;  %v756_v38 = vadd.f32 %v3956_v22, %v755_v34  ;;  %v872_v47 = vmax.f32 %v764_v40, 0.0 }
  0xe1   : > { %v3336_v37 = vpop.f32.mrf.mxu0 }
  0xe2   : > { %v767_v39 = vadd.f32 %v3336_v37, %v3956_v22  ;;  %3363 = vmatprep.mubr.msk.bf16.mxu1 %vm929_vm1, %v898_v35  ;;  %v870_v45 = vmax.f32 %v756_v38, 0.0 }
  0xe3   : > { %v758_v41 = vpop.f32.mrf.mxu0  ;;  %3364 = vmatmul.mubr.msk.bf16.vlgmr.msra.gmra.mxu1 %vm929_vm1, %v899_v36 }
  0xe4   : > { %v759_v42 = vadd.f32 %v3956_v22, %v758_v41  ;;  %3396 = vmatpush3.bf16.msra.mxu1 %v3628_v19  ;;  %v873_v43 = vmax.f32 %v767_v39, 0.0 }
  0xe5   : > { %v3339_v44 = vpop.f32.mrf.mxu0 }
  0xe6   : > { %v871_v46 = vmax.f32 %v759_v42, 0.0  ;;  %v901_v50 = vpack.c.bf16 %v873_v43, %v872_v47  ;;  %v780_v54 = vadd.f32 %v3339_v44, %v3956_v22 }
  0xe7   : > { %v771_v48 = vpop.f32.mrf.mxu0 }
  0xe8   : > { %v900_v49 = vpack.c.bf16 %v871_v46, %v870_v45  ;;  %v772_v52 = vadd.f32 %v3956_v22, %v771_v48  ;;  %v876_v61 = vmax.f32 %v780_v54, 0.0 }
  0xe9   : > { %v3340_v51 = vpop.f32.mrf.mxu0 }
  0xea   : > { %v783_v53 = vadd.f32 %v3340_v51, %v3956_v22  ;;  %3367 = vmatprep.mubr.msk.bf16.mxu1 %vm929_vm1, %v900_v49  ;;  %v874_v59 = vmax.f32 %v772_v52, 0.0 }
  0xeb   : > { %v774_v55 = vpop.f32.mrf.mxu0  ;;  %3368 = vmatmul.mubr.msk.bf16.gmra.mxu1 %vm929_vm1, %v901_v50 }
  0xec   : > { %v775_v56 = vadd.f32 %v3956_v22, %v774_v55  ;;  %v877_v57 = vmax.f32 %v783_v53, 0.0 }
  0xed   : > { %v3343_v58 = vpop.f32.mrf.mxu0 }
  0xee   : > { %v875_v60 = vmax.f32 %v775_v56, 0.0  ;;  %v903_v0 = vpack.c.bf16 %v877_v57, %v876_v61  ;;  %v796_v4 = vadd.f32 %v3343_v58, %v3956_v22 }
  0xef   : > { %v787_v62 = vpop.f32.mrf.mxu0 }
  0xf0   : > { %v902_v63 = vpack.c.bf16 %v875_v60, %v874_v59  ;;  %v788_v2 = vadd.f32 %v3956_v22, %v787_v62  ;;  %v880_v11 = vmax.f32 %v796_v4, 0.0 }
  0xf1   : > { %v3344_v1 = vpop.f32.mrf.mxu0 }
  0xf2   : > { %v799_v3 = vadd.f32 %v3344_v1, %v3956_v22  ;;  %3371 = vmatprep.mubr.msk.bf16.mxu1 %vm929_vm1, %v902_v63  ;;  %v878_v9 = vmax.f32 %v788_v2, 0.0 }
  0xf3   : > { %v790_v5 = vpop.f32.mrf.mxu0  ;;  %3372 = vmatmul.mubr.msk.bf16.gmra.mxu1 %vm929_vm1, %v903_v0 }
  0xf4   : > { %v791_v6 = vadd.f32 %v3956_v22, %v790_v5  ;;  %v881_v7 = vmax.f32 %v799_v3, 0.0 }
  0xf5   : > { %v3347_v8 = vpop.f32.mrf.mxu0 }
  0xf6   : > { %v879_v10 = vmax.f32 %v791_v6, 0.0  ;;  %v905_v14 = vpack.c.bf16 %v881_v7, %v880_v11  ;;  %v812_v18 = vadd.f32 %v3347_v8, %v3956_v22  ;;  %v4009_v8 = vld [vmem:[%s4648_s7] ss:$0 sm:$0xff] }
  0xf7   : > { %v803_v12 = vpop.f32.mrf.mxu0 }
  0xf8   : > { %v904_v13 = vpack.c.bf16 %v879_v10, %v878_v9  ;;  %v804_v16 = vadd.f32 %v3956_v22, %v803_v12  ;;  %v884_v26 = vmax.f32 %v812_v18, 0.0 }
  0xf9   : > { %v3348_v15 = vpop.f32.mrf.mxu0 }
  0xfa   : > { %v815_v17 = vadd.f32 %v3348_v15, %v3956_v22  ;;  %3375 = vmatprep.mubr.msk.bf16.mxu1 %vm929_vm1, %v904_v13  ;;  %v882_v24 = vmax.f32 %v804_v16, 0.0 }
  0xfb   : > { %v806_v19 = vpop.f32.mrf.mxu0  ;;  %3376 = vmatmul.mubr.msk.bf16.gmra.mxu1 %vm929_vm1, %v905_v14 }
  0xfc   : > { %v807_v20 = vadd.f32 %v3956_v22, %v806_v19  ;;  %v885_v21 = vmax.f32 %v815_v17, 0.0 }
  0xfd   : > { %v3351_v23 = vpop.f32.mrf.mxu0 }
  0xfe   : > { %v883_v25 = vmax.f32 %v807_v20, 0.0  ;;  %v907_v29 = vpack.c.bf16 %v885_v21, %v884_v26  ;;  %v828_v33 = vadd.f32 %v3351_v23, %v3956_v22 }
  0xff   : > { %v819_v27 = vpop.f32.mrf.mxu0 }
 0x100   : > { %v906_v28 = vpack.c.bf16 %v883_v25, %v882_v24  ;;  %v820_v31 = vadd.f32 %v3956_v22, %v819_v27  ;;  %v888_v40 = vmax.f32 %v828_v33, 0.0 }
 0x101   : > { %v3352_v30 = vpop.f32.mrf.mxu0 }
 0x102   : > { %v831_v32 = vadd.f32 %v3352_v30, %v3956_v22  ;;  %3379 = vmatprep.mubr.msk.bf16.mxu1 %vm929_vm1, %v906_v28  ;;  %v886_v38 = vmax.f32 %v820_v31, 0.0 }
 0x103   : > { %v822_v34 = vpop.f32.mrf.mxu0  ;;  %3380 = vmatmul.mubr.msk.bf16.gmra.mxu1 %vm929_vm1, %v907_v29 }
 0x104   : > { %v823_v35 = vadd.f32 %v3956_v22, %v822_v34  ;;  %v889_v36 = vmax.f32 %v831_v32, 0.0 }
 0x105   : > { %v3355_v37 = vpop.f32.mrf.mxu0 }
 0x106   : > { %v887_v39 = vmax.f32 %v823_v35, 0.0  ;;  %v909_v43 = vpack.c.bf16 %v889_v36, %v888_v40  ;;  %v844_v47 = vadd.f32 %v3355_v37, %v3956_v22 }
 0x107   : > { %v835_v41 = vpop.f32.mrf.mxu0 }
 0x108   : > { %v908_v42 = vpack.c.bf16 %v887_v39, %v886_v38  ;;  %v836_v45 = vadd.f32 %v3956_v22, %v835_v41  ;;  %v892_v54 = vmax.f32 %v844_v47, 0.0 }
 0x109   : > { %v3356_v44 = vpop.f32.mrf.mxu0 }
 0x10a   : > { %v847_v46 = vadd.f32 %v3356_v44, %v3956_v22  ;;  %3383 = vmatprep.mubr.msk.bf16.mxu1 %vm929_vm1, %v908_v42  ;;  %v890_v52 = vmax.f32 %v836_v45, 0.0 }
 0x10b   : > { %v838_v48 = vpop.f32.mrf.mxu0  ;;  %3384 = vmatmul.mubr.msk.bf16.gmra.mxu1 %vm929_vm1, %v909_v43 }
 0x10c   : > { %v839_v49 = vadd.f32 %v3956_v22, %v838_v48  ;;  %v893_v50 = vmax.f32 %v847_v46, 0.0 }
 0x10d   : > { %v3359_v51 = vpop.f32.mrf.mxu0 }
 0x10e   : > { %v891_v53 = vmax.f32 %v839_v49, 0.0  ;;  %v911_v57 = vpack.c.bf16 %v893_v50, %v892_v54  ;;  %v860_v61 = vadd.f32 %v3359_v51, %v3956_v22 }
 0x10f   : > { %v851_v55 = vpop.f32.mrf.mxu0 }
 0x110   : > { %v910_v56 = vpack.c.bf16 %v891_v53, %v890_v52  ;;  %v852_v59 = vadd.f32 %v3956_v22, %v851_v55  ;;  %v896_v3 = vmax.f32 %v860_v61, 0.0 }
 0x111   : > { %v3360_v58 = vpop.f32.mrf.mxu0 }
 0x112   : > { %v863_v60 = vadd.f32 %v3360_v58, %v3956_v22  ;;  %3387 = vmatprep.mubr.msk.bf16.mxu1 %vm929_vm1, %v910_v56  ;;  %v894_v1 = vmax.f32 %v852_v59, 0.0 }
 0x113   : > { %v854_v62 = vpop.f32.mrf.mxu0  ;;  %3388 = vmatmul.mubr.msk.bf16.gmra.mxu1 %vm929_vm1, %v911_v57 }
 0x114   : > { %v855_v63 = vadd.f32 %v3956_v22, %v854_v62  ;;  %v897_v0 = vmax.f32 %v863_v60, 0.0 }
 0x116   : > { %v895_v2 = vmax.f32 %v855_v63, 0.0  ;;  %v913_v5 = vpack.c.bf16 %v897_v0, %v896_v3 }
 0x118   : > { %v912_v4 = vpack.c.bf16 %v895_v2, %v894_v1 }
 0x11a   : > { %3391 = vmatprep.mubr.msk.bf16.mxu1 %vm929_vm1, %v912_v4 }
 0x11b   : > { %3392 = vmatmul.mubr.msk.bf16.gmra.mxu1 %vm929_vm1, %v913_v5 }
 0x1a3   : > { %v3365_v6 = vpop.f32.mrf.mxu1 }
 0x1a4   : > { %v1021_v11 = vadd.f32 %v3365_v6, %v4009_v8 }
 0x1a5   : > { %v1012_v7 = vpop.f32.mrf.mxu1 }
 0x1a6   : > { %v1013_v22 = vadd.f32 %v4009_v8, %v1012_v7  ;;  %v1141_v18 = vmax.f32 %v1021_v11, 0.0 }
 0x1a7   : > { %v3366_v9 = vpop.f32.mrf.mxu1 }
 0x1a8   : > { %v1024_v10 = vadd.f32 %v3366_v9, %v4009_v8  ;;  %v1139_v16 = vmax.f32 %v1013_v22, 0.0 }
 0x1a9   : > { %v1015_v12 = vpop.f32.mrf.mxu1 }
 0x1aa   : > { %v1016_v13 = vadd.f32 %v4009_v8, %v1015_v12  ;;  %v1142_v14 = vmax.f32 %v1024_v10, 0.0 }
 0x1ab   : > { %v3369_v15 = vpop.f32.mrf.mxu1 }
 0x1ac   : > { %v1140_v17 = vmax.f32 %v1016_v13, 0.0  ;;  %v1172_v21 = vpack.c.bf16 %v1142_v14, %v1141_v18  ;;  %v1037_v26 = vadd.f32 %v3369_v15, %v4009_v8 }
 0x1ad   : > { %v1028_v19 = vpop.f32.mrf.mxu1 }
 0x1ae   : > { %v1171_v20 = vpack.c.bf16 %v1140_v17, %v1139_v16  ;;  %v1029_v24 = vadd.f32 %v4009_v8, %v1028_v19  ;;  %v1145_v33 = vmax.f32 %v1037_v26, 0.0 }
 0x1af   : > { %v3370_v23 = vpop.f32.mrf.mxu1 }
 0x1b0   : > { %v1040_v25 = vadd.f32 %v3370_v23, %v4009_v8  ;;  %3397 = vmatprep.mubr.msk.bf16.mxu1 %vm929_vm1, %v1171_v20  ;;  %v1143_v31 = vmax.f32 %v1029_v24, 0.0 }
 0x1b1   : > { %v1031_v27 = vpop.f32.mrf.mxu1  ;;  %3398 = vmatmul.mubr.msk.bf16.vlgmr.msra.gmra.mxu1 %vm929_vm1, %v1172_v21 }
 0x1b2   : > { %v1032_v28 = vadd.f32 %v4009_v8, %v1031_v27  ;;  %v1146_v29 = vmax.f32 %v1040_v25, 0.0 }
 0x1b3   : > { %v3373_v30 = vpop.f32.mrf.mxu1 }
 0x1b4   : > { %v1144_v32 = vmax.f32 %v1032_v28, 0.0  ;;  %v1174_v36 = vpack.c.bf16 %v1146_v29, %v1145_v33  ;;  %v1053_v40 = vadd.f32 %v3373_v30, %v4009_v8 }
 0x1b5   : > { %v1044_v34 = vpop.f32.mrf.mxu1 }
 0x1b6   : > { %v1173_v35 = vpack.c.bf16 %v1144_v32, %v1143_v31  ;;  %v1045_v38 = vadd.f32 %v4009_v8, %v1044_v34  ;;  %v1149_v47 = vmax.f32 %v1053_v40, 0.0 }
 0x1b7   : > { %v3374_v37 = vpop.f32.mrf.mxu1 }
 0x1b8   : > { %v1056_v39 = vadd.f32 %v3374_v37, %v4009_v8  ;;  %3401 = vmatprep.mubr.msk.bf16.mxu1 %vm929_vm1, %v1173_v35  ;;  %v1147_v45 = vmax.f32 %v1045_v38, 0.0 }
 0x1b9   : > { %v1047_v41 = vpop.f32.mrf.mxu1  ;;  %3402 = vmatmul.mubr.msk.bf16.gmra.mxu1 %vm929_vm1, %v1174_v36 }
 0x1ba   : > { %v1048_v42 = vadd.f32 %v4009_v8, %v1047_v41  ;;  %v1150_v43 = vmax.f32 %v1056_v39, 0.0 }
 0x1bb   : > { %v3377_v44 = vpop.f32.mrf.mxu1 }
 0x1bc   : > { %v1148_v46 = vmax.f32 %v1048_v42, 0.0  ;;  %v1176_v50 = vpack.c.bf16 %v1150_v43, %v1149_v47  ;;  %v1069_v54 = vadd.f32 %v3377_v44, %v4009_v8 }
 0x1bd   : > { %v1060_v48 = vpop.f32.mrf.mxu1 }
 0x1be   : > { %v1175_v49 = vpack.c.bf16 %v1148_v46, %v1147_v45  ;;  %v1061_v52 = vadd.f32 %v4009_v8, %v1060_v48  ;;  %v1153_v61 = vmax.f32 %v1069_v54, 0.0 }
 0x1bf   : > { %v3378_v51 = vpop.f32.mrf.mxu1 }
 0x1c0   : > { %v1072_v53 = vadd.f32 %v3378_v51, %v4009_v8  ;;  %3405 = vmatprep.mubr.msk.bf16.mxu1 %vm929_vm1, %v1175_v49  ;;  %v1151_v59 = vmax.f32 %v1061_v52, 0.0 }
 0x1c1   : > { %v1063_v55 = vpop.f32.mrf.mxu1  ;;  %3406 = vmatmul.mubr.msk.bf16.gmra.mxu1 %vm929_vm1, %v1176_v50 }
 0x1c2   : > { %v1064_v56 = vadd.f32 %v4009_v8, %v1063_v55  ;;  %v1154_v57 = vmax.f32 %v1072_v53, 0.0 }
 0x1c3   : > { %v3381_v58 = vpop.f32.mrf.mxu1 }
 0x1c4   : > { %v1152_v60 = vmax.f32 %v1064_v56, 0.0  ;;  %v1178_v0 = vpack.c.bf16 %v1154_v57, %v1153_v61  ;;  %v1085_v4 = vadd.f32 %v3381_v58, %v4009_v8  ;;  %v4062_v56 = vld [vmem:[%s4644_s3] ss:$0 sm:$0xff] }
 0x1c5   : > { %v1076_v62 = vpop.f32.mrf.mxu1 }
 0x1c6   : > { %v1177_v63 = vpack.c.bf16 %v1152_v60, %v1151_v59  ;;  %v1077_v2 = vadd.f32 %v4009_v8, %v1076_v62  ;;  %v1157_v11 = vmax.f32 %v1085_v4, 0.0 }
 0x1c7   : > { %v3382_v1 = vpop.f32.mrf.mxu1 }
 0x1c8   : > { %v1088_v3 = vadd.f32 %v3382_v1, %v4009_v8  ;;  %3409 = vmatprep.mubr.msk.bf16.mxu1 %vm929_vm1, %v1177_v63  ;;  %v1155_v22 = vmax.f32 %v1077_v2, 0.0 }
 0x1c9   : > { %v1079_v5 = vpop.f32.mrf.mxu1  ;;  %3410 = vmatmul.mubr.msk.bf16.gmra.mxu1 %vm929_vm1, %v1178_v0 }
 0x1ca   : > { %v1080_v6 = vadd.f32 %v4009_v8, %v1079_v5  ;;  %v1158_v7 = vmax.f32 %v1088_v3, 0.0 }
 0x1cb   : > { %v3385_v9 = vpop.f32.mrf.mxu1 }
 0x1cc   : > { %v1156_v10 = vmax.f32 %v1080_v6, 0.0  ;;  %v1180_v14 = vpack.c.bf16 %v1158_v7, %v1157_v11  ;;  %v1101_v18 = vadd.f32 %v3385_v9, %v4009_v8 }
 0x1cd   : > { %v1092_v12 = vpop.f32.mrf.mxu1 }
 0x1ce   : > { %v1179_v13 = vpack.c.bf16 %v1156_v10, %v1155_v22  ;;  %v1093_v16 = vadd.f32 %v4009_v8, %v1092_v12  ;;  %v1161_v26 = vmax.f32 %v1101_v18, 0.0 }
 0x1cf   : > { %v3386_v15 = vpop.f32.mrf.mxu1 }
 0x1d0   : > { %v1104_v17 = vadd.f32 %v3386_v15, %v4009_v8  ;;  %3413 = vmatprep.mubr.msk.bf16.mxu1 %vm929_vm1, %v1179_v13  ;;  %v1159_v24 = vmax.f32 %v1093_v16, 0.0 }
 0x1d1   : > { %v1095_v19 = vpop.f32.mrf.mxu1  ;;  %3414 = vmatmul.mubr.msk.bf16.gmra.mxu1 %vm929_vm1, %v1180_v14 }
 0x1d2   : > { %v1096_v20 = vadd.f32 %v4009_v8, %v1095_v19  ;;  %v1162_v21 = vmax.f32 %v1104_v17, 0.0 }
 0x1d3   : > { %v3389_v23 = vpop.f32.mrf.mxu1 }
 0x1d4   : > { %v1160_v25 = vmax.f32 %v1096_v20, 0.0  ;;  %v1182_v29 = vpack.c.bf16 %v1162_v21, %v1161_v26  ;;  %v1117_v33 = vadd.f32 %v3389_v23, %v4009_v8 }
 0x1d5   : > { %v1108_v27 = vpop.f32.mrf.mxu1 }
 0x1d6   : > { %v1181_v28 = vpack.c.bf16 %v1160_v25, %v1159_v24  ;;  %v1109_v31 = vadd.f32 %v4009_v8, %v1108_v27  ;;  %v1165_v40 = vmax.f32 %v1117_v33, 0.0 }
 0x1d7   : > { %v3390_v30 = vpop.f32.mrf.mxu1 }
 0x1d8   : > { %v1120_v32 = vadd.f32 %v3390_v30, %v4009_v8  ;;  %3417 = vmatprep.mubr.msk.bf16.mxu1 %vm929_vm1, %v1181_v28  ;;  %v1163_v38 = vmax.f32 %v1109_v31, 0.0 }
 0x1d9   : > { %v1111_v34 = vpop.f32.mrf.mxu1  ;;  %3418 = vmatmul.mubr.msk.bf16.gmra.mxu1 %vm929_vm1, %v1182_v29 }
 0x1da   : > { %v1112_v35 = vadd.f32 %v4009_v8, %v1111_v34  ;;  %v1166_v36 = vmax.f32 %v1120_v32, 0.0 }
 0x1db   : > { %v3393_v37 = vpop.f32.mrf.mxu1 }
 0x1dc   : > { %v1164_v39 = vmax.f32 %v1112_v35, 0.0  ;;  %v1184_v43 = vpack.c.bf16 %v1166_v36, %v1165_v40  ;;  %v1133_v47 = vadd.f32 %v3393_v37, %v4009_v8 }
 0x1dd   : > { %v1124_v41 = vpop.f32.mrf.mxu1 }
 0x1de   : > { %v1183_v42 = vpack.c.bf16 %v1164_v39, %v1163_v38  ;;  %v1125_v45 = vadd.f32 %v4009_v8, %v1124_v41  ;;  %v1169_v53 = vmax.f32 %v1133_v47, 0.0 }
 0x1df   : > { %v3394_v44 = vpop.f32.mrf.mxu1 }
 0x1e0   : > { %v1136_v46 = vadd.f32 %v3394_v44, %v4009_v8  ;;  %3421 = vmatprep.mubr.msk.bf16.mxu1 %vm929_vm1, %v1183_v42  ;;  %v1167_v51 = vmax.f32 %v1125_v45, 0.0 }
 0x1e1   : > { %v1127_v48 = vpop.f32.mrf.mxu1  ;;  %3422 = vmatmul.mubr.msk.bf16.gmra.mxu1 %vm929_vm1, %v1184_v43 }
 0x1e2   : > { %v1128_v49 = vadd.f32 %v4009_v8, %v1127_v48  ;;  %v1170_v50 = vmax.f32 %v1136_v46, 0.0 }
 0x1e4   : > { %v1168_v52 = vmax.f32 %v1128_v49, 0.0  ;;  %v1186_v55 = vpack.c.bf16 %v1170_v50, %v1169_v53 }
 0x1e6   : > { %v1185_v54 = vpack.c.bf16 %v1168_v52, %v1167_v51 }
 0x1e8   : > { %3425 = vmatprep.mubr.msk.bf16.mxu1 %vm929_vm1, %v1185_v54 }
 0x1e9   : > { %3426 = vmatmul.mubr.msk.bf16.gmra.mxu1 %vm929_vm1, %v1186_v55 }
 0x271   : > { %v3399_v57 = vpop.f32.mrf.mxu1 }
 0x272   : > { %v4065_v58 = vadd.f32 %v3399_v57, %v4062_v56 }
 0x273   : > { %v1284_v8 = vpop.f32.mrf.mxu1 }
 0x274   : > { %v4068_v59 = vadd.f32 %v4062_v56, %v1284_v8  ;;  %1415 = vmax.xlane.f32.xlu1 %v4065_v58  ;;  %v3629_v8 = vld [vmem:[%s4196_s24 + $0x38] sm:$0xff]  }
 0x275   : > { %v3400_v60 = vpop.f32.mrf.mxu1  ;;  %3429 = vmatprep.subr.bf16.mxu0 %v3629_v8 }
 0x276   : > { %v4072_v61 = vadd.f32 %v3400_v60, %v4062_v56  ;;  %1411 = vmax.xlane.f32.xlu0 %v4068_v59  ;;  %v3630_v60 = vld [vmem:[%s4196_s24 + $0x30] sm:$0xff]   ;;  %3430 = vmatpush3.bf16.msra.mxu0 %v3629_v8 }
 0x277   : > { %v1287_v62 = vpop.f32.mrf.mxu1  ;;  %3431 = vmatprep.subr.bf16.mxu0 %v3630_v60 }
 0x278   : > { %v4076_v63 = vadd.f32 %v4062_v56, %v1287_v62  ;;  %1417 = vmax.xlane.f32.xlu1 %v4072_v61  ;;  %v3632_v62 = vld [vmem:[%s4196_s24 + $0x20] sm:$0xff]  }
 0x279   : > { %v3403_v0 = vpop.f32.mrf.mxu1 }
 0x27a   : > { %1413 = vmax.xlane.f32.xlu0 %v4076_v63  ;;  %v4085_v5 = vadd.f32 %v3403_v0, %v4062_v56  ;;  %3432 = vmatpush3.bf16.msra.mxu0 %v3630_v60  ;;  %v3633_v0 = vld [vmem:[%s4196_s24 + $0x18] sm:$0xff]  }
 0x27b   : > { %v1300_v1 = vpop.f32.mrf.mxu1 }
 0x27c   : > { %v4081_v2 = vadd.f32 %v4062_v56, %v1300_v1 }
 0x27d   : > { %v3404_v3 = vpop.f32.mrf.mxu1 }
 0x27e   : > { %1419 = vmax.xlane.f32.xlu0 %v4081_v2  ;;  %v4093_v22 = vadd.f32 %v3404_v3, %v4062_v56 }
 0x27f   : > { %v1303_v4 = vpop.f32.mrf.mxu1 }
 0x280   : > { %v4088_v6 = vadd.f32 %v4062_v56, %v1303_v4 }
 0x281   : > { %v3407_v7 = vpop.f32.mrf.mxu1 }
 0x282   : > { %1421 = vmax.xlane.f32.xlu1 %v4088_v6  ;;  %1423 = vmax.xlane.f32.xlu0 %v4085_v5  ;;  %v4101_v13 = vadd.f32 %v3407_v7, %v4062_v56 }
 0x283   : > { %v1316_v9 = vpop.f32.mrf.mxu1 }
 0x284   : > { %v4096_v10 = vadd.f32 %v4062_v56, %v1316_v9 }
 0x285   : > { %v3408_v11 = vpop.f32.mrf.mxu1 }
 0x286   : > { %1425 = vmax.xlane.f32.xlu1 %v4093_v22  ;;  %1427 = vmax.xlane.f32.xlu0 %v4096_v10  ;;  %v4109_v17 = vadd.f32 %v3408_v11, %v4062_v56 }
 0x287   : > { %v1319_v12 = vpop.f32.mrf.mxu1 }
 0x288   : > { %v4104_v14 = vadd.f32 %v4062_v56, %v1319_v12 }
 0x289   : > { %v3411_v15 = vpop.f32.mrf.mxu1 }
 0x28a   : > { %1429 = vmax.xlane.f32.xlu1 %v4104_v14  ;;  %1431 = vmax.xlane.f32.xlu0 %v4101_v13  ;;  %v4117_v21 = vadd.f32 %v3411_v15, %v4062_v56 }
 0x28b   : > { %v1332_v16 = vpop.f32.mrf.mxu1 }
 0x28c   : > { %v4112_v18 = vadd.f32 %v4062_v56, %v1332_v16 }
 0x28d   : > { %v3412_v19 = vpop.f32.mrf.mxu1 }
 0x28e   : > { %1433 = vmax.xlane.f32.xlu1 %v4109_v17  ;;  %1435 = vmax.xlane.f32.xlu0 %v4112_v18  ;;  %v4125_v26 = vadd.f32 %v3412_v19, %v4062_v56 }
 0x28f   : > { %v1335_v20 = vpop.f32.mrf.mxu1 }
 0x290   : > { %v4120_v23 = vadd.f32 %v4062_v56, %v1335_v20 }
 0x291   : > { %v3415_v24 = vpop.f32.mrf.mxu1 }
 0x292   : > { %1437 = vmax.xlane.f32.xlu1 %v4120_v23  ;;  %1439 = vmax.xlane.f32.xlu0 %v4117_v21  ;;  %v4133_v30 = vadd.f32 %v3415_v24, %v4062_v56 }
 0x293   : > { %v1348_v25 = vpop.f32.mrf.mxu1 }
 0x294   : > { %v4128_v27 = vadd.f32 %v4062_v56, %v1348_v25 }
 0x295   : > { %v3416_v28 = vpop.f32.mrf.mxu1 }
 0x296   : > { %1441 = vmax.xlane.f32.xlu1 %v4125_v26  ;;  %1443 = vmax.xlane.f32.xlu0 %v4128_v27  ;;  %v4141_v34 = vadd.f32 %v3416_v28, %v4062_v56 }
 0x297   : > { %v1351_v29 = vpop.f32.mrf.mxu1 }
 0x298   : > { %v4136_v31 = vadd.f32 %v4062_v56, %v1351_v29 }
 0x299   : > { %v3419_v32 = vpop.f32.mrf.mxu1 }
 0x29a   : > { %1445 = vmax.xlane.f32.xlu1 %v4136_v31  ;;  %1447 = vmax.xlane.f32.xlu0 %v4133_v30  ;;  %v4149_v38 = vadd.f32 %v3419_v32, %v4062_v56 }
 0x29b   : > { %v1364_v33 = vpop.f32.mrf.mxu1 }
 0x29c   : > { %v4144_v35 = vadd.f32 %v4062_v56, %v1364_v33 }
 0x29d   : > { %v3420_v36 = vpop.f32.mrf.mxu1 }
 0x29e   : > { %1449 = vmax.xlane.f32.xlu1 %v4141_v34  ;;  %1451 = vmax.xlane.f32.xlu0 %v4144_v35  ;;  %v4157_v42 = vadd.f32 %v3420_v36, %v4062_v56 }
 0x29f   : > { %v1367_v37 = vpop.f32.mrf.mxu1 }
 0x2a0   : > { %v4152_v39 = vadd.f32 %v4062_v56, %v1367_v37 }
 0x2a1   : > { %v3423_v40 = vpop.f32.mrf.mxu1 }
 0x2a2   : > { %1453 = vmax.xlane.f32.xlu1 %v4152_v39  ;;  %1455 = vmax.xlane.f32.xlu0 %v4149_v38  ;;  %v4165_v46 = vadd.f32 %v3423_v40, %v4062_v56 }
 0x2a3   : > { %v1380_v41 = vpop.f32.mrf.mxu1 }
 0x2a4   : > { %v4160_v43 = vadd.f32 %v4062_v56, %v1380_v41 }
 0x2a5   : > { %v3424_v44 = vpop.f32.mrf.mxu1 }
 0x2a6   : > { %1457 = vmax.xlane.f32.xlu1 %v4157_v42  ;;  %1459 = vmax.xlane.f32.xlu0 %v4160_v43  ;;  %v4173_v50 = vadd.f32 %v3424_v44, %v4062_v56 }
 0x2a7   : > { %v1383_v45 = vpop.f32.mrf.mxu1 }
 0x2a8   : > { %v4168_v47 = vadd.f32 %v4062_v56, %v1383_v45 }
 0x2a9   : > { %v3427_v48 = vpop.f32.mrf.mxu1 }
 0x2aa   : > { %1461 = vmax.xlane.f32.xlu1 %v4168_v47  ;;  %1463 = vmax.xlane.f32.xlu0 %v4165_v46  ;;  %v4181_v54 = vadd.f32 %v3427_v48, %v4062_v56 }
 0x2ab   : > { %v1396_v49 = vpop.f32.mrf.mxu1 }
 0x2ac   : > { %v4176_v51 = vadd.f32 %v4062_v56, %v1396_v49 }
 0x2ad   : > { %v3428_v52 = vpop.f32.mrf.mxu1 }
 0x2ae   : > { %1465 = vmax.xlane.f32.xlu1 %v4173_v50  ;;  %1467 = vmax.xlane.f32.xlu0 %v4176_v51  ;;  %v4189_v57 = vadd.f32 %v3428_v52, %v4062_v56 }
 0x2af   : > { %v1399_v53 = vpop.f32.mrf.mxu1 }
 0x2b0   : > { %v4184_v55 = vadd.f32 %v4062_v56, %v1399_v53  ;;  %v3631_v56 = vld [vmem:[%s4196_s24 + $0x28] sm:$0xff]  }
 0x2b1   : > { %3433 = vmatprep.subr.bf16.mxu0 %v3631_v56 }
 0x2b2   : > { %1469 = vmax.xlane.f32.xlu1 %v4184_v55  ;;  %1471 = vmax.xlane.f32.xlu0 %v4181_v54 }
 0x2b3   : > { %3434 = vmatpush3.bf16.msra.mxu0 %v3631_v56 }
 0x2b4   : > { %3435 = vmatprep.subr.bf16.mxu0 %v3632_v62 }
 0x2b6   : > { %1473 = vmax.xlane.f32.xlu1 %v4189_v57 }
 0x2b7   : > { %3436 = vmatpush3.bf16.msra.mxu0 %v3632_v62 }
 0x2b8   : > { %3437 = vmatprep.subr.bf16.mxu0 %v3633_v0 }
 0x2bb   : > { %3438 = vmatpush3.bf16.msra.mxu0 %v3633_v0 }
 0x2fd   : > { %v1416_v1 = vpop.xlane.xlu1 %1415 }
 0x2fe   : > { %v1477_v3 = vsub.f32 %v4065_v58, %v1416_v1 }
 0x2ff   : > { %v1412_v4 = vpop.xlane.xlu0 %1411 }
 0x300   : > { %v1475_v7 = vsub.f32 %v4068_v59, %v1412_v4  ;;  %v1511_v12 = vmul.f32 1.442695, %v1477_v3 }
 0x301   : > { %v1418_v9 = vpop.xlane.xlu1 %1417 }
 0x302   : > { %v1507_v11 = vmul.f32 1.442695, %v1475_v7  ;;  %v1478_v15 = vsub.f32 %v4072_v61, %v1418_v9 }
 0x303   : > { %v1414_v16 = vpop.xlane.xlu0 %1413 }
 0x304   : > { %3642 = vpow2.f32 %v1507_v11  ;;  %v1476_v19 = vsub.f32 %v4076_v63, %v1414_v16  ;;  %v1513_v24 = vmul.f32 1.442695, %v1478_v15  ;;  %v3634_v11 = vld [vmem:[%s4196_s24 + $0x10] sm:$0xff]  }
 0x305   : > { %3644 = vpow2.f32 %v1511_v12  ;;  %3439 = vmatprep.subr.bf16.mxu0 %v3634_v11 }
 0x306   : > { %v1509_v20 = vmul.f32 1.442695, %v1476_v19  ;;  %3440 = vmatpush3.bf16.msra.mxu0 %v3634_v11 }
 0x307   : > { %v1420_v25 = vpop.xlane.xlu0 %1419 }
 0x308   : > { %3646 = vpow2.f32 %v1509_v20  ;;  %v1479_v28 = vsub.f32 %v4081_v2, %v1420_v25 }
 0x309   : > { %3648 = vpow2.f32 %v1513_v24 }
 0x30a   : > { %v1515_v58 = vmul.f32 1.442695, %v1479_v28 }
 0x30b   : > { %v1422_v29 = vpop.xlane.xlu1 %1421  ;;  %v1424_v59 = vpop.xlane.xlu0 %1423 }
 0x30c   : > { %3650 = vpow2.f32 %v1515_v58  ;;  %v1480_v32 = vsub.f32 %v4088_v6, %v1422_v29  ;;  %v1481_v61 = vsub.f32 %v4085_v5, %v1424_v59 }
 0x30e   : > { %v1517_v33 = vmul.f32 1.442695, %v1480_v32  ;;  %v1519_v36 = vmul.f32 1.442695, %v1481_v61 }
 0x30f   : > { %v1426_v37 = vpop.xlane.xlu1 %1425  ;;  %v1428_v63 = vpop.xlane.xlu0 %1427 }
 0x310   : > { %3652 = vpow2.f32 %v1517_v33  ;;  %v1482_v40 = vsub.f32 %v4093_v22, %v1426_v37  ;;  %v1483_v41 = vsub.f32 %v4096_v10, %v1428_v63 }
 0x311   : > { %v4212_v44 = vpop.eup %3642  ;;  %3654 = vpow2.f32 %v1519_v36 }
 0x312   : > { %v1521_v2 = vmul.f32 1.442695, %v1482_v40  ;;  %v1523_v45 = vmul.f32 1.442695, %v1483_v41  ;;  %1571 = vadd.xlane.f32.xlu0 %v4212_v44  ;;  %v4215_v49 = vpop.eup %3644 }
 0x313   : > { %v1430_v48 = vpop.xlane.xlu1 %1429  ;;  %v1432_v6 = vpop.xlane.xlu0 %1431 }
 0x314   : > { %3656 = vpow2.f32 %v1521_v2  ;;  %v1484_v5 = vsub.f32 %v4104_v14, %v1430_v48  ;;  %v1485_v52 = vsub.f32 %v4101_v13, %v1432_v6 }
 0x315   : > { %v4219_v53 = vpop.eup %3646  ;;  %3658 = vpow2.f32 %v1523_v45 }
 0x316   : > { %v1525_v22 = vmul.f32 1.442695, %v1484_v5  ;;  %v1527_v10 = vmul.f32 1.442695, %v1485_v52  ;;  %1575 = vadd.xlane.f32.xlu0 %v4215_v49  ;;  %1573 = vadd.xlane.f32.xlu1 %v4219_v53  ;;  %v4223_v56 = vpop.eup %3648  ;;  %v3636_v52 = vld [vmem:[%s4196_s24] sm:$0xff]  }
 0x317   : > { %v1434_v8 = vpop.xlane.xlu1 %1433  ;;  %v1436_v60 = vpop.xlane.xlu0 %1435 }
 0x318   : > { %3660 = vpow2.f32 %v1525_v22  ;;  %v1486_v62 = vsub.f32 %v4109_v17, %v1434_v8  ;;  %v1487_v14 = vsub.f32 %v4112_v18, %v1436_v60 }
 0x319   : > { %v4227_v13 = vpop.eup %3650  ;;  %3662 = vpow2.f32 %v1527_v10 }
 0x31a   : > { %v1529_v0 = vmul.f32 1.442695, %v1486_v62  ;;  %v1531_v1 = vmul.f32 1.442695, %v1487_v14  ;;  %1577 = vadd.xlane.f32.xlu1 %v4223_v56  ;;  %1579 = vadd.xlane.f32.xlu0 %v4227_v13 }
 0x31b   : > { %v1438_v3 = vpop.xlane.xlu1 %1437  ;;  %v1440_v4 = vpop.xlane.xlu0 %1439 }
 0x31c   : > { %3664 = vpow2.f32 %v1529_v0  ;;  %v1488_v7 = vsub.f32 %v4120_v23, %v1438_v3  ;;  %v1489_v9 = vsub.f32 %v4117_v21, %v1440_v4 }
 0x31d   : > { %v4234_v17 = vpop.eup %3652  ;;  %3666 = vpow2.f32 %v1531_v1 }
 0x31e   : > { %v4236_v18 = vpop.eup %3654  ;;  %v1533_v12 = vmul.f32 1.442695, %v1488_v7  ;;  %v1535_v15 = vmul.f32 1.442695, %v1489_v9  ;;  %1581 = vadd.xlane.f32.xlu1 %v4234_v17 }
 0x31f   : > { %1583 = vadd.xlane.f32.xlu0 %v4236_v18  ;;  %v1442_v16 = vpop.xlane.xlu1 %1441  ;;  %v1444_v19 = vpop.xlane.xlu0 %1443 }
 0x320   : > { %3668 = vpow2.f32 %v1533_v12  ;;  %v1490_v23 = vsub.f32 %v4125_v26, %v1442_v16  ;;  %v1491_v21 = vsub.f32 %v4128_v27, %v1444_v19  ;;  %v3635_v27 = vld [vmem:[%s4196_s24 + $0x8] sm:$0xff]  }
 0x321   : > { %v4242_v20 = vpop.eup %3656  ;;  %3670 = vpow2.f32 %v1535_v15  ;;  %3441 = vmatprep.subr.bf16.mxu0 %v3635_v27 }
 0x322   : > { %v4244_v24 = vpop.eup %3658  ;;  %v1537_v25 = vmul.f32 1.442695, %v1490_v23  ;;  %v1539_v28 = vmul.f32 1.442695, %v1491_v21  ;;  %1585 = vadd.xlane.f32.xlu1 %v4242_v20  ;;  %3442 = vmatpush3.bf16.msra.mxu0 %v3635_v27 }
 0x323   : > { %1587 = vadd.xlane.f32.xlu0 %v4244_v24  ;;  %v1446_v58 = vpop.xlane.xlu1 %1445  ;;  %v1448_v29 = vpop.xlane.xlu0 %1447  ;;  %3443 = vmatprep.subr.bf16.mxu0 %v3636_v52 }
 0x324   : > { %3672 = vpow2.f32 %v1537_v25  ;;  %v1492_v59 = vsub.f32 %v4136_v31, %v1446_v58  ;;  %v1493_v26 = vsub.f32 %v4133_v30, %v1448_v29 }
 0x325   : > { %v4250_v32 = vpop.eup %3660  ;;  %3674 = vpow2.f32 %v1539_v28 }
 0x326   : > { %v4253_v61 = vpop.eup %3662  ;;  %v1541_v33 = vmul.f32 1.442695, %v1492_v59  ;;  %v1543_v36 = vmul.f32 1.442695, %v1493_v26  ;;  %1589 = vadd.xlane.f32.xlu1 %v4250_v32  ;;  %3444 = vmatpush3.bf16.msra.mxu0 %v3636_v52 }
 0x327   : > { %1591 = vadd.xlane.f32.xlu0 %v4253_v61  ;;  %v1450_v37 = vpop.xlane.xlu1 %1449  ;;  %v1452_v63 = vpop.xlane.xlu0 %1451 }
 0x328   : > { %3676 = vpow2.f32 %v1541_v33  ;;  %v1494_v31 = vsub.f32 %v4141_v34, %v1450_v37  ;;  %v1495_v30 = vsub.f32 %v4144_v35, %v1452_v63 }
 0x329   : > { %v4259_v40 = vpop.eup %3664  ;;  %3678 = vpow2.f32 %v1543_v36 }
 0x32a   : > { %v4261_v41 = vpop.eup %3666  ;;  %v1545_v2 = vmul.f32 1.442695, %v1494_v31  ;;  %v1547_v45 = vmul.f32 1.442695, %v1495_v30  ;;  %1593 = vadd.xlane.f32.xlu1 %v4259_v40 }
 0x32b   : > { %1595 = vadd.xlane.f32.xlu0 %v4261_v41  ;;  %v1454_v48 = vpop.xlane.xlu1 %1453  ;;  %v1456_v6 = vpop.xlane.xlu0 %1455 }
 0x32c   : > { %3680 = vpow2.f32 %v1545_v2  ;;  %v1496_v34 = vsub.f32 %v4152_v39, %v1454_v48  ;;  %v1497_v35 = vsub.f32 %v4149_v38, %v1456_v6 }
 0x32d   : > { %v4267_v5 = vpop.eup %3668  ;;  %3682 = vpow2.f32 %v1547_v45 }
 0x32e   : > { %v4270_v22 = vpop.eup %3670  ;;  %v1549_v10 = vmul.f32 1.442695, %v1496_v34  ;;  %v1551_v8 = vmul.f32 1.442695, %v1497_v35  ;;  %1597 = vadd.xlane.f32.xlu1 %v4267_v5  ;;  %v3637_v34 = vld [vmem:[%s4649_s8] sm:$0xff]  }
 0x32f   : > { %1599 = vadd.xlane.f32.xlu0 %v4270_v22  ;;  %v1458_v60 = vpop.xlane.xlu1 %1457  ;;  %v1460_v62 = vpop.xlane.xlu0 %1459  ;;  %3477 = vmatprep.subr.bf16.mxu0 %v3637_v34 }
 0x330   : > { %3684 = vpow2.f32 %v1549_v10  ;;  %v1498_v39 = vsub.f32 %v4157_v42, %v1458_v60  ;;  %v1499_v38 = vsub.f32 %v4160_v43, %v1460_v62  ;;  %3583 = vmatprep.subr.bf16.mxu1 %v3637_v34 }
 0x331   : > { %v4276_v14 = vpop.eup %3672  ;;  %3686 = vpow2.f32 %v1551_v8  ;;  %3584 = vmatpush3.bf16.msra.mxu1 %v3637_v34 }
 0x332   : > { %v4278_v0 = vpop.eup %3674  ;;  %v1553_v1 = vmul.f32 1.442695, %v1498_v39  ;;  %v1555_v3 = vmul.f32 1.442695, %v1499_v38  ;;  %1601 = vadd.xlane.f32.xlu1 %v4276_v14 }
 0x333   : > { %1603 = vadd.xlane.f32.xlu0 %v4278_v0  ;;  %v1462_v4 = vpop.xlane.xlu1 %1461  ;;  %v1464_v7 = vpop.xlane.xlu0 %1463 }
 0x334   : > { %3688 = vpow2.f32 %v1553_v1  ;;  %v1500_v9 = vsub.f32 %v4168_v47, %v1462_v4  ;;  %v1501_v42 = vsub.f32 %v4165_v46, %v1464_v7 }
 0x335   : > { %v4284_v43 = vpop.eup %3676  ;;  %3690 = vpow2.f32 %v1555_v3 }
 0x336   : > { %v4286_v11 = vpop.eup %3678  ;;  %v1557_v12 = vmul.f32 1.442695, %v1500_v9  ;;  %v1559_v15 = vmul.f32 1.442695, %v1501_v42  ;;  %1605 = vadd.xlane.f32.xlu1 %v4284_v43 }
 0x337   : > { %1607 = vadd.xlane.f32.xlu0 %v4286_v11  ;;  %v1466_v16 = vpop.xlane.xlu1 %1465  ;;  %v1468_v19 = vpop.xlane.xlu0 %1467 }
 0x338   : > { %3692 = vpow2.f32 %v1557_v12  ;;  %v1502_v23 = vsub.f32 %v4173_v50, %v1466_v16  ;;  %v1503_v47 = vsub.f32 %v4176_v51, %v1468_v19 }
 0x339   : > { %v4292_v21 = vpop.eup %3680  ;;  %3694 = vpow2.f32 %v1559_v15 }
 0x33a   : > { %v4294_v46 = vpop.eup %3682  ;;  %v1561_v25 = vmul.f32 1.442695, %v1502_v23  ;;  %v1563_v28 = vmul.f32 1.442695, %v1503_v47  ;;  %1609 = vadd.xlane.f32.xlu1 %v4292_v21 }
 0x33b   : > { %1611 = vadd.xlane.f32.xlu0 %v4294_v46  ;;  %v1470_v58 = vpop.xlane.xlu1 %1469  ;;  %v1472_v29 = vpop.xlane.xlu0 %1471 }
 0x33c   : > { %3696 = vpow2.f32 %v1561_v25  ;;  %v1504_v59 = vsub.f32 %v4184_v55, %v1470_v58  ;;  %v1505_v50 = vsub.f32 %v4181_v54, %v1472_v29 }
 0x33d   : > { %v4300_v26 = vpop.eup %3684  ;;  %3698 = vpow2.f32 %v1563_v28 }
 0x33e   : > { %v4302_v51 = vpop.eup %3686  ;;  %v1565_v27 = vmul.f32 1.442695, %v1504_v59  ;;  %v1567_v33 = vmul.f32 1.442695, %v1505_v50  ;;  %1613 = vadd.xlane.f32.xlu1 %v4300_v26 }
 0x33f   : > { %1615 = vadd.xlane.f32.xlu0 %v4302_v51  ;;  %v1474_v36 = vpop.xlane.xlu1 %1473 }
 0x340   : > { %3700 = vpow2.f32 %v1565_v27  ;;  %v1506_v37 = vsub.f32 %v4189_v57, %v1474_v36 }
 0x341   : > { %v4307_v63 = vpop.eup %3688  ;;  %3702 = vpow2.f32 %v1567_v33 }
 0x342   : > { %v4309_v55 = vpop.eup %3690  ;;  %v1569_v54 = vmul.f32 1.442695, %v1506_v37  ;;  %1617 = vadd.xlane.f32.xlu1 %v4307_v63 }
 0x343   : > { %1619 = vadd.xlane.f32.xlu0 %v4309_v55 }
 0x344   : > { %3704 = vpow2.f32 %v1569_v54 }
 0x345   : > { %v4313_v31 = vpop.eup %3692 }
 0x346   : > { %v4315_v30 = vpop.eup %3694  ;;  %1621 = vadd.xlane.f32.xlu1 %v4313_v31 }
 0x347   : > { %1623 = vadd.xlane.f32.xlu0 %v4315_v30 }
 0x349   : > { %v4319_v57 = vpop.eup %3696 }
 0x34a   : > { %v4321_v2 = vpop.eup %3698  ;;  %1625 = vadd.xlane.f32.xlu1 %v4319_v57 }
 0x34b   : > { %1627 = vadd.xlane.f32.xlu0 %v4321_v2 }
 0x34d   : > { %v4325_v45 = vpop.eup %3700 }
 0x34e   : > { %v4327_v48 = vpop.eup %3702  ;;  %1629 = vadd.xlane.f32.xlu1 %v4325_v45 }
 0x34f   : > { %1631 = vadd.xlane.f32.xlu0 %v4327_v48 }
 0x351   : > { %v4331_v6 = vpop.eup %3704 }
 0x352   : > { %1633 = vadd.xlane.f32.xlu1 %v4331_v6 }
 0x39b   : > { %v1572_v35 = vpop.xlane.xlu0 %1571 }
 0x39c   : > { %3706 = vrcp.f32 %v1572_v35 }
 0x39f   : > { %v1574_v52 = vpop.xlane.xlu1 %1573  ;;  %v1576_v10 = vpop.xlane.xlu0 %1575 }
 0x3a0   : > { %3708 = vrcp.f32 %v1574_v52 }
 0x3a1   : > { %3710 = vrcp.f32 %v1576_v10 }
 0x3a3   : > { %v1578_v8 = vpop.xlane.xlu1 %1577  ;;  %v1580_v60 = vpop.xlane.xlu0 %1579 }
 0x3a4   : > { %3712 = vrcp.f32 %v1578_v8 }
 0x3a5   : > { %3714 = vrcp.f32 %v1580_v60 }
 0x3a7   : > { %v1582_v62 = vpop.xlane.xlu1 %1581 }
 0x3a8   : > { %3716 = vrcp.f32 %v1582_v62  ;;  %v1584_v39 = vpop.xlane.xlu0 %1583 }
 0x3a9   : > { %3718 = vrcp.f32 %v1584_v39  ;;  %v3707_v38 = vpop.eup %3706 }
 0x3aa   : > { %v1667_v7 = vmul.f32 %v3707_v38, %v4212_v44 }
 0x3ab   : > { %v1586_v1 = vpop.xlane.xlu1 %1585 }
 0x3ac   : > { %3720 = vrcp.f32 %v1586_v1  ;;  %v1588_v3 = vpop.xlane.xlu0 %1587 }
 0x3ad   : > { %v3709_v4 = vpop.eup %3708  ;;  %3722 = vrcp.f32 %v1588_v3 }
 0x3ae   : > { %v1668_v9 = vmul.f32 %v3709_v4, %v4219_v53  ;;  %v3711_v42 = vpop.eup %3710 }
 0x3af   : > { %v1590_v12 = vpop.xlane.xlu1 %1589  ;;  %v1669_v23 = vmul.f32 %v3711_v42, %v4215_v49 }
 0x3b0   : > { %3724 = vrcp.f32 %v1590_v12  ;;  %v1592_v15 = vpop.xlane.xlu0 %1591  ;;  %v1699_v16 = vpack.c.bf16 %v1668_v9, %v1667_v7 }
 0x3b1   : > { %v3713_v19 = vpop.eup %3712  ;;  %3726 = vrcp.f32 %v1592_v15 }
 0x3b2   : > { %3445 = vmatprep.mubr.bf16.mxu0 %v1699_v16  ;;  %v1670_v47 = vmul.f32 %v3713_v19, %v4223_v56  ;;  %v3715_v25 = vpop.eup %3714 }
 0x3b3   : > { %v1594_v28 = vpop.xlane.xlu1 %1593  ;;  %v1671_v53 = vmul.f32 %v3715_v25, %v4227_v13 }
 0x3b4   : > { %3728 = vrcp.f32 %v1594_v28  ;;  %v1596_v58 = vpop.xlane.xlu0 %1595  ;;  %v1700_v29 = vpack.c.bf16 %v1670_v47, %v1669_v23 }
 0x3b5   : > { %v3717_v44 = vpop.eup %3716  ;;  %3730 = vrcp.f32 %v1596_v58 }
 0x3b6   : > { %3446 = vmatmul.mubr.bf16.vlgmr.msra.gmra.mxu0 %v1700_v29  ;;  %v1672_v59 = vmul.f32 %v3717_v44, %v4234_v17  ;;  %v3719_v50 = vpop.eup %3718 }
 0x3b7   : > { %v1598_v27 = vpop.xlane.xlu1 %1597  ;;  %3478 = vmatpush3.bf16.msra.mxu0 %v3637_v34  ;;  %v1673_v56 = vmul.f32 %v3719_v50, %v4236_v18 }
 0x3b8   : > { %3732 = vrcp.f32 %v1598_v27  ;;  %v1600_v33 = vpop.xlane.xlu0 %1599  ;;  %v1701_v49 = vpack.c.bf16 %v1672_v59, %v1671_v53 }
 0x3b9   : > { %v3721_v36 = vpop.eup %3720  ;;  %3734 = vrcp.f32 %v1600_v33 }
 0x3ba   : > { %3449 = vmatprep.mubr.bf16.mxu0 %v1701_v49  ;;  %v1674_v37 = vmul.f32 %v3721_v36, %v4242_v20  ;;  %v3723_v54 = vpop.eup %3722 }
 0x3bb   : > { %v1602_v35 = vpop.xlane.xlu1 %1601  ;;  %v1675_v17 = vmul.f32 %v3723_v54, %v4244_v24 }
 0x3bc   : > { %3736 = vrcp.f32 %v1602_v35  ;;  %v1604_v52 = vpop.xlane.xlu0 %1603  ;;  %v1702_v13 = vpack.c.bf16 %v1674_v37, %v1673_v56 }
 0x3bd   : > { %v3725_v10 = vpop.eup %3724  ;;  %3738 = vrcp.f32 %v1604_v52 }
 0x3be   : > { %3450 = vmatmul.mubr.bf16.gmra.mxu0 %v1702_v13  ;;  %v1676_v34 = vmul.f32 %v3725_v10, %v4250_v32  ;;  %v3727_v8 = vpop.eup %3726 }
 0x3bf   : > { %v1606_v60 = vpop.xlane.xlu1 %1605  ;;  %v1677_v20 = vmul.f32 %v3727_v8, %v4253_v61 }
 0x3c0   : > { %3740 = vrcp.f32 %v1606_v60  ;;  %v1608_v62 = vpop.xlane.xlu0 %1607  ;;  %v1703_v39 = vpack.c.bf16 %v1676_v34, %v1675_v17 }
 0x3c1   : > { %v3729_v18 = vpop.eup %3728  ;;  %3742 = vrcp.f32 %v1608_v62 }
 0x3c2   : > { %3453 = vmatprep.mubr.bf16.mxu0 %v1703_v39  ;;  %v1678_v38 = vmul.f32 %v3729_v18, %v4259_v40  ;;  %v3731_v1 = vpop.eup %3730 }
 0x3c3   : > { %v1610_v3 = vpop.xlane.xlu1 %1609  ;;  %v1679_v32 = vmul.f32 %v3731_v1, %v4261_v41 }
 0x3c4   : > { %3744 = vrcp.f32 %v1610_v3  ;;  %v1612_v4 = vpop.xlane.xlu0 %1611  ;;  %v1704_v7 = vpack.c.bf16 %v1678_v38, %v1677_v20 }
 0x3c5   : > { %v3733_v24 = vpop.eup %3732  ;;  %3746 = vrcp.f32 %v1612_v4 }
 0x3c6   : > { %3454 = vmatmul.mubr.bf16.gmra.mxu0 %v1704_v7  ;;  %v1680_v9 = vmul.f32 %v3733_v24, %v4267_v5  ;;  %v3735_v42 = vpop.eup %3734 }
 0x3c7   : > { %v1614_v12 = vpop.xlane.xlu1 %1613  ;;  %v1681_v40 = vmul.f32 %v3735_v42, %v4270_v22 }
 0x3c8   : > { %3748 = vrcp.f32 %v1614_v12  ;;  %v1616_v15 = vpop.xlane.xlu0 %1615  ;;  %v1705_v16 = vpack.c.bf16 %v1680_v9, %v1679_v32 }
 0x3c9   : > { %v3737_v61 = vpop.eup %3736  ;;  %3750 = vrcp.f32 %v1616_v15 }
 0x3ca   : > { %3457 = vmatprep.mubr.bf16.mxu0 %v1705_v16  ;;  %v1682_v19 = vmul.f32 %v3737_v61, %v4276_v14  ;;  %v3739_v23 = vpop.eup %3738 }
 0x3cb   : > { %v1618_v47 = vpop.xlane.xlu1 %1617  ;;  %v1683_v5 = vmul.f32 %v3739_v23, %v4278_v0 }
 0x3cc   : > { %3752 = vrcp.f32 %v1618_v47  ;;  %v1620_v25 = vpop.xlane.xlu0 %1619  ;;  %v1706_v28 = vpack.c.bf16 %v1682_v19, %v1681_v40 }
 0x3cd   : > { %v3741_v41 = vpop.eup %3740  ;;  %3754 = vrcp.f32 %v1620_v25 }
 0x3ce   : > { %3458 = vmatmul.mubr.bf16.gmra.mxu0 %v1706_v28  ;;  %v1684_v58 = vmul.f32 %v3741_v41, %v4284_v43  ;;  %v3743_v29 = vpop.eup %3742 }
 0x3cf   : > { %v1622_v44 = vpop.xlane.xlu1 %1621  ;;  %v1685_v14 = vmul.f32 %v3743_v29, %v4286_v11 }
 0x3d0   : > { %3756 = vrcp.f32 %v1622_v44  ;;  %v1624_v53 = vpop.xlane.xlu0 %1623  ;;  %v1707_v59 = vpack.c.bf16 %v1684_v58, %v1683_v5  ;;  %v3770_v44 = vld [vmem:[%s3912_s19] sm:$0xff]  }
 0x3d1   : > { %v3745_v22 = vpop.eup %3744  ;;  %3758 = vrcp.f32 %v1624_v53 }
 0x3d2   : > { %3461 = vmatprep.mubr.bf16.mxu0 %v1707_v59  ;;  %v1686_v50 = vmul.f32 %v3745_v22, %v4292_v21  ;;  %v3747_v27 = vpop.eup %3746 }
 0x3d3   : > { %v1626_v33 = vpop.xlane.xlu1 %1625  ;;  %v1687_v43 = vmul.f32 %v3747_v27, %v4294_v46  ;;  %v3640_v27 = vld [vmem:[%s4651_s10] sm:$0xff]  }
 0x3d4   : > { %3760 = vrcp.f32 %v1626_v33  ;;  %v1628_v49 = vpop.xlane.xlu0 %1627  ;;  %v1708_v36 = vpack.c.bf16 %v1686_v50, %v1685_v14 }
 0x3d5   : > { %v3749_v0 = vpop.eup %3748  ;;  %3762 = vrcp.f32 %v1628_v49 }
 0x3d6   : > { %3462 = vmatmul.mubr.bf16.gmra.mxu0 %v1708_v36  ;;  %v1688_v56 = vmul.f32 %v3749_v0, %v4300_v26  ;;  %v3751_v37 = vpop.eup %3750 }
 0x3d7   : > { %v1630_v54 = vpop.xlane.xlu1 %1629  ;;  %v1689_v21 = vmul.f32 %v3751_v37, %v4302_v51 }
 0x3d8   : > { %3764 = vrcp.f32 %v1630_v54  ;;  %v1632_v35 = vpop.xlane.xlu0 %1631  ;;  %v1709_v52 = vpack.c.bf16 %v1688_v56, %v1687_v43 }
 0x3d9   : > { %v3753_v11 = vpop.eup %3752  ;;  %3766 = vrcp.f32 %v1632_v35 }
 0x3da   : > { %3465 = vmatprep.mubr.bf16.mxu0 %v1709_v52  ;;  %v1690_v13 = vmul.f32 %v3753_v11, %v4307_v63  ;;  %v3755_v10 = vpop.eup %3754 }
 0x3db   : > { %v1634_v17 = vpop.xlane.xlu1 %1633  ;;  %v1691_v46 = vmul.f32 %v3755_v10, %v4309_v55 }
 0x3dc   : > { %3768 = vrcp.f32 %v1634_v17  ;;  %v1710_v34 = vpack.c.bf16 %v1690_v13, %v1689_v21 }
 0x3dd   : > { %v3757_v8 = vpop.eup %3756 }
 0x3de   : > { %3466 = vmatmul.mubr.bf16.gmra.mxu0 %v1710_v34  ;;  %v1692_v26 = vmul.f32 %v3757_v8, %v4313_v31  ;;  %v3759_v60 = vpop.eup %3758 }
 0x3df   : > { %v1693_v18 = vmul.f32 %v3759_v60, %v4315_v30  ;;  %v3638_v30 = vld [vmem:[%s4651_s10 + $0x8] sm:$0xff]  }
 0x3e0   : > { %v1711_v62 = vpack.c.bf16 %v1692_v26, %v1691_v46  ;;  %3547 = vmatprep.subr.bf16.mxu1 %v3638_v30 }
 0x3e1   : > { %v3761_v39 = vpop.eup %3760 }
 0x3e2   : > { %3469 = vmatprep.mubr.bf16.mxu0 %v1711_v62  ;;  %v1694_v51 = vmul.f32 %v3761_v39, %v4319_v57  ;;  %v3763_v20 = vpop.eup %3762  ;;  %v3639_v57 = vld [vmem:[%s4652_s11 + $0x8] sm:$0xff]  }
 0x3e3   : > { %v1695_v1 = vmul.f32 %v3763_v20, %v4321_v2  ;;  %3511 = vmatprep.subr.bf16.mxu0 %v3639_v57  ;;  %v3771_v20 = vld [vmem:[%s3912_s19 + $0x8] sm:$0xff]  }
 0x3e4   : > { %v1712_v63 = vpack.c.bf16 %v1694_v51, %v1693_v18  ;;  %v3641_v51 = vld [vmem:[%s4652_s11] sm:$0xff]  }
 0x3e5   : > { %v3765_v38 = vpop.eup %3764 }
 0x3e6   : > { %3470 = vmatmul.mubr.bf16.gmra.mxu0 %v1712_v63  ;;  %v1696_v3 = vmul.f32 %v3765_v38, %v4325_v45  ;;  %v3767_v4 = vpop.eup %3766  ;;  %v3772_v63 = vld [vmem:[%s3912_s19 + $0x10] sm:$0xff]   ;;  %v3773_v38 = vld [vmem:[%s3912_s19 + $0x18] sm:$0xff]  }
 0x3e7   : > { %v1697_v31 = vmul.f32 %v3767_v4, %v4327_v48  ;;  %v3776_v4 = vld [vmem:[%s3912_s19 + $0x30] sm:$0xff]  }
 0x3e8   : > { %v1713_v55 = vpack.c.bf16 %v1696_v3, %v1695_v1  ;;  %v3774_v1 = vld [vmem:[%s3912_s19 + $0x20] sm:$0xff]   ;;  %v3775_v3 = vld [vmem:[%s3912_s19 + $0x28] sm:$0xff]  }
 0x3e9   : > { %v3769_v7 = vpop.eup %3768 }
 0x3ea   : > { %3473 = vmatprep.mubr.bf16.mxu0 %v1713_v55  ;;  %v1698_v24 = vmul.f32 %v3769_v7, %v4331_v6  ;;  %v3777_v55 = vld [vmem:[%s3912_s19 + $0x38] sm:$0xff]   ;;  %v3778_v7 = vld [vmem:[%s3912_s19 + $0x40] sm:$0xff]  }
 0x3ec   : > { %v1714_v32 = vpack.c.bf16 %v1698_v24, %v1697_v31  ;;  %v3779_v31 = vld [vmem:[%s3912_s19 + $0x48] sm:$0xff]   ;;  %v3780_v24 = vld [vmem:[%s3912_s19 + $0x50] sm:$0xff]  }
 0x3ee   : > { %3474 = vmatmul.mubr.bf16.gmra.mxu0 %v1714_v32  ;;  %v3781_v32 = vld [vmem:[%s3912_s19 + $0x58] sm:$0xff]  }
 0x476   : > { %v3447_v2 = vpop.f32.mrf.mxu0 }
 0x478   : > { %v1813_v45 = vpop.f32.mrf.mxu0 }
 0x47a   : > { %v3448_v9 = vpop.f32.mrf.mxu0 }
 0x47b   : > { %v1941_v48 = vpack.c.bf16 %v3448_v9, %v3447_v2  ;;  %v3784_v2 = vld [vmem:[%s3912_s19 + $0x70] sm:$0xff]  }
 0x47c   : > { %v1816_v42 = vpop.f32.mrf.mxu0 }
 0x47d   : > { %v1940_v12 = vpack.c.bf16 %v1816_v42, %v1813_v45  ;;  %v3785_v45 = vld [vmem:[%s3912_s19 + $0x78] sm:$0xff]  }
 0x47e   : > { %v3451_v15 = vpop.f32.mrf.mxu0 }
 0x47f   : > { %3479 = vmatprep.mubr.msk.bf16.mxu0 %vm929_vm1, %v1940_v12  ;;  %v4432_v12 = vld [vmem:[%s4650_s9] ss:$0 sm:$0xff] }
 0x480   : > { %v1829_v6 = vpop.f32.mrf.mxu0  ;;  %3480 = vmatmul.mubr.msk.bf16.vlgmr.msra.gmra.mxu0 %vm929_vm1, %v1941_v48 }
 0x481   : > { %3512 = vmatpush3.bf16.msra.mxu0 %v3639_v57  ;;  %v3783_v57 = vld [vmem:[%s3912_s19 + $0x68] sm:$0xff]  }
 0x482   : > { %v3452_v16 = vpop.f32.mrf.mxu0  ;;  %3513 = vmatprep.subr.bf16.mxu0 %v3641_v51 }
 0x483   : > { %v1943_v19 = vpack.c.bf16 %v3452_v16, %v3451_v15 }
 0x484   : > { %v1832_v61 = vpop.f32.mrf.mxu0 }
 0x485   : > { %v1942_v40 = vpack.c.bf16 %v1832_v61, %v1829_v6  ;;  %3514 = vmatpush3.bf16.msra.mxu0 %v3641_v51 }
 0x486   : > { %v3455_v23 = vpop.f32.mrf.mxu0 }
 0x487   : > { %3483 = vmatprep.mubr.msk.bf16.mxu0 %vm929_vm1, %v1942_v40 }
 0x488   : > { %v1845_v47 = vpop.f32.mrf.mxu0  ;;  %3484 = vmatmul.mubr.msk.bf16.gmra.mxu0 %vm929_vm1, %v1943_v19 }
 0x48a   : > { %v3456_v25 = vpop.f32.mrf.mxu0 }
 0x48b   : > { %v1945_v5 = vpack.c.bf16 %v3456_v25, %v3455_v23 }
 0x48c   : > { %v1848_v28 = vpop.f32.mrf.mxu0 }
 0x48d   : > { %v1944_v41 = vpack.c.bf16 %v1848_v28, %v1845_v47 }
 0x48e   : > { %v3459_v58 = vpop.f32.mrf.mxu0 }
 0x48f   : > { %3487 = vmatprep.mubr.msk.bf16.mxu0 %vm929_vm1, %v1944_v41 }
 0x490   : > { %v1861_v29 = vpop.f32.mrf.mxu0  ;;  %3488 = vmatmul.mubr.msk.bf16.gmra.mxu0 %vm929_vm1, %v1945_v5 }
 0x491   : > { %3515 = vmatprep.mubr.msk.bf16.mxu0 %vm656_vm0, %v3770_v44 }
 0x492   : > { %v3460_v53 = vpop.f32.mrf.mxu0 }
 0x493   : > { %v1947_v14 = vpack.c.bf16 %v3460_v53, %v3459_v58 }
 0x494   : > { %v1864_v59 = vpop.f32.mrf.mxu0 }
 0x495   : > { %v1946_v22 = vpack.c.bf16 %v1864_v59, %v1861_v29 }
 0x496   : > { %v3463_v50 = vpop.f32.mrf.mxu0 }
 0x497   : > { %3491 = vmatprep.mubr.msk.bf16.mxu1 %vm929_vm1, %v1946_v22 }
 0x498   : > { %v1877_v33 = vpop.f32.mrf.mxu0  ;;  %3492 = vmatmul.mubr.msk.bf16.vlgmr.msra.gmra.mxu1 %vm929_vm1, %v1947_v14  ;;  %3516 = vmatmul.mubr.msk.bf16.vlgmr.msra.gmra.mxu0 %vm656_vm0, %v3771_v20 }
 0x499   : > { %3548 = vmatpush3.bf16.msra.mxu1 %v3638_v30  ;;  %3519 = vmatprep.mubr.msk.bf16.mxu0 %vm656_vm0, %v3772_v63  ;;  %v3782_v30 = vld [vmem:[%s3912_s19 + $0x60] sm:$0xff]  }
 0x49a   : > { %v3464_v49 = vpop.f32.mrf.mxu0  ;;  %3549 = vmatprep.subr.bf16.mxu1 %v3640_v27 }
 0x49b   : > { %v1949_v43 = vpack.c.bf16 %v3464_v49, %v3463_v50 }
 0x49c   : > { %v1880_v36 = vpop.f32.mrf.mxu0 }
 0x49d   : > { %v1948_v0 = vpack.c.bf16 %v1880_v36, %v1877_v33  ;;  %3550 = vmatpush3.bf16.msra.mxu1 %v3640_v27 }
 0x49e   : > { %v3467_v56 = vpop.f32.mrf.mxu0 }
 0x49f   : > { %3495 = vmatprep.mubr.msk.bf16.mxu1 %vm929_vm1, %v1948_v0 }
 0x4a0   : > { %v1893_v37 = vpop.f32.mrf.mxu0  ;;  %3496 = vmatmul.mubr.msk.bf16.gmra.mxu1 %vm929_vm1, %v1949_v43  ;;  %3520 = vmatmul.mubr.msk.bf16.gmra.mxu0 %vm656_vm0, %v3773_v38 }
 0x4a1   : > { %3523 = vmatprep.mubr.msk.bf16.mxu0 %vm656_vm0, %v3774_v1 }
 0x4a2   : > { %v3468_v54 = vpop.f32.mrf.mxu0 }
 0x4a3   : > { %v1951_v11 = vpack.c.bf16 %v3468_v54, %v3467_v56 }
 0x4a4   : > { %v1896_v35 = vpop.f32.mrf.mxu0 }
 0x4a5   : > { %v1950_v52 = vpack.c.bf16 %v1896_v35, %v1893_v37 }
 0x4a6   : > { %v3471_v21 = vpop.f32.mrf.mxu0 }
 0x4a7   : > { %3499 = vmatprep.mubr.msk.bf16.mxu1 %vm929_vm1, %v1950_v52 }
 0x4a8   : > { %v1909_v13 = vpop.f32.mrf.mxu0  ;;  %3500 = vmatmul.mubr.msk.bf16.gmra.mxu1 %vm929_vm1, %v1951_v11  ;;  %3524 = vmatmul.mubr.msk.bf16.gmra.mxu0 %vm656_vm0, %v3775_v3 }
 0x4a9   : > { %3527 = vmatprep.mubr.msk.bf16.mxu0 %vm656_vm0, %v3776_v4 }
 0x4aa   : > { %v3472_v10 = vpop.f32.mrf.mxu0 }
 0x4ab   : > { %v1953_v8 = vpack.c.bf16 %v3472_v10, %v3471_v21 }
 0x4ac   : > { %v1912_v17 = vpop.f32.mrf.mxu0 }
 0x4ad   : > { %v1952_v34 = vpack.c.bf16 %v1912_v17, %v1909_v13 }
 0x4ae   : > { %v3475_v46 = vpop.f32.mrf.mxu0 }
 0x4af   : > { %3503 = vmatprep.mubr.msk.bf16.mxu1 %vm929_vm1, %v1952_v34 }
 0x4b0   : > { %v1925_v26 = vpop.f32.mrf.mxu0  ;;  %3504 = vmatmul.mubr.msk.bf16.gmra.mxu1 %vm929_vm1, %v1953_v8  ;;  %3528 = vmatmul.mubr.msk.bf16.gmra.mxu0 %vm656_vm0, %v3777_v55 }
 0x4b1   : > { %3531 = vmatprep.mubr.msk.bf16.mxu0 %vm656_vm0, %v3778_v7 }
 0x4b2   : > { %v3476_v60 = vpop.f32.mrf.mxu0 }
 0x4b3   : > { %v1955_v18 = vpack.c.bf16 %v3476_v60, %v3475_v46 }
 0x4b4   : > { %v1928_v62 = vpop.f32.mrf.mxu0 }
 0x4b5   : > { %v1954_v39 = vpack.c.bf16 %v1928_v62, %v1925_v26 }
 0x4b7   : > { %3507 = vmatprep.mubr.msk.bf16.mxu1 %vm929_vm1, %v1954_v39 }
 0x4b8   : > { %3508 = vmatmul.mubr.msk.bf16.gmra.mxu1 %vm929_vm1, %v1955_v18  ;;  %3532 = vmatmul.mubr.msk.bf16.gmra.mxu0 %vm656_vm0, %v3779_v31 }
 0x4b9   : > { %3535 = vmatprep.mubr.msk.bf16.mxu0 %vm656_vm0, %v3780_v24 }
 0x4c0   : > { %3536 = vmatmul.mubr.msk.bf16.gmra.mxu0 %vm656_vm0, %v3781_v32 }
 0x4c1   : > { %3539 = vmatprep.mubr.msk.bf16.mxu0 %vm656_vm0, %v3782_v30 }
 0x4c8   : > { %3540 = vmatmul.mubr.msk.bf16.gmra.mxu0 %vm656_vm0, %v3783_v57 }
 0x4c9   : > { %3543 = vmatprep.mubr.msk.bf16.mxu0 %vm656_vm0, %v3784_v2 }
 0x4d0   : > { %3544 = vmatmul.mubr.msk.bf16.gmra.mxu0 %vm656_vm0, %v3785_v45 }
 0x540   : > { %v3481_v9 = vpop.f32.mrf.mxu0 }
 0x541   : > { %v2062_v16 = vadd.f32 %v3481_v9, %v4432_v12 }
 0x542   : > { %v2053_v42 = vpop.f32.mrf.mxu0 }
 0x543   : > { %v2054_v15 = vadd.f32 %v4432_v12, %v2053_v42  ;;  %v2182_v28 = vmax.f32 %v2062_v16, 0.0 }
 0x544   : > { %v3482_v48 = vpop.f32.mrf.mxu0 }
 0x545   : > { %v2065_v6 = vadd.f32 %v3482_v48, %v4432_v12  ;;  %v2180_v47 = vmax.f32 %v2054_v15, 0.0 }
 0x546   : > { %v2056_v61 = vpop.f32.mrf.mxu0 }
 0x547   : > { %v2057_v40 = vadd.f32 %v4432_v12, %v2056_v61  ;;  %v2183_v19 = vmax.f32 %v2065_v6, 0.0 }
 0x548   : > { %v3485_v23 = vpop.f32.mrf.mxu0 }
 0x549   : > { %v2181_v25 = vmax.f32 %v2057_v40, 0.0  ;;  %v2213_v58 = vpack.c.bf16 %v2183_v19, %v2182_v28  ;;  %v2078_v59 = vadd.f32 %v3485_v23, %v4432_v12 }
 0x54a   : > { %v2069_v41 = vpop.f32.mrf.mxu0 }
 0x54b   : > { %v2212_v5 = vpack.c.bf16 %v2181_v25, %v2180_v47  ;;  %v2070_v44 = vadd.f32 %v4432_v12, %v2069_v41  ;;  %v2186_v36 = vmax.f32 %v2078_v59, 0.0 }
 0x54c   : > { %v3486_v29 = vpop.f32.mrf.mxu0 }
 0x54d   : > { %v2081_v53 = vadd.f32 %v3486_v29, %v4432_v12  ;;  %3551 = vmatprep.mubr.msk.bf16.mxu1 %vm656_vm0, %v2212_v5  ;;  %v2184_v33 = vmax.f32 %v2070_v44, 0.0 }
 0x54e   : > { %v2072_v22 = vpop.f32.mrf.mxu0  ;;  %3552 = vmatmul.mubr.msk.bf16.vlgmr.msra.gmra.mxu1 %vm656_vm0, %v2213_v58 }
 0x54f   : > { %v2073_v14 = vadd.f32 %v4432_v12, %v2072_v22  ;;  %v2187_v50 = vmax.f32 %v2081_v53, 0.0 }
 0x550   : > { %v3489_v27 = vpop.f32.mrf.mxu0 }
 0x551   : > { %v2185_v49 = vmax.f32 %v2073_v14, 0.0  ;;  %v2215_v56 = vpack.c.bf16 %v2187_v50, %v2186_v36  ;;  %v2094_v52 = vadd.f32 %v3489_v27, %v4432_v12 }
 0x552   : > { %v2085_v0 = vpop.f32.mrf.mxu0 }
 0x553   : > { %v2214_v43 = vpack.c.bf16 %v2185_v49, %v2184_v33  ;;  %v2086_v54 = vadd.f32 %v4432_v12, %v2085_v0  ;;  %v2190_v8 = vmax.f32 %v2094_v52, 0.0 }
 0x554   : > { %v3490_v37 = vpop.f32.mrf.mxu0 }
 0x555   : > { %v2097_v35 = vadd.f32 %v3490_v37, %v4432_v12  ;;  %3555 = vmatprep.mubr.msk.bf16.mxu1 %vm656_vm0, %v2214_v43  ;;  %v2188_v17 = vmax.f32 %v2086_v54, 0.0 }
 0x556   : > { %v2088_v11 = vpop.f32.mrf.mxu0  ;;  %3556 = vmatmul.mubr.msk.bf16.gmra.mxu1 %vm656_vm0, %v2215_v56 }
 0x557   : > { %v2089_v21 = vadd.f32 %v4432_v12, %v2088_v11  ;;  %v2191_v13 = vmax.f32 %v2097_v35, 0.0 }
 0x558   : > { %v3493_v10 = vpop.f32.mrf.mxu1 }
 0x559   : > { %v2189_v34 = vmax.f32 %v2089_v21, 0.0  ;;  %v2217_v60 = vpack.c.bf16 %v2191_v13, %v2190_v8  ;;  %v2110_v51 = vadd.f32 %v3493_v10, %v4432_v12 }
 0x55a   : > { %v2101_v46 = vpop.f32.mrf.mxu1 }
 0x55b   : > { %v2216_v26 = vpack.c.bf16 %v2189_v34, %v2188_v17  ;;  %v2102_v39 = vadd.f32 %v4432_v12, %v2101_v46  ;;  %v2194_v55 = vmax.f32 %v2110_v51, 0.0 }
 0x55c   : > { %v3494_v62 = vpop.f32.mrf.mxu1 }
 0x55d   : > { %v2113_v18 = vadd.f32 %v3494_v62, %v4432_v12  ;;  %3559 = vmatprep.mubr.msk.bf16.mxu1 %vm656_vm0, %v2216_v26  ;;  %v2192_v3 = vmax.f32 %v2102_v39, 0.0 }
 0x55e   : > { %v2104_v20 = vpop.f32.mrf.mxu1  ;;  %3560 = vmatmul.mubr.msk.bf16.gmra.mxu1 %vm656_vm0, %v2217_v60 }
 0x55f   : > { %v2105_v63 = vadd.f32 %v4432_v12, %v2104_v20  ;;  %v2195_v38 = vmax.f32 %v2113_v18, 0.0 }
 0x560   : > { %v3497_v1 = vpop.f32.mrf.mxu1 }
 0x561   : > { %v2193_v4 = vmax.f32 %v2105_v63, 0.0  ;;  %v2219_v24 = vpack.c.bf16 %v2195_v38, %v2194_v55  ;;  %v2126_v2 = vadd.f32 %v3497_v1, %v4432_v12  ;;  %v3517_v63 = vpop.f32.mrf.mxu0 }
 0x562   : > { %v2117_v7 = vpop.f32.mrf.mxu1 }
 0x563   : > { %v2218_v31 = vpack.c.bf16 %v2193_v4, %v2192_v3  ;;  %v2118_v30 = vadd.f32 %v4432_v12, %v2117_v7  ;;  %v2198_v16 = vmax.f32 %v2126_v2, 0.0  ;;  %v2282_v38 = vpop.f32.mrf.mxu0 }
 0x564   : > { %v3498_v32 = vpop.f32.mrf.mxu1 }
 0x565   : > { %v2129_v57 = vadd.f32 %v3498_v32, %v4432_v12  ;;  %3563 = vmatprep.mubr.msk.bf16.mxu1 %vm656_vm0, %v2218_v31  ;;  %v2196_v15 = vmax.f32 %v2118_v30, 0.0  ;;  %v3518_v1 = vpop.f32.mrf.mxu0 }
 0x566   : > { %v2120_v45 = vpop.f32.mrf.mxu1  ;;  %3564 = vmatmul.mubr.msk.bf16.gmra.mxu1 %vm656_vm0, %v2219_v24 }
 0x567   : > { %v2121_v9 = vadd.f32 %v4432_v12, %v2120_v45  ;;  %v2199_v42 = vmax.f32 %v2129_v57, 0.0  ;;  %v2285_v3 = vpop.f32.mrf.mxu0 }
 0x568   : > { %v3501_v48 = vpop.f32.mrf.mxu1 }
 0x569   : > { %v2197_v6 = vmax.f32 %v2121_v9, 0.0  ;;  %v2221_v19 = vpack.c.bf16 %v2199_v42, %v2198_v16  ;;  %v2142_v28 = vadd.f32 %v3501_v48, %v4432_v12  ;;  %v3521_v4 = vpop.f32.mrf.mxu0  ;;  %v4499_v48 = vld [vmem:[%s4653_s12] ss:$0 sm:$0xff] }
 0x56a   : > { %v2133_v61 = vpop.f32.mrf.mxu1 }
 0x56b   : > { %v2220_v40 = vpack.c.bf16 %v2197_v6, %v2196_v15  ;;  %v2134_v47 = vadd.f32 %v4432_v12, %v2133_v61  ;;  %v2202_v59 = vmax.f32 %v2142_v28, 0.0  ;;  %v2298_v55 = vpop.f32.mrf.mxu0 }
 0x56c   : > { %v3502_v23 = vpop.f32.mrf.mxu1 }
 0x56d   : > { %v2145_v25 = vadd.f32 %v3502_v23, %v4432_v12  ;;  %3567 = vmatprep.mubr.msk.bf16.mxu1 %vm656_vm0, %v2220_v40  ;;  %v2200_v44 = vmax.f32 %v2134_v47, 0.0  ;;  %v3522_v7 = vpop.f32.mrf.mxu0 }
 0x56e   : > { %v2136_v41 = vpop.f32.mrf.mxu1  ;;  %3568 = vmatmul.mubr.msk.bf16.gmra.mxu1 %vm656_vm0, %v2221_v19 }
 0x56f   : > { %v2137_v5 = vadd.f32 %v4432_v12, %v2136_v41  ;;  %v2203_v58 = vmax.f32 %v2145_v25, 0.0  ;;  %v2301_v31 = vpop.f32.mrf.mxu0 }
 0x570   : > { %v3505_v29 = vpop.f32.mrf.mxu1 }
 0x571   : > { %v2201_v53 = vmax.f32 %v2137_v5, 0.0  ;;  %v2223_v50 = vpack.c.bf16 %v2203_v58, %v2202_v59  ;;  %v2158_v36 = vadd.f32 %v3505_v29, %v4432_v12  ;;  %v3525_v24 = vpop.f32.mrf.mxu0 }
 0x572   : > { %v2149_v22 = vpop.f32.mrf.mxu1 }
 0x573   : > { %v2222_v14 = vpack.c.bf16 %v2201_v53, %v2200_v44  ;;  %v2150_v33 = vadd.f32 %v4432_v12, %v2149_v22  ;;  %v2206_v52 = vmax.f32 %v2158_v36, 0.0 }
 0x574   : > { %v3506_v27 = vpop.f32.mrf.mxu1 }
 0x575   : > { %v2161_v49 = vadd.f32 %v3506_v27, %v4432_v12  ;;  %3571 = vmatprep.mubr.msk.bf16.mxu1 %vm656_vm0, %v2222_v14  ;;  %v2204_v54 = vmax.f32 %v2150_v33, 0.0 }
 0x576   : > { %v2152_v0 = vpop.f32.mrf.mxu1  ;;  %3572 = vmatmul.mubr.msk.bf16.gmra.mxu1 %vm656_vm0, %v2223_v50 }
 0x577   : > { %v2153_v43 = vadd.f32 %v4432_v12, %v2152_v0  ;;  %v2207_v56 = vmax.f32 %v2161_v49, 0.0 }
 0x578   : > { %v3509_v37 = vpop.f32.mrf.mxu1 }
 0x579   : > { %v2205_v35 = vmax.f32 %v2153_v43, 0.0  ;;  %v2225_v13 = vpack.c.bf16 %v2207_v56, %v2206_v52  ;;  %v2174_v8 = vadd.f32 %v3509_v37, %v4432_v12 }
 0x57a   : > { %v2165_v11 = vpop.f32.mrf.mxu1 }
 0x57b   : > { %v2224_v21 = vpack.c.bf16 %v2205_v35, %v2204_v54  ;;  %v2166_v17 = vadd.f32 %v4432_v12, %v2165_v11  ;;  %v2210_v18 = vmax.f32 %v2174_v8, 0.0 }
 0x57c   : > { %v3510_v10 = vpop.f32.mrf.mxu1 }
 0x57d   : > { %v2177_v34 = vadd.f32 %v3510_v10, %v4432_v12  ;;  %3575 = vmatprep.mubr.msk.bf16.mxu1 %vm656_vm0, %v2224_v21  ;;  %v2208_v62 = vmax.f32 %v2166_v17, 0.0 }
 0x57e   : > { %v2168_v46 = vpop.f32.mrf.mxu1  ;;  %3576 = vmatmul.mubr.msk.bf16.gmra.mxu1 %vm656_vm0, %v2225_v13 }
 0x57f   : > { %v2169_v26 = vadd.f32 %v4432_v12, %v2168_v46  ;;  %v2211_v60 = vmax.f32 %v2177_v34, 0.0  ;;  %v4482_v12 = vpop.f32.mrf.mxu0 }
 0x581   : > { %v2209_v39 = vmax.f32 %v2169_v26, 0.0  ;;  %v2227_v20 = vpack.c.bf16 %v2211_v60, %v2210_v18  ;;  %v4484_v32 = vpop.f32.mrf.mxu0 }
 0x583   : > { %v2226_v51 = vpack.c.bf16 %v2209_v39, %v2208_v62  ;;  %v4486_v30 = vpop.f32.mrf.mxu0 }
 0x585   : > { %3579 = vmatprep.mubr.msk.bf16.mxu1 %vm656_vm0, %v2226_v51  ;;  %v4488_v57 = vpop.f32.mrf.mxu0 }
 0x586   : > { %3580 = vmatmul.mubr.msk.bf16.gmra.mxu1 %vm656_vm0, %v2227_v20 }
 0x587   : > { %v4490_v2 = vpop.f32.mrf.mxu0 }
 0x589   : > { %v4492_v45 = vpop.f32.mrf.mxu0 }
 0x58b   : > { %v4494_v9 = vpop.f32.mrf.mxu0 }
 0x58d   : > { %v4501_v16 = vpop.f32.mrf.mxu0 }
 0x58f   : > { %v4512_v41 = vpop.f32.mrf.mxu0 }
 0x591   : > { %v4518_v33 = vpop.f32.mrf.mxu0 }
 0x593   : > { %v4526_v21 = vpop.f32.mrf.mxu0 }
 0x595   : > { %v4534_v18 = vpop.f32.mrf.mxu0 }
 0x60e   : > { %v3553_v42 = vpop.f32.mrf.mxu1 }
 0x60f   : > { %v2512_v15 = vadd.f32 %v3553_v42, %v3517_v63 }
 0x610   : > { %v2503_v6 = vpop.f32.mrf.mxu1 }
 0x611   : > { %v2639_v61 = vadd.f32 %v4499_v48, %v2512_v15  ;;  %v2504_v40 = vadd.f32 %v2503_v6, %v2282_v38 }
 0x612   : > { %v3554_v19 = vpop.f32.mrf.mxu1 }
 0x613   : > { %v2671_v23 = vmax.f32 %v2639_v61, 0.0  ;;  %v2637_v47 = vadd.f32 %v4499_v48, %v2504_v40  ;;  %v2515_v25 = vadd.f32 %v3554_v19, %v3518_v1 }
 0x614   : > { %v2506_v28 = vpop.f32.mrf.mxu1 }
 0x615   : > { %v3166_v5 = vpack.c.bf16 %v2671_v23, %v2671_v23  ;;  %v2669_v58 = vmax.f32 %v2637_v47, 0.0  ;;  %v2640_v29 = vadd.f32 %v4499_v48, %v2515_v25  ;;  %v2507_v44 = vadd.f32 %v2506_v28, %v2285_v3 }
 0x616   : > { %v3557_v53 = vpop.f32.mrf.mxu1 }
 0x617   : > { %2832 = vst.msk [vmem:[%s4510_s17 + $0x8] sm:$0xf] %vm2829_vm2, %v3166_v5  ;;  %v3164_v59 = vpack.c.bf16 %v2669_v58, %v2669_v58  ;;  %v2672_v22 = vmax.f32 %v2640_v29, 0.0  ;;  %v2638_v14 = vadd.f32 %v4499_v48, %v2507_v44  ;;  %v2528_v50 = vadd.f32 %v3557_v53, %v3521_v4 }
 0x618   : > { %v2519_v27 = vpop.f32.mrf.mxu1 }
 0x619   : > { %2830 = vst.msk [vmem:[%s4510_s17] sm:$0xf] %vm2829_vm2, %v3164_v59  ;;  %v3167_v49 = vpack.c.bf16 %v2672_v22, %v2672_v22  ;;  %v2670_v36 = vmax.f32 %v2638_v14, 0.0  ;;  %v2643_v0 = vadd.f32 %v4499_v48, %v2528_v50  ;;  %v2520_v43 = vadd.f32 %v2519_v27, %v2298_v55 }
 0x61a   : > { %v3558_v56 = vpop.f32.mrf.mxu1 }
 0x61b   : > { %2833 = vst.msk [vmem:[%s4510_s17 + $0xc] sm:$0xf] %vm2829_vm2, %v3167_v49  ;;  %v3165_v37 = vpack.c.bf16 %v2670_v36, %v2670_v36  ;;  %v2675_v54 = vmax.f32 %v2643_v0, 0.0  ;;  %v2641_v35 = vadd.f32 %v4499_v48, %v2520_v43  ;;  %v2531_v52 = vadd.f32 %v3558_v56, %v3522_v7 }
 0x61c   : > { %v2522_v11 = vpop.f32.mrf.mxu1 }
 0x61d   : > { %2831 = vst.msk [vmem:[%s4510_s17 + $0x4] sm:$0xf] %vm2829_vm2, %v3165_v37  ;;  %v3170_v13 = vpack.c.bf16 %v2675_v54, %v2675_v54  ;;  %v2673_v10 = vmax.f32 %v2641_v35, 0.0  ;;  %v2644_v17 = vadd.f32 %v4499_v48, %v2531_v52  ;;  %v2523_v34 = vadd.f32 %v2522_v11, %v2301_v31 }
 0x61e   : > { %v3561_v8 = vpop.f32.mrf.mxu1 }
 0x61f   : > { %2836 = vst.msk [vmem:[%s4510_s17 + $0x18] sm:$0xf] %vm2829_vm2, %v3170_v13  ;;  %v3168_v46 = vpack.c.bf16 %v2673_v10, %v2673_v10  ;;  %v2676_v26 = vmax.f32 %v2644_v17, 0.0  ;;  %v2642_v60 = vadd.f32 %v4499_v48, %v2523_v34  ;;  %v2544_v62 = vadd.f32 %v3561_v8, %v3525_v24  ;;  %v4544_v24 = vpop.f32.mrf.mxu0 }
 0x620   : > { %v2535_v39 = vpop.f32.mrf.mxu1 }
 0x621   : > { %2834 = vst.msk [vmem:[%s4510_s17 + $0x10] sm:$0xf] %vm2829_vm2, %v3168_v46  ;;  %v3171_v51 = vpack.c.bf16 %v2676_v26, %v2676_v26  ;;  %v2674_v20 = vmax.f32 %v2642_v60, 0.0  ;;  %v2647_v63 = vadd.f32 %v4499_v48, %v2544_v62  ;;  %v2536_v38 = vadd.f32 %v2535_v39, %v4482_v12  ;;  %v4554_v25 = vpop.f32.mrf.mxu0 }
 0x622   : > { %v3562_v1 = vpop.f32.mrf.mxu1 }
 0x623   : > { %2837 = vst.msk [vmem:[%s4510_s17 + $0x1c] sm:$0xf] %vm2829_vm2, %v3171_v51  ;;  %v3169_v3 = vpack.c.bf16 %v2674_v20, %v2674_v20  ;;  %v2679_v4 = vmax.f32 %v2647_v63, 0.0  ;;  %v2645_v55 = vadd.f32 %v4499_v48, %v2536_v38  ;;  %v2547_v7 = vadd.f32 %v3562_v1, %v4484_v32  ;;  %v2365_v14 = vpop.f32.mrf.mxu0 }
 0x624   : > { %v2538_v31 = vpop.f32.mrf.mxu1 }
 0x625   : > { %2835 = vst.msk [vmem:[%s4510_s17 + $0x14] sm:$0xf] %vm2829_vm2, %v3169_v3  ;;  %v3174_v42 = vpack.c.bf16 %v2679_v4, %v2679_v4  ;;  %v2677_v15 = vmax.f32 %v2645_v55, 0.0  ;;  %v2648_v6 = vadd.f32 %v4499_v48, %v2547_v7  ;;  %v2539_v12 = vadd.f32 %v2538_v31, %v4486_v30  ;;  %v3541_v54 = vpop.f32.mrf.mxu0 }
 0x626   : > { %v3565_v61 = vpop.f32.mrf.mxu1 }
 0x627   : > { %2840 = vst.msk [vmem:[%s4510_s17 + $0x28] sm:$0xf] %vm2829_vm2, %v3174_v42  ;;  %v3172_v40 = vpack.c.bf16 %v2677_v15, %v2677_v15  ;;  %v2680_v19 = vmax.f32 %v2648_v6, 0.0  ;;  %v2646_v32 = vadd.f32 %v4499_v48, %v2539_v12  ;;  %v2560_v23 = vadd.f32 %v3565_v61, %v4488_v57  ;;  %v2378_v46 = vpop.f32.mrf.mxu0 }
 0x628   : > { %v2551_v47 = vpop.f32.mrf.mxu1 }
 0x629   : > { %2838 = vst.msk [vmem:[%s4510_s17 + $0x20] sm:$0xf] %vm2829_vm2, %v3172_v40  ;;  %v3175_v28 = vpack.c.bf16 %v2680_v19, %v2680_v19  ;;  %v2678_v5 = vmax.f32 %v2646_v32, 0.0  ;;  %v2651_v58 = vadd.f32 %v4499_v48, %v2560_v23  ;;  %v2552_v30 = vadd.f32 %v2551_v47, %v4490_v2  ;;  %v3542_v1 = vpop.f32.mrf.mxu0 }
 0x62a   : > { %v3566_v29 = vpop.f32.mrf.mxu1 }
 0x62b   : > { %2841 = vst.msk [vmem:[%s4510_s17 + $0x2c] sm:$0xf] %vm2829_vm2, %v3175_v28  ;;  %v3173_v44 = vpack.c.bf16 %v2678_v5, %v2678_v5  ;;  %v2683_v53 = vmax.f32 %v2651_v58, 0.0  ;;  %v2649_v57 = vadd.f32 %v4499_v48, %v2552_v30  ;;  %v2563_v59 = vadd.f32 %v3566_v29, %v4492_v45  ;;  %v2381_v12 = vpop.f32.mrf.mxu0 }
 0x62c   : > { %v2554_v22 = vpop.f32.mrf.mxu1 }
 0x62d   : > { %2839 = vst.msk [vmem:[%s4510_s17 + $0x24] sm:$0xf] %vm2829_vm2, %v3173_v44  ;;  %v3178_v50 = vpack.c.bf16 %v2683_v53, %v2683_v53  ;;  %v2681_v27 = vmax.f32 %v2649_v57, 0.0  ;;  %v2652_v49 = vadd.f32 %v4499_v48, %v2563_v59  ;;  %v2555_v2 = vadd.f32 %v2554_v22, %v4494_v9 }
 0x62e   : > { %v3569_v36 = vpop.f32.mrf.mxu1 }
 0x62f   : > { %2844 = vst.msk [vmem:[%s4510_s17 + $0x38] sm:$0xf] %vm2829_vm2, %v3178_v50  ;;  %v3176_v0 = vpack.c.bf16 %v2681_v27, %v2681_v27  ;;  %v2684_v43 = vmax.f32 %v2652_v49, 0.0  ;;  %v2650_v56 = vadd.f32 %v4499_v48, %v2555_v2  ;;  %v2576_v45 = vadd.f32 %v3569_v36, %v4501_v16 }
 0x630   : > { %v2567_v37 = vpop.f32.mrf.mxu1 }
 0x631   : > { %2842 = vst.msk [vmem:[%s4510_s17 + $0x30] sm:$0xf] %vm2829_vm2, %v3176_v0  ;;  %v3179_v35 = vpack.c.bf16 %v2684_v43, %v2684_v43  ;;  %v2682_v52 = vmax.f32 %v2650_v56, 0.0  ;;  %v2655_v11 = vadd.f32 %v4499_v48, %v2576_v45  ;;  %v2568_v9 = vadd.f32 %v2567_v37, %v4512_v41 }
 0x632   : > { %v3570_v13 = vpop.f32.mrf.mxu1 }
 0x633   : > { %2845 = vst.msk [vmem:[%s4510_s17 + $0x3c] sm:$0xf] %vm2829_vm2, %v3179_v35  ;;  %v3177_v10 = vpack.c.bf16 %v2682_v52, %v2682_v52  ;;  %v2687_v17 = vmax.f32 %v2655_v11, 0.0  ;;  %v2653_v34 = vadd.f32 %v4499_v48, %v2568_v9  ;;  %v2579_v16 = vadd.f32 %v3570_v13, %v4518_v33 }
 0x634   : > { %v2570_v8 = vpop.f32.mrf.mxu1 }
 0x635   : > { %2843 = vst.msk [vmem:[%s4510_s17 + $0x34] sm:$0xf] %vm2829_vm2, %v3177_v10  ;;  %v3182_v26 = vpack.c.bf16 %v2687_v17, %v2687_v17  ;;  %v2685_v60 = vmax.f32 %v2653_v34, 0.0  ;;  %v2656_v62 = vadd.f32 %v4499_v48, %v2579_v16  ;;  %v2571_v41 = vadd.f32 %v2570_v8, %v4526_v21 }
 0x636   : > { %v3573_v39 = vpop.f32.mrf.mxu1 }
 0x637   : > { %2848 = vst.msk [vmem:[%s4510_s17 + $0x48] sm:$0xf] %vm2829_vm2, %v3182_v26  ;;  %v3180_v51 = vpack.c.bf16 %v2685_v60, %v2685_v60  ;;  %v2688_v20 = vmax.f32 %v2656_v62, 0.0  ;;  %v2654_v63 = vadd.f32 %v4499_v48, %v2571_v41  ;;  %v2592_v33 = vadd.f32 %v3573_v39, %v4534_v18 }
 0x638   : > { %v2583_v38 = vpop.f32.mrf.mxu1 }
 0x639   : > { %2846 = vst.msk [vmem:[%s4510_s17 + $0x40] sm:$0xf] %vm2829_vm2, %v3180_v51  ;;  %v3183_v3 = vpack.c.bf16 %v2688_v20, %v2688_v20  ;;  %v2686_v4 = vmax.f32 %v2654_v63, 0.0  ;;  %v2659_v55 = vadd.f32 %v4499_v48, %v2592_v33  ;;  %v2584_v21 = vadd.f32 %v2583_v38, %v4544_v24 }
 0x63a   : > { %v3574_v7 = vpop.f32.mrf.mxu1 }
 0x63b   : > { %2849 = vst.msk [vmem:[%s4510_s17 + $0x4c] sm:$0xf] %vm2829_vm2, %v3183_v3  ;;  %v3181_v31 = vpack.c.bf16 %v2686_v4, %v2686_v4  ;;  %v2691_v42 = vmax.f32 %v2659_v55, 0.0  ;;  %v2657_v15 = vadd.f32 %v4499_v48, %v2584_v21  ;;  %v2595_v18 = vadd.f32 %v3574_v7, %v4554_v25  ;;  %v3545_v25 = vpop.f32.mrf.mxu0 }
 0x63c   : > { %v2586_v6 = vpop.f32.mrf.mxu1 }
 0x63d   : > { %2847 = vst.msk [vmem:[%s4510_s17 + $0x44] sm:$0xf] %vm2829_vm2, %v3181_v31  ;;  %v3186_v61 = vpack.c.bf16 %v2691_v42, %v2691_v42  ;;  %v2689_v40 = vmax.f32 %v2657_v15, 0.0  ;;  %v2660_v19 = vadd.f32 %v4499_v48, %v2595_v18  ;;  %v2587_v24 = vadd.f32 %v2586_v6, %v2365_v14  ;;  %v2394_v27 = vpop.f32.mrf.mxu0 }
 0x63e   : > { %v3577_v32 = vpop.f32.mrf.mxu1 }
 0x63f   : > { %2852 = vst.msk [vmem:[%s4510_s17 + $0x58] sm:$0xf] %vm2829_vm2, %v3186_v61  ;;  %v3184_v23 = vpack.c.bf16 %v2689_v40, %v2689_v40  ;;  %v2692_v47 = vmax.f32 %v2660_v19, 0.0  ;;  %v2658_v28 = vadd.f32 %v4499_v48, %v2587_v24  ;;  %v2608_v5 = vadd.f32 %v3577_v32, %v3541_v54  ;;  %v3546_v52 = vpop.f32.mrf.mxu0 }
 0x640   : > { %v2599_v58 = vpop.f32.mrf.mxu1 }
 0x641   : > { %2850 = vst.msk [vmem:[%s4510_s17 + $0x50] sm:$0xf] %vm2829_vm2, %v3184_v23  ;;  %v3187_v30 = vpack.c.bf16 %v2692_v47, %v2692_v47  ;;  %v2690_v29 = vmax.f32 %v2658_v28, 0.0  ;;  %v2663_v44 = vadd.f32 %v4499_v48, %v2608_v5  ;;  %v2600_v53 = vadd.f32 %v2599_v58, %v2378_v46  ;;  %v2397_v60 = vpop.f32.mrf.mxu0 }
 0x642   : > { %v3578_v57 = vpop.f32.mrf.mxu1 }
 0x643   : > { %2853 = vst.msk [vmem:[%s4510_s17 + $0x5c] sm:$0xf] %vm2829_vm2, %v3187_v30  ;;  %v3185_v59 = vpack.c.bf16 %v2690_v29, %v2690_v29  ;;  %v2695_v22 = vmax.f32 %v2663_v44, 0.0  ;;  %v2661_v14 = vadd.f32 %v4499_v48, %v2600_v53  ;;  %v2611_v50 = vadd.f32 %v3578_v57, %v3542_v1 }
 0x644   : > { %v2602_v49 = vpop.f32.mrf.mxu1 }
 0x645   : > { %2851 = vst.msk [vmem:[%s4510_s17 + $0x54] sm:$0xf] %vm2829_vm2, %v3185_v59  ;;  %v3190_v2 = vpack.c.bf16 %v2695_v22, %v2695_v22  ;;  %v2693_v36 = vmax.f32 %v2661_v14, 0.0  ;;  %v2664_v0 = vadd.f32 %v4499_v48, %v2611_v50  ;;  %v2603_v43 = vadd.f32 %v2602_v49, %v2381_v12 }
 0x646   : > { %v3581_v56 = vpop.f32.mrf.mxu1 }
 0x647   : > { %2856 = vst.msk [vmem:[%s4510_s17 + $0x68] sm:$0xf] %vm2829_vm2, %v3190_v2  ;;  %v3188_v45 = vpack.c.bf16 %v2693_v36, %v2693_v36  ;;  %v2696_v37 = vmax.f32 %v2664_v0, 0.0  ;;  %v2662_v54 = vadd.f32 %v4499_v48, %v2603_v43  ;;  %v2624_v35 = vadd.f32 %v3581_v56, %v3545_v25 }
 0x648   : > { %v2615_v11 = vpop.f32.mrf.mxu1 }
 0x649   : > { %2854 = vst.msk [vmem:[%s4510_s17 + $0x60] sm:$0xf] %vm2829_vm2, %v3188_v45  ;;  %v3191_v9 = vpack.c.bf16 %v2696_v37, %v2696_v37  ;;  %v2694_v13 = vmax.f32 %v2662_v54, 0.0  ;;  %v2667_v10 = vadd.f32 %v4499_v48, %v2624_v35  ;;  %v2616_v17 = vadd.f32 %v2615_v11, %v2394_v27 }
 0x64a   : > { %v3582_v34 = vpop.f32.mrf.mxu1 }
 0x64b   : > { %2857 = vst.msk [vmem:[%s4510_s17 + $0x6c] sm:$0xf] %vm2829_vm2, %v3191_v9  ;;  %v3189_v16 = vpack.c.bf16 %v2694_v13, %v2694_v13  ;;  %v2699_v8 = vmax.f32 %v2667_v10, 0.0  ;;  %v2665_v46 = vadd.f32 %v4499_v48, %v2616_v17  ;;  %v2627_v26 = vadd.f32 %v3582_v34, %v3546_v52 }
 0x64c   : > { %v2618_v62 = vpop.f32.mrf.mxu1 }
 0x64d   : > { %2855 = vst.msk [vmem:[%s4510_s17 + $0x64] sm:$0xf] %vm2829_vm2, %v3189_v16  ;;  %v3194_v41 = vpack.c.bf16 %v2699_v8, %v2699_v8  ;;  %v2697_v39 = vmax.f32 %v2665_v46, 0.0  ;;  %v2668_v51 = vadd.f32 %v4499_v48, %v2627_v26  ;;  %v2619_v20 = vadd.f32 %v2618_v62, %v2397_v60 }
 0x64f   : > { %2860 = vst.msk [vmem:[%s4510_s17 + $0x78] sm:$0xf] %vm2829_vm2, %v3194_v41  ;;  %v3192_v63 = vpack.c.bf16 %v2697_v39, %v2697_v39  ;;  %v2700_v33 = vmax.f32 %v2668_v51, 0.0  ;;  %v2666_v38 = vadd.f32 %v4499_v48, %v2619_v20 }
 0x651   : > { %2858 = vst.msk [vmem:[%s4510_s17 + $0x70] sm:$0xf] %vm2829_vm2, %v3192_v63  ;;  %v3195_v1 = vpack.c.bf16 %v2700_v33, %v2700_v33  ;;  %v2698_v3 = vmax.f32 %v2666_v38, 0.0 }
 0x653   : > { %2861 = vst.msk [vmem:[%s4510_s17 + $0x7c] sm:$0xf] %vm2829_vm2, %v3195_v1  ;;  %v3193_v4 = vpack.c.bf16 %v2698_v3, %v2698_v3 }
 0x655   : > { %2859 = vst.msk [vmem:[%s4510_s17 + $0x74] sm:$0xf] %vm2829_vm2, %v3193_v4 }
 0x656 PF: > { %s23_s27 = sadd.s32 1, %s3808_s27   ;;  %s4655_s25 = smov %s3804_s26 }
 0x657   : > { %p20_p5 = scmp.ge.s32.totalorder %s23_s27, 4   ;;  %s4656_s26 = smov %s4658_s28 }
 0x659   :  { %22 = sbr.rel (!%p20_p5) target bundleno = 2 (0x2), region = 108 }

// kernel: tpu_custom_call.1
= control target key start
LH: loop header
LB: loop body
LE: loop exit
PB: predicated region body
PF: predicated region fallthrough
CT: control target
= control target key end

     0   :  { %s3874_s25 = smov 0   ;;  %s3876_s26 = smov 0   ;;  %s4635_s0 = inlined_call_operand.vmem [shape: bf16[2,256,32], index: 0, kind: input, shape index: {}]   ;;  %s4636_s1 = inlined_call_operand.vmem [shape: bf16[2,16,128], index: 1, kind: input, shape index: {}]   ;;  %s4637_s2 = inlined_call_operand.vmem [shape: bf16[2,128,16], index: 2, kind: input, shape index: {}]   ;;  %s4638_s3 = inlined_call_operand.vmem [shape: f32[1,128], index: 3, kind: input, shape index: {}]   ;;  %s4639_s4 = inlined_call_operand.vmem [shape: bf16[32,16], index: 4, kind: input, shape index: {}]   ;;  %s4640_s5 = inlined_call_operand.vmem [shape: f32[1,16], index: 5, kind: input, shape index: {}]   ;;  %s4641_s6 = inlined_call_operand.vmem [shape: bf16[16,16], index: 6, kind: input, shape index: {}]   ;;  %s4642_s7 = inlined_call_operand.vmem [shape: f32[1,16], index: 7, kind: input, shape index: {}]   ;;  %s4643_s8 = inlined_call_operand.vmem [shape: bf16[16,32], index: 8, kind: input, shape index: {}]   ;;  %s4644_s9 = inlined_call_operand.vmem [shape: f32[1,32], index: 9, kind: input, shape index: {}]   ;;  %s4645_s10 = inlined_call_operand.vmem [shape: bf16[32,32], index: 10, kind: input, shape index: {}]   ;;  %s4646_s11 = inlined_call_operand.vmem [shape: bf16[32,32], index: 11, kind: input, shape index: {}]   ;;  %s4647_s12 = inlined_call_operand.vmem [shape: f32[1,32], index: 12, kind: input, shape index: {}]   ;;  %s4648_s13 = inlined_call_operand.vmem [shape: bf16[2,256,32], index: 13, kind: output, shape index: {}]  }
   0x1   :  { %s3878_s27 = smov 0  }
   0x2 LB: > { %s35_s28 = sadd.s32 1, %s3798_s26  ;;  %p2977_p0 = scmp.ge.s32.totalorder %s3802_s27, 1  ;;  %s3802_s27 = sphi %s3878_s27, %s23_s27   ;;  %s3798_s26 = sphi %s3876_s26, %s4650_s26   ;;  %s3794_s25 = sphi %s3874_s25, %s4649_s25  }
   0x3   : > { %p37_p1 = scmp.ge.s32.totalorder %s35_s28, 2  ;;  %p428_p2 = scmp.lt.s32.totalorder %s3802_s27, 3 }
   0x5   : > { %s4652_s28 = smov (%p37_p1, %s35_s28), 0  ;;  %p429_p3 = pnand %p2977_p0, %p428_p2 }
   0x6   : > { %p491_p4 = scmp.lt.s32.totalorder (!%p429_p3), %s3794_s25, 1 }
   0x7   : > { %432 = sbr.rel (%p429_p3) target bundleno = 1622 (0x656), region = 72 }
   0xc   : > { %v3603_v0 = vld [vmem:[%s4639_s4 + $0x8] sm:$0xff]   ;;  %v3604_v1 = vld [vmem:[%s4639_s4] sm:$0xff]   ;;  %s4654_s25 = smov (!%p491_p4, %s3794_s25), 1  ;;  %vm656_vm0 = vcmask 261120   ;;  %vm929_vm1 = vcmask 130048   ;;  %vm2829_vm2 = vcmask 257024  }
   0xd   : > { %3319 = vmatprep.subr.bf16.mxu0 %v3603_v0  ;;  %s3154_s16 = sshll.u32 %s4654_s25, 7  ;;  %v3621_v18 = vld [vmem:[%s4641_s6] sm:$0xff]   ;;  %s3155_s22 = sshll.u32 %s4654_s25, 3 }
   0xe   : > { %3320 = vmatpush3.bf16.msra.mxu0 %v3603_v0  ;;  %s3906_s19 = scalar_lea.vmem %s4635_s0, %s3154_s16  ;;  %3355 = vmatprep.subr.bf16.mxu1 %v3621_v18  ;;  %s504_s29 = scalar_lea.vmem %s4636_s1, %s3155_s22  ;;  %v3950_v22 = vld [vmem:[%s4640_s5] ss:$0 sm:$0xff] }
   0xf   : > { %3321 = vmatprep.subr.bf16.mxu0 %v3604_v1  ;;  %v3605_v2 = vld [vmem:[%s3906_s19] sm:$0xff]   ;;  %v3606_v3 = vld [vmem:[%s3906_s19 + $0x8] sm:$0xff]   ;;  %v3607_v4 = vld [vmem:[%s3906_s19 + $0x10] sm:$0xff]   ;;  %3356 = vmatpush3.bf16.msra.mxu1 %v3621_v18  ;;  %s3156_s21 = sshll.u32 %s4654_s25, 6  ;;  %s4504_s17 = scalar_lea.vmem %s4648_s13, %s3154_s16 }
  0x10   : > { %3323 = vmatprep.mubr.msk.bf16.mxu0 %vm656_vm0, %v3605_v2  ;;  %v3608_v5 = vld [vmem:[%s3906_s19 + $0x18] sm:$0xff]   ;;  %v3609_v6 = vld [vmem:[%s3906_s19 + $0x20] sm:$0xff]   ;;  %v3610_v7 = vld [vmem:[%s3906_s19 + $0x28] sm:$0xff]   ;;  %s4190_s24 = scalar_lea.vmem %s4637_s2, %s3156_s21 }
  0x11   : > { %v3611_v8 = vld [vmem:[%s3906_s19 + $0x30] sm:$0xff]   ;;  %v3612_v9 = vld [vmem:[%s3906_s19 + $0x38] sm:$0xff]   ;;  %v3613_v10 = vld [vmem:[%s3906_s19 + $0x40] sm:$0xff]  }
  0x12   : > { %3322 = vmatpush3.bf16.msra.mxu0 %v3604_v1  ;;  %v3614_v11 = vld [vmem:[%s3906_s19 + $0x48] sm:$0xff]   ;;  %v3615_v12 = vld [vmem:[%s3906_s19 + $0x50] sm:$0xff]   ;;  %v3616_v13 = vld [vmem:[%s3906_s19 + $0x58] sm:$0xff]  }
  0x13   : > { %v3617_v14 = vld [vmem:[%s3906_s19 + $0x60] sm:$0xff]   ;;  %v3618_v15 = vld [vmem:[%s3906_s19 + $0x68] sm:$0xff]   ;;  %v3619_v16 = vld [vmem:[%s3906_s19 + $0x70] sm:$0xff]  }
  0x14   : > { %v3620_v17 = vld [vmem:[%s3906_s19 + $0x78] sm:$0xff]   ;;  %v3622_v19 = vld [vmem:[%s504_s29] sm:$0xff]  }
  0x15   : > { %3324 = vmatmul.mubr.msk.bf16.vlgmr.msra.gmra.mxu0 %vm656_vm0, %v3606_v3  ;;  %3389 = vmatprep.subr.bf16.mxu1 %v3622_v19 }
  0x16   : > { %3327 = vmatprep.mubr.msk.bf16.mxu0 %vm656_vm0, %v3607_v4 }
  0x1d   : > { %3328 = vmatmul.mubr.msk.bf16.gmra.mxu0 %vm656_vm0, %v3608_v5 }
  0x1e   : > { %3331 = vmatprep.mubr.msk.bf16.mxu0 %vm656_vm0, %v3609_v6 }
  0x25   : > { %3332 = vmatmul.mubr.msk.bf16.gmra.mxu0 %vm656_vm0, %v3610_v7 }
  0x26   : > { %3335 = vmatprep.mubr.msk.bf16.mxu0 %vm656_vm0, %v3611_v8 }
  0x2d   : > { %3336 = vmatmul.mubr.msk.bf16.gmra.mxu0 %vm656_vm0, %v3612_v9 }
  0x2e   : > { %3339 = vmatprep.mubr.msk.bf16.mxu0 %vm656_vm0, %v3613_v10 }
  0x35   : > { %3340 = vmatmul.mubr.msk.bf16.gmra.mxu0 %vm656_vm0, %v3614_v11 }
  0x36   : > { %3343 = vmatprep.mubr.msk.bf16.mxu0 %vm656_vm0, %v3615_v12 }
  0x3d   : > { %3344 = vmatmul.mubr.msk.bf16.gmra.mxu0 %vm656_vm0, %v3616_v13 }
  0x3e   : > { %3347 = vmatprep.mubr.msk.bf16.mxu0 %vm656_vm0, %v3617_v14 }
  0x45   : > { %3348 = vmatmul.mubr.msk.bf16.gmra.mxu0 %vm656_vm0, %v3618_v15 }
  0x46   : > { %3351 = vmatprep.mubr.msk.bf16.mxu0 %vm656_vm0, %v3619_v16 }
  0x4d   : > { %3352 = vmatmul.mubr.msk.bf16.gmra.mxu0 %vm656_vm0, %v3620_v17 }
  0xd5   : > { %v3325_v20 = vpop.f32.mrf.mxu0 }
  0xd6   : > { %v748_v26 = vadd.f32 %v3325_v20, %v3950_v22 }
  0xd7   : > { %v739_v21 = vpop.f32.mrf.mxu0 }
  0xd8   : > { %v740_v24 = vadd.f32 %v3950_v22, %v739_v21  ;;  %v868_v33 = vmax.f32 %v748_v26, 0.0 }
  0xd9   : > { %v3326_v23 = vpop.f32.mrf.mxu0 }
  0xda   : > { %v751_v25 = vadd.f32 %v3326_v23, %v3950_v22  ;;  %v866_v31 = vmax.f32 %v740_v24, 0.0 }
  0xdb   : > { %v742_v27 = vpop.f32.mrf.mxu0 }
  0xdc   : > { %v743_v28 = vadd.f32 %v3950_v22, %v742_v27  ;;  %v869_v29 = vmax.f32 %v751_v25, 0.0 }
  0xdd   : > { %v3329_v30 = vpop.f32.mrf.mxu0 }
  0xde   : > { %v867_v32 = vmax.f32 %v743_v28, 0.0  ;;  %v899_v36 = vpack.c.bf16 %v869_v29, %v868_v33  ;;  %v764_v40 = vadd.f32 %v3329_v30, %v3950_v22 }
  0xdf   : > { %v755_v34 = vpop.f32.mrf.mxu0 }
  0xe0   : > { %v898_v35 = vpack.c.bf16 %v867_v32, %v866_v31  ;;  %v756_v38 = vadd.f32 %v3950_v22, %v755_v34  ;;  %v872_v47 = vmax.f32 %v764_v40, 0.0 }
  0xe1   : > { %v3330_v37 = vpop.f32.mrf.mxu0 }
  0xe2   : > { %v767_v39 = vadd.f32 %v3330_v37, %v3950_v22  ;;  %3357 = vmatprep.mubr.msk.bf16.mxu1 %vm929_vm1, %v898_v35  ;;  %v870_v45 = vmax.f32 %v756_v38, 0.0 }
  0xe3   : > { %v758_v41 = vpop.f32.mrf.mxu0  ;;  %3358 = vmatmul.mubr.msk.bf16.vlgmr.msra.gmra.mxu1 %vm929_vm1, %v899_v36 }
  0xe4   : > { %v759_v42 = vadd.f32 %v3950_v22, %v758_v41  ;;  %3390 = vmatpush3.bf16.msra.mxu1 %v3622_v19  ;;  %v873_v43 = vmax.f32 %v767_v39, 0.0 }
  0xe5   : > { %v3333_v44 = vpop.f32.mrf.mxu0 }
  0xe6   : > { %v871_v46 = vmax.f32 %v759_v42, 0.0  ;;  %v901_v50 = vpack.c.bf16 %v873_v43, %v872_v47  ;;  %v780_v54 = vadd.f32 %v3333_v44, %v3950_v22 }
  0xe7   : > { %v771_v48 = vpop.f32.mrf.mxu0 }
  0xe8   : > { %v900_v49 = vpack.c.bf16 %v871_v46, %v870_v45  ;;  %v772_v52 = vadd.f32 %v3950_v22, %v771_v48  ;;  %v876_v61 = vmax.f32 %v780_v54, 0.0 }
  0xe9   : > { %v3334_v51 = vpop.f32.mrf.mxu0 }
  0xea   : > { %v783_v53 = vadd.f32 %v3334_v51, %v3950_v22  ;;  %3361 = vmatprep.mubr.msk.bf16.mxu1 %vm929_vm1, %v900_v49  ;;  %v874_v59 = vmax.f32 %v772_v52, 0.0 }
  0xeb   : > { %v774_v55 = vpop.f32.mrf.mxu0  ;;  %3362 = vmatmul.mubr.msk.bf16.gmra.mxu1 %vm929_vm1, %v901_v50 }
  0xec   : > { %v775_v56 = vadd.f32 %v3950_v22, %v774_v55  ;;  %v877_v57 = vmax.f32 %v783_v53, 0.0 }
  0xed   : > { %v3337_v58 = vpop.f32.mrf.mxu0 }
  0xee   : > { %v875_v60 = vmax.f32 %v775_v56, 0.0  ;;  %v903_v0 = vpack.c.bf16 %v877_v57, %v876_v61  ;;  %v796_v4 = vadd.f32 %v3337_v58, %v3950_v22 }
  0xef   : > { %v787_v62 = vpop.f32.mrf.mxu0 }
  0xf0   : > { %v902_v63 = vpack.c.bf16 %v875_v60, %v874_v59  ;;  %v788_v2 = vadd.f32 %v3950_v22, %v787_v62  ;;  %v880_v11 = vmax.f32 %v796_v4, 0.0 }
  0xf1   : > { %v3338_v1 = vpop.f32.mrf.mxu0 }
  0xf2   : > { %v799_v3 = vadd.f32 %v3338_v1, %v3950_v22  ;;  %3365 = vmatprep.mubr.msk.bf16.mxu1 %vm929_vm1, %v902_v63  ;;  %v878_v9 = vmax.f32 %v788_v2, 0.0 }
  0xf3   : > { %v790_v5 = vpop.f32.mrf.mxu0  ;;  %3366 = vmatmul.mubr.msk.bf16.gmra.mxu1 %vm929_vm1, %v903_v0 }
  0xf4   : > { %v791_v6 = vadd.f32 %v3950_v22, %v790_v5  ;;  %v881_v7 = vmax.f32 %v799_v3, 0.0 }
  0xf5   : > { %v3341_v8 = vpop.f32.mrf.mxu0 }
  0xf6   : > { %v879_v10 = vmax.f32 %v791_v6, 0.0  ;;  %v905_v14 = vpack.c.bf16 %v881_v7, %v880_v11  ;;  %v812_v18 = vadd.f32 %v3341_v8, %v3950_v22  ;;  %v4003_v8 = vld [vmem:[%s4642_s7] ss:$0 sm:$0xff] }
  0xf7   : > { %v803_v12 = vpop.f32.mrf.mxu0 }
  0xf8   : > { %v904_v13 = vpack.c.bf16 %v879_v10, %v878_v9  ;;  %v804_v16 = vadd.f32 %v3950_v22, %v803_v12  ;;  %v884_v26 = vmax.f32 %v812_v18, 0.0 }
  0xf9   : > { %v3342_v15 = vpop.f32.mrf.mxu0 }
  0xfa   : > { %v815_v17 = vadd.f32 %v3342_v15, %v3950_v22  ;;  %3369 = vmatprep.mubr.msk.bf16.mxu1 %vm929_vm1, %v904_v13  ;;  %v882_v24 = vmax.f32 %v804_v16, 0.0 }
  0xfb   : > { %v806_v19 = vpop.f32.mrf.mxu0  ;;  %3370 = vmatmul.mubr.msk.bf16.gmra.mxu1 %vm929_vm1, %v905_v14 }
  0xfc   : > { %v807_v20 = vadd.f32 %v3950_v22, %v806_v19  ;;  %v885_v21 = vmax.f32 %v815_v17, 0.0 }
  0xfd   : > { %v3345_v23 = vpop.f32.mrf.mxu0 }
  0xfe   : > { %v883_v25 = vmax.f32 %v807_v20, 0.0  ;;  %v907_v29 = vpack.c.bf16 %v885_v21, %v884_v26  ;;  %v828_v33 = vadd.f32 %v3345_v23, %v3950_v22 }
  0xff   : > { %v819_v27 = vpop.f32.mrf.mxu0 }
 0x100   : > { %v906_v28 = vpack.c.bf16 %v883_v25, %v882_v24  ;;  %v820_v31 = vadd.f32 %v3950_v22, %v819_v27  ;;  %v888_v40 = vmax.f32 %v828_v33, 0.0 }
 0x101   : > { %v3346_v30 = vpop.f32.mrf.mxu0 }
 0x102   : > { %v831_v32 = vadd.f32 %v3346_v30, %v3950_v22  ;;  %3373 = vmatprep.mubr.msk.bf16.mxu1 %vm929_vm1, %v906_v28  ;;  %v886_v38 = vmax.f32 %v820_v31, 0.0 }
 0x103   : > { %v822_v34 = vpop.f32.mrf.mxu0  ;;  %3374 = vmatmul.mubr.msk.bf16.gmra.mxu1 %vm929_vm1, %v907_v29 }
 0x104   : > { %v823_v35 = vadd.f32 %v3950_v22, %v822_v34  ;;  %v889_v36 = vmax.f32 %v831_v32, 0.0 }
 0x105   : > { %v3349_v37 = vpop.f32.mrf.mxu0 }
 0x106   : > { %v887_v39 = vmax.f32 %v823_v35, 0.0  ;;  %v909_v43 = vpack.c.bf16 %v889_v36, %v888_v40  ;;  %v844_v47 = vadd.f32 %v3349_v37, %v3950_v22 }
 0x107   : > { %v835_v41 = vpop.f32.mrf.mxu0 }
 0x108   : > { %v908_v42 = vpack.c.bf16 %v887_v39, %v886_v38  ;;  %v836_v45 = vadd.f32 %v3950_v22, %v835_v41  ;;  %v892_v54 = vmax.f32 %v844_v47, 0.0 }
 0x109   : > { %v3350_v44 = vpop.f32.mrf.mxu0 }
 0x10a   : > { %v847_v46 = vadd.f32 %v3350_v44, %v3950_v22  ;;  %3377 = vmatprep.mubr.msk.bf16.mxu1 %vm929_vm1, %v908_v42  ;;  %v890_v52 = vmax.f32 %v836_v45, 0.0 }
 0x10b   : > { %v838_v48 = vpop.f32.mrf.mxu0  ;;  %3378 = vmatmul.mubr.msk.bf16.gmra.mxu1 %vm929_vm1, %v909_v43 }
 0x10c   : > { %v839_v49 = vadd.f32 %v3950_v22, %v838_v48  ;;  %v893_v50 = vmax.f32 %v847_v46, 0.0 }
 0x10d   : > { %v3353_v51 = vpop.f32.mrf.mxu0 }
 0x10e   : > { %v891_v53 = vmax.f32 %v839_v49, 0.0  ;;  %v911_v57 = vpack.c.bf16 %v893_v50, %v892_v54  ;;  %v860_v61 = vadd.f32 %v3353_v51, %v3950_v22 }
 0x10f   : > { %v851_v55 = vpop.f32.mrf.mxu0 }
 0x110   : > { %v910_v56 = vpack.c.bf16 %v891_v53, %v890_v52  ;;  %v852_v59 = vadd.f32 %v3950_v22, %v851_v55  ;;  %v896_v3 = vmax.f32 %v860_v61, 0.0 }
 0x111   : > { %v3354_v58 = vpop.f32.mrf.mxu0 }
 0x112   : > { %v863_v60 = vadd.f32 %v3354_v58, %v3950_v22  ;;  %3381 = vmatprep.mubr.msk.bf16.mxu1 %vm929_vm1, %v910_v56  ;;  %v894_v1 = vmax.f32 %v852_v59, 0.0 }
 0x113   : > { %v854_v62 = vpop.f32.mrf.mxu0  ;;  %3382 = vmatmul.mubr.msk.bf16.gmra.mxu1 %vm929_vm1, %v911_v57 }
 0x114   : > { %v855_v63 = vadd.f32 %v3950_v22, %v854_v62  ;;  %v897_v0 = vmax.f32 %v863_v60, 0.0 }
 0x116   : > { %v895_v2 = vmax.f32 %v855_v63, 0.0  ;;  %v913_v5 = vpack.c.bf16 %v897_v0, %v896_v3 }
 0x118   : > { %v912_v4 = vpack.c.bf16 %v895_v2, %v894_v1 }
 0x11a   : > { %3385 = vmatprep.mubr.msk.bf16.mxu1 %vm929_vm1, %v912_v4 }
 0x11b   : > { %3386 = vmatmul.mubr.msk.bf16.gmra.mxu1 %vm929_vm1, %v913_v5 }
 0x1a3   : > { %v3359_v6 = vpop.f32.mrf.mxu1 }
 0x1a4   : > { %v1021_v11 = vadd.f32 %v3359_v6, %v4003_v8 }
 0x1a5   : > { %v1012_v7 = vpop.f32.mrf.mxu1 }
 0x1a6   : > { %v1013_v22 = vadd.f32 %v4003_v8, %v1012_v7  ;;  %v1141_v18 = vmax.f32 %v1021_v11, 0.0 }
 0x1a7   : > { %v3360_v9 = vpop.f32.mrf.mxu1 }
 0x1a8   : > { %v1024_v10 = vadd.f32 %v3360_v9, %v4003_v8  ;;  %v1139_v16 = vmax.f32 %v1013_v22, 0.0 }
 0x1a9   : > { %v1015_v12 = vpop.f32.mrf.mxu1 }
 0x1aa   : > { %v1016_v13 = vadd.f32 %v4003_v8, %v1015_v12  ;;  %v1142_v14 = vmax.f32 %v1024_v10, 0.0 }
 0x1ab   : > { %v3363_v15 = vpop.f32.mrf.mxu1 }
 0x1ac   : > { %v1140_v17 = vmax.f32 %v1016_v13, 0.0  ;;  %v1172_v21 = vpack.c.bf16 %v1142_v14, %v1141_v18  ;;  %v1037_v26 = vadd.f32 %v3363_v15, %v4003_v8 }
 0x1ad   : > { %v1028_v19 = vpop.f32.mrf.mxu1 }
 0x1ae   : > { %v1171_v20 = vpack.c.bf16 %v1140_v17, %v1139_v16  ;;  %v1029_v24 = vadd.f32 %v4003_v8, %v1028_v19  ;;  %v1145_v33 = vmax.f32 %v1037_v26, 0.0 }
 0x1af   : > { %v3364_v23 = vpop.f32.mrf.mxu1 }
 0x1b0   : > { %v1040_v25 = vadd.f32 %v3364_v23, %v4003_v8  ;;  %3391 = vmatprep.mubr.msk.bf16.mxu1 %vm929_vm1, %v1171_v20  ;;  %v1143_v31 = vmax.f32 %v1029_v24, 0.0 }
 0x1b1   : > { %v1031_v27 = vpop.f32.mrf.mxu1  ;;  %3392 = vmatmul.mubr.msk.bf16.vlgmr.msra.gmra.mxu1 %vm929_vm1, %v1172_v21 }
 0x1b2   : > { %v1032_v28 = vadd.f32 %v4003_v8, %v1031_v27  ;;  %v1146_v29 = vmax.f32 %v1040_v25, 0.0 }
 0x1b3   : > { %v3367_v30 = vpop.f32.mrf.mxu1 }
 0x1b4   : > { %v1144_v32 = vmax.f32 %v1032_v28, 0.0  ;;  %v1174_v36 = vpack.c.bf16 %v1146_v29, %v1145_v33  ;;  %v1053_v40 = vadd.f32 %v3367_v30, %v4003_v8 }
 0x1b5   : > { %v1044_v34 = vpop.f32.mrf.mxu1 }
 0x1b6   : > { %v1173_v35 = vpack.c.bf16 %v1144_v32, %v1143_v31  ;;  %v1045_v38 = vadd.f32 %v4003_v8, %v1044_v34  ;;  %v1149_v47 = vmax.f32 %v1053_v40, 0.0 }
 0x1b7   : > { %v3368_v37 = vpop.f32.mrf.mxu1 }
 0x1b8   : > { %v1056_v39 = vadd.f32 %v3368_v37, %v4003_v8  ;;  %3395 = vmatprep.mubr.msk.bf16.mxu1 %vm929_vm1, %v1173_v35  ;;  %v1147_v45 = vmax.f32 %v1045_v38, 0.0 }
 0x1b9   : > { %v1047_v41 = vpop.f32.mrf.mxu1  ;;  %3396 = vmatmul.mubr.msk.bf16.gmra.mxu1 %vm929_vm1, %v1174_v36 }
 0x1ba   : > { %v1048_v42 = vadd.f32 %v4003_v8, %v1047_v41  ;;  %v1150_v43 = vmax.f32 %v1056_v39, 0.0 }
 0x1bb   : > { %v3371_v44 = vpop.f32.mrf.mxu1 }
 0x1bc   : > { %v1148_v46 = vmax.f32 %v1048_v42, 0.0  ;;  %v1176_v50 = vpack.c.bf16 %v1150_v43, %v1149_v47  ;;  %v1069_v54 = vadd.f32 %v3371_v44, %v4003_v8 }
 0x1bd   : > { %v1060_v48 = vpop.f32.mrf.mxu1 }
 0x1be   : > { %v1175_v49 = vpack.c.bf16 %v1148_v46, %v1147_v45  ;;  %v1061_v52 = vadd.f32 %v4003_v8, %v1060_v48  ;;  %v1153_v61 = vmax.f32 %v1069_v54, 0.0 }
 0x1bf   : > { %v3372_v51 = vpop.f32.mrf.mxu1 }
 0x1c0   : > { %v1072_v53 = vadd.f32 %v3372_v51, %v4003_v8  ;;  %3399 = vmatprep.mubr.msk.bf16.mxu1 %vm929_vm1, %v1175_v49  ;;  %v1151_v59 = vmax.f32 %v1061_v52, 0.0 }
 0x1c1   : > { %v1063_v55 = vpop.f32.mrf.mxu1  ;;  %3400 = vmatmul.mubr.msk.bf16.gmra.mxu1 %vm929_vm1, %v1176_v50 }
 0x1c2   : > { %v1064_v56 = vadd.f32 %v4003_v8, %v1063_v55  ;;  %v1154_v57 = vmax.f32 %v1072_v53, 0.0 }
 0x1c3   : > { %v3375_v58 = vpop.f32.mrf.mxu1 }
 0x1c4   : > { %v1152_v60 = vmax.f32 %v1064_v56, 0.0  ;;  %v1178_v0 = vpack.c.bf16 %v1154_v57, %v1153_v61  ;;  %v1085_v4 = vadd.f32 %v3375_v58, %v4003_v8  ;;  %v4056_v56 = vld [vmem:[%s4638_s3] ss:$0 sm:$0xff] }
 0x1c5   : > { %v1076_v62 = vpop.f32.mrf.mxu1 }
 0x1c6   : > { %v1177_v63 = vpack.c.bf16 %v1152_v60, %v1151_v59  ;;  %v1077_v2 = vadd.f32 %v4003_v8, %v1076_v62  ;;  %v1157_v11 = vmax.f32 %v1085_v4, 0.0 }
 0x1c7   : > { %v3376_v1 = vpop.f32.mrf.mxu1 }
 0x1c8   : > { %v1088_v3 = vadd.f32 %v3376_v1, %v4003_v8  ;;  %3403 = vmatprep.mubr.msk.bf16.mxu1 %vm929_vm1, %v1177_v63  ;;  %v1155_v22 = vmax.f32 %v1077_v2, 0.0 }
 0x1c9   : > { %v1079_v5 = vpop.f32.mrf.mxu1  ;;  %3404 = vmatmul.mubr.msk.bf16.gmra.mxu1 %vm929_vm1, %v1178_v0 }
 0x1ca   : > { %v1080_v6 = vadd.f32 %v4003_v8, %v1079_v5  ;;  %v1158_v7 = vmax.f32 %v1088_v3, 0.0 }
 0x1cb   : > { %v3379_v9 = vpop.f32.mrf.mxu1 }
 0x1cc   : > { %v1156_v10 = vmax.f32 %v1080_v6, 0.0  ;;  %v1180_v14 = vpack.c.bf16 %v1158_v7, %v1157_v11  ;;  %v1101_v18 = vadd.f32 %v3379_v9, %v4003_v8 }
 0x1cd   : > { %v1092_v12 = vpop.f32.mrf.mxu1 }
 0x1ce   : > { %v1179_v13 = vpack.c.bf16 %v1156_v10, %v1155_v22  ;;  %v1093_v16 = vadd.f32 %v4003_v8, %v1092_v12  ;;  %v1161_v26 = vmax.f32 %v1101_v18, 0.0 }
 0x1cf   : > { %v3380_v15 = vpop.f32.mrf.mxu1 }
 0x1d0   : > { %v1104_v17 = vadd.f32 %v3380_v15, %v4003_v8  ;;  %3407 = vmatprep.mubr.msk.bf16.mxu1 %vm929_vm1, %v1179_v13  ;;  %v1159_v24 = vmax.f32 %v1093_v16, 0.0 }
 0x1d1   : > { %v1095_v19 = vpop.f32.mrf.mxu1  ;;  %3408 = vmatmul.mubr.msk.bf16.gmra.mxu1 %vm929_vm1, %v1180_v14 }
 0x1d2   : > { %v1096_v20 = vadd.f32 %v4003_v8, %v1095_v19  ;;  %v1162_v21 = vmax.f32 %v1104_v17, 0.0 }
 0x1d3   : > { %v3383_v23 = vpop.f32.mrf.mxu1 }
 0x1d4   : > { %v1160_v25 = vmax.f32 %v1096_v20, 0.0  ;;  %v1182_v29 = vpack.c.bf16 %v1162_v21, %v1161_v26  ;;  %v1117_v33 = vadd.f32 %v3383_v23, %v4003_v8 }
 0x1d5   : > { %v1108_v27 = vpop.f32.mrf.mxu1 }
 0x1d6   : > { %v1181_v28 = vpack.c.bf16 %v1160_v25, %v1159_v24  ;;  %v1109_v31 = vadd.f32 %v4003_v8, %v1108_v27  ;;  %v1165_v40 = vmax.f32 %v1117_v33, 0.0 }
 0x1d7   : > { %v3384_v30 = vpop.f32.mrf.mxu1 }
 0x1d8   : > { %v1120_v32 = vadd.f32 %v3384_v30, %v4003_v8  ;;  %3411 = vmatprep.mubr.msk.bf16.mxu1 %vm929_vm1, %v1181_v28  ;;  %v1163_v38 = vmax.f32 %v1109_v31, 0.0 }
 0x1d9   : > { %v1111_v34 = vpop.f32.mrf.mxu1  ;;  %3412 = vmatmul.mubr.msk.bf16.gmra.mxu1 %vm929_vm1, %v1182_v29 }
 0x1da   : > { %v1112_v35 = vadd.f32 %v4003_v8, %v1111_v34  ;;  %v1166_v36 = vmax.f32 %v1120_v32, 0.0 }
 0x1db   : > { %v3387_v37 = vpop.f32.mrf.mxu1 }
 0x1dc   : > { %v1164_v39 = vmax.f32 %v1112_v35, 0.0  ;;  %v1184_v43 = vpack.c.bf16 %v1166_v36, %v1165_v40  ;;  %v1133_v47 = vadd.f32 %v3387_v37, %v4003_v8 }
 0x1dd   : > { %v1124_v41 = vpop.f32.mrf.mxu1 }
 0x1de   : > { %v1183_v42 = vpack.c.bf16 %v1164_v39, %v1163_v38  ;;  %v1125_v45 = vadd.f32 %v4003_v8, %v1124_v41  ;;  %v1169_v53 = vmax.f32 %v1133_v47, 0.0 }
 0x1df   : > { %v3388_v44 = vpop.f32.mrf.mxu1 }
 0x1e0   : > { %v1136_v46 = vadd.f32 %v3388_v44, %v4003_v8  ;;  %3415 = vmatprep.mubr.msk.bf16.mxu1 %vm929_vm1, %v1183_v42  ;;  %v1167_v51 = vmax.f32 %v1125_v45, 0.0 }
 0x1e1   : > { %v1127_v48 = vpop.f32.mrf.mxu1  ;;  %3416 = vmatmul.mubr.msk.bf16.gmra.mxu1 %vm929_vm1, %v1184_v43 }
 0x1e2   : > { %v1128_v49 = vadd.f32 %v4003_v8, %v1127_v48  ;;  %v1170_v50 = vmax.f32 %v1136_v46, 0.0 }
 0x1e4   : > { %v1168_v52 = vmax.f32 %v1128_v49, 0.0  ;;  %v1186_v55 = vpack.c.bf16 %v1170_v50, %v1169_v53 }
 0x1e6   : > { %v1185_v54 = vpack.c.bf16 %v1168_v52, %v1167_v51 }
 0x1e8   : > { %3419 = vmatprep.mubr.msk.bf16.mxu1 %vm929_vm1, %v1185_v54 }
 0x1e9   : > { %3420 = vmatmul.mubr.msk.bf16.gmra.mxu1 %vm929_vm1, %v1186_v55 }
 0x271   : > { %v3393_v57 = vpop.f32.mrf.mxu1 }
 0x272   : > { %v4059_v58 = vadd.f32 %v3393_v57, %v4056_v56 }
 0x273   : > { %v1284_v8 = vpop.f32.mrf.mxu1 }
 0x274   : > { %v4062_v59 = vadd.f32 %v4056_v56, %v1284_v8  ;;  %1415 = vmax.xlane.f32.xlu1 %v4059_v58  ;;  %v3623_v8 = vld [vmem:[%s4190_s24 + $0x38] sm:$0xff]  }
 0x275   : > { %v3394_v60 = vpop.f32.mrf.mxu1  ;;  %3423 = vmatprep.subr.bf16.mxu0 %v3623_v8 }
 0x276   : > { %v4066_v61 = vadd.f32 %v3394_v60, %v4056_v56  ;;  %1411 = vmax.xlane.f32.xlu0 %v4062_v59  ;;  %v3624_v60 = vld [vmem:[%s4190_s24 + $0x30] sm:$0xff]   ;;  %3424 = vmatpush3.bf16.msra.mxu0 %v3623_v8 }
 0x277   : > { %v1287_v62 = vpop.f32.mrf.mxu1  ;;  %3425 = vmatprep.subr.bf16.mxu0 %v3624_v60 }
 0x278   : > { %v4070_v63 = vadd.f32 %v4056_v56, %v1287_v62  ;;  %1417 = vmax.xlane.f32.xlu1 %v4066_v61  ;;  %v3626_v62 = vld [vmem:[%s4190_s24 + $0x20] sm:$0xff]  }
 0x279   : > { %v3397_v0 = vpop.f32.mrf.mxu1 }
 0x27a   : > { %1413 = vmax.xlane.f32.xlu0 %v4070_v63  ;;  %v4079_v5 = vadd.f32 %v3397_v0, %v4056_v56  ;;  %3426 = vmatpush3.bf16.msra.mxu0 %v3624_v60  ;;  %v3627_v0 = vld [vmem:[%s4190_s24 + $0x18] sm:$0xff]  }
 0x27b   : > { %v1300_v1 = vpop.f32.mrf.mxu1 }
 0x27c   : > { %v4075_v2 = vadd.f32 %v4056_v56, %v1300_v1 }
 0x27d   : > { %v3398_v3 = vpop.f32.mrf.mxu1 }
 0x27e   : > { %1419 = vmax.xlane.f32.xlu0 %v4075_v2  ;;  %v4087_v22 = vadd.f32 %v3398_v3, %v4056_v56 }
 0x27f   : > { %v1303_v4 = vpop.f32.mrf.mxu1 }
 0x280   : > { %v4082_v6 = vadd.f32 %v4056_v56, %v1303_v4 }
 0x281   : > { %v3401_v7 = vpop.f32.mrf.mxu1 }
 0x282   : > { %1421 = vmax.xlane.f32.xlu1 %v4082_v6  ;;  %1423 = vmax.xlane.f32.xlu0 %v4079_v5  ;;  %v4095_v13 = vadd.f32 %v3401_v7, %v4056_v56 }
 0x283   : > { %v1316_v9 = vpop.f32.mrf.mxu1 }
 0x284   : > { %v4090_v10 = vadd.f32 %v4056_v56, %v1316_v9 }
 0x285   : > { %v3402_v11 = vpop.f32.mrf.mxu1 }
 0x286   : > { %1425 = vmax.xlane.f32.xlu1 %v4087_v22  ;;  %1427 = vmax.xlane.f32.xlu0 %v4090_v10  ;;  %v4103_v17 = vadd.f32 %v3402_v11, %v4056_v56 }
 0x287   : > { %v1319_v12 = vpop.f32.mrf.mxu1 }
 0x288   : > { %v4098_v14 = vadd.f32 %v4056_v56, %v1319_v12 }
 0x289   : > { %v3405_v15 = vpop.f32.mrf.mxu1 }
 0x28a   : > { %1429 = vmax.xlane.f32.xlu1 %v4098_v14  ;;  %1431 = vmax.xlane.f32.xlu0 %v4095_v13  ;;  %v4111_v21 = vadd.f32 %v3405_v15, %v4056_v56 }
 0x28b   : > { %v1332_v16 = vpop.f32.mrf.mxu1 }
 0x28c   : > { %v4106_v18 = vadd.f32 %v4056_v56, %v1332_v16 }
 0x28d   : > { %v3406_v19 = vpop.f32.mrf.mxu1 }
 0x28e   : > { %1433 = vmax.xlane.f32.xlu1 %v4103_v17  ;;  %1435 = vmax.xlane.f32.xlu0 %v4106_v18  ;;  %v4119_v26 = vadd.f32 %v3406_v19, %v4056_v56 }
 0x28f   : > { %v1335_v20 = vpop.f32.mrf.mxu1 }
 0x290   : > { %v4114_v23 = vadd.f32 %v4056_v56, %v1335_v20 }
 0x291   : > { %v3409_v24 = vpop.f32.mrf.mxu1 }
 0x292   : > { %1437 = vmax.xlane.f32.xlu1 %v4114_v23  ;;  %1439 = vmax.xlane.f32.xlu0 %v4111_v21  ;;  %v4127_v30 = vadd.f32 %v3409_v24, %v4056_v56 }
 0x293   : > { %v1348_v25 = vpop.f32.mrf.mxu1 }
 0x294   : > { %v4122_v27 = vadd.f32 %v4056_v56, %v1348_v25 }
 0x295   : > { %v3410_v28 = vpop.f32.mrf.mxu1 }
 0x296   : > { %1441 = vmax.xlane.f32.xlu1 %v4119_v26  ;;  %1443 = vmax.xlane.f32.xlu0 %v4122_v27  ;;  %v4135_v34 = vadd.f32 %v3410_v28, %v4056_v56 }
 0x297   : > { %v1351_v29 = vpop.f32.mrf.mxu1 }
 0x298   : > { %v4130_v31 = vadd.f32 %v4056_v56, %v1351_v29 }
 0x299   : > { %v3413_v32 = vpop.f32.mrf.mxu1 }
 0x29a   : > { %1445 = vmax.xlane.f32.xlu1 %v4130_v31  ;;  %1447 = vmax.xlane.f32.xlu0 %v4127_v30  ;;  %v4143_v38 = vadd.f32 %v3413_v32, %v4056_v56 }
 0x29b   : > { %v1364_v33 = vpop.f32.mrf.mxu1 }
 0x29c   : > { %v4138_v35 = vadd.f32 %v4056_v56, %v1364_v33 }
 0x29d   : > { %v3414_v36 = vpop.f32.mrf.mxu1 }
 0x29e   : > { %1449 = vmax.xlane.f32.xlu1 %v4135_v34  ;;  %1451 = vmax.xlane.f32.xlu0 %v4138_v35  ;;  %v4151_v42 = vadd.f32 %v3414_v36, %v4056_v56 }
 0x29f   : > { %v1367_v37 = vpop.f32.mrf.mxu1 }
 0x2a0   : > { %v4146_v39 = vadd.f32 %v4056_v56, %v1367_v37 }
 0x2a1   : > { %v3417_v40 = vpop.f32.mrf.mxu1 }
 0x2a2   : > { %1453 = vmax.xlane.f32.xlu1 %v4146_v39  ;;  %1455 = vmax.xlane.f32.xlu0 %v4143_v38  ;;  %v4159_v46 = vadd.f32 %v3417_v40, %v4056_v56 }
 0x2a3   : > { %v1380_v41 = vpop.f32.mrf.mxu1 }
 0x2a4   : > { %v4154_v43 = vadd.f32 %v4056_v56, %v1380_v41 }
 0x2a5   : > { %v3418_v44 = vpop.f32.mrf.mxu1 }
 0x2a6   : > { %1457 = vmax.xlane.f32.xlu1 %v4151_v42  ;;  %1459 = vmax.xlane.f32.xlu0 %v4154_v43  ;;  %v4167_v50 = vadd.f32 %v3418_v44, %v4056_v56 }
 0x2a7   : > { %v1383_v45 = vpop.f32.mrf.mxu1 }
 0x2a8   : > { %v4162_v47 = vadd.f32 %v4056_v56, %v1383_v45 }
 0x2a9   : > { %v3421_v48 = vpop.f32.mrf.mxu1 }
 0x2aa   : > { %1461 = vmax.xlane.f32.xlu1 %v4162_v47  ;;  %1463 = vmax.xlane.f32.xlu0 %v4159_v46  ;;  %v4175_v54 = vadd.f32 %v3421_v48, %v4056_v56 }
 0x2ab   : > { %v1396_v49 = vpop.f32.mrf.mxu1 }
 0x2ac   : > { %v4170_v51 = vadd.f32 %v4056_v56, %v1396_v49 }
 0x2ad   : > { %v3422_v52 = vpop.f32.mrf.mxu1 }
 0x2ae   : > { %1465 = vmax.xlane.f32.xlu1 %v4167_v50  ;;  %1467 = vmax.xlane.f32.xlu0 %v4170_v51  ;;  %v4183_v57 = vadd.f32 %v3422_v52, %v4056_v56 }
 0x2af   : > { %v1399_v53 = vpop.f32.mrf.mxu1 }
 0x2b0   : > { %v4178_v55 = vadd.f32 %v4056_v56, %v1399_v53  ;;  %v3625_v56 = vld [vmem:[%s4190_s24 + $0x28] sm:$0xff]  }
 0x2b1   : > { %3427 = vmatprep.subr.bf16.mxu0 %v3625_v56 }
 0x2b2   : > { %1469 = vmax.xlane.f32.xlu1 %v4178_v55  ;;  %1471 = vmax.xlane.f32.xlu0 %v4175_v54 }
 0x2b3   : > { %3428 = vmatpush3.bf16.msra.mxu0 %v3625_v56 }
 0x2b4   : > { %3429 = vmatprep.subr.bf16.mxu0 %v3626_v62 }
 0x2b6   : > { %1473 = vmax.xlane.f32.xlu1 %v4183_v57 }
 0x2b7   : > { %3430 = vmatpush3.bf16.msra.mxu0 %v3626_v62 }
 0x2b8   : > { %3431 = vmatprep.subr.bf16.mxu0 %v3627_v0 }
 0x2bb   : > { %3432 = vmatpush3.bf16.msra.mxu0 %v3627_v0 }
 0x2fd   : > { %v1416_v1 = vpop.xlane.xlu1 %1415 }
 0x2fe   : > { %v1477_v3 = vsub.f32 %v4059_v58, %v1416_v1 }
 0x2ff   : > { %v1412_v4 = vpop.xlane.xlu0 %1411 }
 0x300   : > { %v1475_v7 = vsub.f32 %v4062_v59, %v1412_v4  ;;  %v1511_v12 = vmul.f32 1.442695, %v1477_v3 }
 0x301   : > { %v1418_v9 = vpop.xlane.xlu1 %1417 }
 0x302   : > { %v1507_v11 = vmul.f32 1.442695, %v1475_v7  ;;  %v1478_v15 = vsub.f32 %v4066_v61, %v1418_v9 }
 0x303   : > { %v1414_v16 = vpop.xlane.xlu0 %1413 }
 0x304   : > { %3636 = vpow2.f32 %v1507_v11  ;;  %v1476_v19 = vsub.f32 %v4070_v63, %v1414_v16  ;;  %v1513_v24 = vmul.f32 1.442695, %v1478_v15  ;;  %v3628_v11 = vld [vmem:[%s4190_s24 + $0x10] sm:$0xff]  }
 0x305   : > { %3638 = vpow2.f32 %v1511_v12  ;;  %3433 = vmatprep.subr.bf16.mxu0 %v3628_v11 }
 0x306   : > { %v1509_v20 = vmul.f32 1.442695, %v1476_v19  ;;  %3434 = vmatpush3.bf16.msra.mxu0 %v3628_v11 }
 0x307   : > { %v1420_v25 = vpop.xlane.xlu0 %1419 }
 0x308   : > { %3640 = vpow2.f32 %v1509_v20  ;;  %v1479_v28 = vsub.f32 %v4075_v2, %v1420_v25 }
 0x309   : > { %3642 = vpow2.f32 %v1513_v24 }
 0x30a   : > { %v1515_v58 = vmul.f32 1.442695, %v1479_v28 }
 0x30b   : > { %v1422_v29 = vpop.xlane.xlu1 %1421  ;;  %v1424_v59 = vpop.xlane.xlu0 %1423 }
 0x30c   : > { %3644 = vpow2.f32 %v1515_v58  ;;  %v1480_v32 = vsub.f32 %v4082_v6, %v1422_v29  ;;  %v1481_v61 = vsub.f32 %v4079_v5, %v1424_v59 }
 0x30e   : > { %v1517_v33 = vmul.f32 1.442695, %v1480_v32  ;;  %v1519_v36 = vmul.f32 1.442695, %v1481_v61 }
 0x30f   : > { %v1426_v37 = vpop.xlane.xlu1 %1425  ;;  %v1428_v63 = vpop.xlane.xlu0 %1427 }
 0x310   : > { %3646 = vpow2.f32 %v1517_v33  ;;  %v1482_v40 = vsub.f32 %v4087_v22, %v1426_v37  ;;  %v1483_v41 = vsub.f32 %v4090_v10, %v1428_v63 }
 0x311   : > { %v4206_v44 = vpop.eup %3636  ;;  %3648 = vpow2.f32 %v1519_v36 }
 0x312   : > { %v1521_v2 = vmul.f32 1.442695, %v1482_v40  ;;  %v1523_v45 = vmul.f32 1.442695, %v1483_v41  ;;  %1571 = vadd.xlane.f32.xlu0 %v4206_v44  ;;  %v4209_v49 = vpop.eup %3638 }
 0x313   : > { %v1430_v48 = vpop.xlane.xlu1 %1429  ;;  %v1432_v6 = vpop.xlane.xlu0 %1431 }
 0x314   : > { %3650 = vpow2.f32 %v1521_v2  ;;  %v1484_v5 = vsub.f32 %v4098_v14, %v1430_v48  ;;  %v1485_v52 = vsub.f32 %v4095_v13, %v1432_v6 }
 0x315   : > { %v4213_v53 = vpop.eup %3640  ;;  %3652 = vpow2.f32 %v1523_v45 }
 0x316   : > { %v1525_v22 = vmul.f32 1.442695, %v1484_v5  ;;  %v1527_v10 = vmul.f32 1.442695, %v1485_v52  ;;  %1575 = vadd.xlane.f32.xlu0 %v4209_v49  ;;  %1573 = vadd.xlane.f32.xlu1 %v4213_v53  ;;  %v4217_v56 = vpop.eup %3642  ;;  %v3630_v52 = vld [vmem:[%s4190_s24] sm:$0xff]  }
 0x317   : > { %v1434_v8 = vpop.xlane.xlu1 %1433  ;;  %v1436_v60 = vpop.xlane.xlu0 %1435 }
 0x318   : > { %3654 = vpow2.f32 %v1525_v22  ;;  %v1486_v62 = vsub.f32 %v4103_v17, %v1434_v8  ;;  %v1487_v14 = vsub.f32 %v4106_v18, %v1436_v60 }
 0x319   : > { %v4221_v13 = vpop.eup %3644  ;;  %3656 = vpow2.f32 %v1527_v10 }
 0x31a   : > { %v1529_v0 = vmul.f32 1.442695, %v1486_v62  ;;  %v1531_v1 = vmul.f32 1.442695, %v1487_v14  ;;  %1577 = vadd.xlane.f32.xlu1 %v4217_v56  ;;  %1579 = vadd.xlane.f32.xlu0 %v4221_v13 }
 0x31b   : > { %v1438_v3 = vpop.xlane.xlu1 %1437  ;;  %v1440_v4 = vpop.xlane.xlu0 %1439 }
 0x31c   : > { %3658 = vpow2.f32 %v1529_v0  ;;  %v1488_v7 = vsub.f32 %v4114_v23, %v1438_v3  ;;  %v1489_v9 = vsub.f32 %v4111_v21, %v1440_v4 }
 0x31d   : > { %v4228_v17 = vpop.eup %3646  ;;  %3660 = vpow2.f32 %v1531_v1 }
 0x31e   : > { %v4230_v18 = vpop.eup %3648  ;;  %v1533_v12 = vmul.f32 1.442695, %v1488_v7  ;;  %v1535_v15 = vmul.f32 1.442695, %v1489_v9  ;;  %1581 = vadd.xlane.f32.xlu1 %v4228_v17 }
 0x31f   : > { %1583 = vadd.xlane.f32.xlu0 %v4230_v18  ;;  %v1442_v16 = vpop.xlane.xlu1 %1441  ;;  %v1444_v19 = vpop.xlane.xlu0 %1443 }
 0x320   : > { %3662 = vpow2.f32 %v1533_v12  ;;  %v1490_v23 = vsub.f32 %v4119_v26, %v1442_v16  ;;  %v1491_v21 = vsub.f32 %v4122_v27, %v1444_v19  ;;  %v3629_v27 = vld [vmem:[%s4190_s24 + $0x8] sm:$0xff]  }
 0x321   : > { %v4236_v20 = vpop.eup %3650  ;;  %3664 = vpow2.f32 %v1535_v15  ;;  %3435 = vmatprep.subr.bf16.mxu0 %v3629_v27 }
 0x322   : > { %v4238_v24 = vpop.eup %3652  ;;  %v1537_v25 = vmul.f32 1.442695, %v1490_v23  ;;  %v1539_v28 = vmul.f32 1.442695, %v1491_v21  ;;  %1585 = vadd.xlane.f32.xlu1 %v4236_v20  ;;  %3436 = vmatpush3.bf16.msra.mxu0 %v3629_v27 }
 0x323   : > { %1587 = vadd.xlane.f32.xlu0 %v4238_v24  ;;  %v1446_v58 = vpop.xlane.xlu1 %1445  ;;  %v1448_v29 = vpop.xlane.xlu0 %1447  ;;  %3437 = vmatprep.subr.bf16.mxu0 %v3630_v52 }
 0x324   : > { %3666 = vpow2.f32 %v1537_v25  ;;  %v1492_v59 = vsub.f32 %v4130_v31, %v1446_v58  ;;  %v1493_v26 = vsub.f32 %v4127_v30, %v1448_v29 }
 0x325   : > { %v4244_v32 = vpop.eup %3654  ;;  %3668 = vpow2.f32 %v1539_v28 }
 0x326   : > { %v4247_v61 = vpop.eup %3656  ;;  %v1541_v33 = vmul.f32 1.442695, %v1492_v59  ;;  %v1543_v36 = vmul.f32 1.442695, %v1493_v26  ;;  %1589 = vadd.xlane.f32.xlu1 %v4244_v32  ;;  %3438 = vmatpush3.bf16.msra.mxu0 %v3630_v52 }
 0x327   : > { %1591 = vadd.xlane.f32.xlu0 %v4247_v61  ;;  %v1450_v37 = vpop.xlane.xlu1 %1449  ;;  %v1452_v63 = vpop.xlane.xlu0 %1451 }
 0x328   : > { %3670 = vpow2.f32 %v1541_v33  ;;  %v1494_v31 = vsub.f32 %v4135_v34, %v1450_v37  ;;  %v1495_v30 = vsub.f32 %v4138_v35, %v1452_v63 }
 0x329   : > { %v4253_v40 = vpop.eup %3658  ;;  %3672 = vpow2.f32 %v1543_v36 }
 0x32a   : > { %v4255_v41 = vpop.eup %3660  ;;  %v1545_v2 = vmul.f32 1.442695, %v1494_v31  ;;  %v1547_v45 = vmul.f32 1.442695, %v1495_v30  ;;  %1593 = vadd.xlane.f32.xlu1 %v4253_v40 }
 0x32b   : > { %1595 = vadd.xlane.f32.xlu0 %v4255_v41  ;;  %v1454_v48 = vpop.xlane.xlu1 %1453  ;;  %v1456_v6 = vpop.xlane.xlu0 %1455 }
 0x32c   : > { %3674 = vpow2.f32 %v1545_v2  ;;  %v1496_v34 = vsub.f32 %v4146_v39, %v1454_v48  ;;  %v1497_v35 = vsub.f32 %v4143_v38, %v1456_v6 }
 0x32d   : > { %v4261_v5 = vpop.eup %3662  ;;  %3676 = vpow2.f32 %v1547_v45 }
 0x32e   : > { %v4264_v22 = vpop.eup %3664  ;;  %v1549_v10 = vmul.f32 1.442695, %v1496_v34  ;;  %v1551_v8 = vmul.f32 1.442695, %v1497_v35  ;;  %1597 = vadd.xlane.f32.xlu1 %v4261_v5  ;;  %v3631_v34 = vld [vmem:[%s4643_s8] sm:$0xff]  }
 0x32f   : > { %1599 = vadd.xlane.f32.xlu0 %v4264_v22  ;;  %v1458_v60 = vpop.xlane.xlu1 %1457  ;;  %v1460_v62 = vpop.xlane.xlu0 %1459  ;;  %3471 = vmatprep.subr.bf16.mxu0 %v3631_v34 }
 0x330   : > { %3678 = vpow2.f32 %v1549_v10  ;;  %v1498_v39 = vsub.f32 %v4151_v42, %v1458_v60  ;;  %v1499_v38 = vsub.f32 %v4154_v43, %v1460_v62  ;;  %3577 = vmatprep.subr.bf16.mxu1 %v3631_v34 }
 0x331   : > { %v4270_v14 = vpop.eup %3666  ;;  %3680 = vpow2.f32 %v1551_v8  ;;  %3578 = vmatpush3.bf16.msra.mxu1 %v3631_v34 }
 0x332   : > { %v4272_v0 = vpop.eup %3668  ;;  %v1553_v1 = vmul.f32 1.442695, %v1498_v39  ;;  %v1555_v3 = vmul.f32 1.442695, %v1499_v38  ;;  %1601 = vadd.xlane.f32.xlu1 %v4270_v14 }
 0x333   : > { %1603 = vadd.xlane.f32.xlu0 %v4272_v0  ;;  %v1462_v4 = vpop.xlane.xlu1 %1461  ;;  %v1464_v7 = vpop.xlane.xlu0 %1463 }
 0x334   : > { %3682 = vpow2.f32 %v1553_v1  ;;  %v1500_v9 = vsub.f32 %v4162_v47, %v1462_v4  ;;  %v1501_v42 = vsub.f32 %v4159_v46, %v1464_v7 }
 0x335   : > { %v4278_v43 = vpop.eup %3670  ;;  %3684 = vpow2.f32 %v1555_v3 }
 0x336   : > { %v4280_v11 = vpop.eup %3672  ;;  %v1557_v12 = vmul.f32 1.442695, %v1500_v9  ;;  %v1559_v15 = vmul.f32 1.442695, %v1501_v42  ;;  %1605 = vadd.xlane.f32.xlu1 %v4278_v43 }
 0x337   : > { %1607 = vadd.xlane.f32.xlu0 %v4280_v11  ;;  %v1466_v16 = vpop.xlane.xlu1 %1465  ;;  %v1468_v19 = vpop.xlane.xlu0 %1467 }
 0x338   : > { %3686 = vpow2.f32 %v1557_v12  ;;  %v1502_v23 = vsub.f32 %v4167_v50, %v1466_v16  ;;  %v1503_v47 = vsub.f32 %v4170_v51, %v1468_v19 }
 0x339   : > { %v4286_v21 = vpop.eup %3674  ;;  %3688 = vpow2.f32 %v1559_v15 }
 0x33a   : > { %v4288_v46 = vpop.eup %3676  ;;  %v1561_v25 = vmul.f32 1.442695, %v1502_v23  ;;  %v1563_v28 = vmul.f32 1.442695, %v1503_v47  ;;  %1609 = vadd.xlane.f32.xlu1 %v4286_v21 }
 0x33b   : > { %1611 = vadd.xlane.f32.xlu0 %v4288_v46  ;;  %v1470_v58 = vpop.xlane.xlu1 %1469  ;;  %v1472_v29 = vpop.xlane.xlu0 %1471 }
 0x33c   : > { %3690 = vpow2.f32 %v1561_v25  ;;  %v1504_v59 = vsub.f32 %v4178_v55, %v1470_v58  ;;  %v1505_v50 = vsub.f32 %v4175_v54, %v1472_v29 }
 0x33d   : > { %v4294_v26 = vpop.eup %3678  ;;  %3692 = vpow2.f32 %v1563_v28 }
 0x33e   : > { %v4296_v51 = vpop.eup %3680  ;;  %v1565_v27 = vmul.f32 1.442695, %v1504_v59  ;;  %v1567_v33 = vmul.f32 1.442695, %v1505_v50  ;;  %1613 = vadd.xlane.f32.xlu1 %v4294_v26 }
 0x33f   : > { %1615 = vadd.xlane.f32.xlu0 %v4296_v51  ;;  %v1474_v36 = vpop.xlane.xlu1 %1473 }
 0x340   : > { %3694 = vpow2.f32 %v1565_v27  ;;  %v1506_v37 = vsub.f32 %v4183_v57, %v1474_v36 }
 0x341   : > { %v4301_v63 = vpop.eup %3682  ;;  %3696 = vpow2.f32 %v1567_v33 }
 0x342   : > { %v4303_v55 = vpop.eup %3684  ;;  %v1569_v54 = vmul.f32 1.442695, %v1506_v37  ;;  %1617 = vadd.xlane.f32.xlu1 %v4301_v63 }
 0x343   : > { %1619 = vadd.xlane.f32.xlu0 %v4303_v55 }
 0x344   : > { %3698 = vpow2.f32 %v1569_v54 }
 0x345   : > { %v4307_v31 = vpop.eup %3686 }
 0x346   : > { %v4309_v30 = vpop.eup %3688  ;;  %1621 = vadd.xlane.f32.xlu1 %v4307_v31 }
 0x347   : > { %1623 = vadd.xlane.f32.xlu0 %v4309_v30 }
 0x349   : > { %v4313_v57 = vpop.eup %3690 }
 0x34a   : > { %v4315_v2 = vpop.eup %3692  ;;  %1625 = vadd.xlane.f32.xlu1 %v4313_v57 }
 0x34b   : > { %1627 = vadd.xlane.f32.xlu0 %v4315_v2 }
 0x34d   : > { %v4319_v45 = vpop.eup %3694 }
 0x34e   : > { %v4321_v48 = vpop.eup %3696  ;;  %1629 = vadd.xlane.f32.xlu1 %v4319_v45 }
 0x34f   : > { %1631 = vadd.xlane.f32.xlu0 %v4321_v48 }
 0x351   : > { %v4325_v6 = vpop.eup %3698 }
 0x352   : > { %1633 = vadd.xlane.f32.xlu1 %v4325_v6 }
 0x39b   : > { %v1572_v35 = vpop.xlane.xlu0 %1571 }
 0x39c   : > { %3700 = vrcp.f32 %v1572_v35 }
 0x39f   : > { %v1574_v52 = vpop.xlane.xlu1 %1573  ;;  %v1576_v10 = vpop.xlane.xlu0 %1575 }
 0x3a0   : > { %3702 = vrcp.f32 %v1574_v52 }
 0x3a1   : > { %3704 = vrcp.f32 %v1576_v10 }
 0x3a3   : > { %v1578_v8 = vpop.xlane.xlu1 %1577  ;;  %v1580_v60 = vpop.xlane.xlu0 %1579 }
 0x3a4   : > { %3706 = vrcp.f32 %v1578_v8 }
 0x3a5   : > { %3708 = vrcp.f32 %v1580_v60 }
 0x3a7   : > { %v1582_v62 = vpop.xlane.xlu1 %1581 }
 0x3a8   : > { %3710 = vrcp.f32 %v1582_v62  ;;  %v1584_v39 = vpop.xlane.xlu0 %1583 }
 0x3a9   : > { %3712 = vrcp.f32 %v1584_v39  ;;  %v3701_v38 = vpop.eup %3700 }
 0x3aa   : > { %v1667_v7 = vmul.f32 %v3701_v38, %v4206_v44 }
 0x3ab   : > { %v1586_v1 = vpop.xlane.xlu1 %1585 }
 0x3ac   : > { %3714 = vrcp.f32 %v1586_v1  ;;  %v1588_v3 = vpop.xlane.xlu0 %1587 }
 0x3ad   : > { %v3703_v4 = vpop.eup %3702  ;;  %3716 = vrcp.f32 %v1588_v3 }
 0x3ae   : > { %v1668_v9 = vmul.f32 %v3703_v4, %v4213_v53  ;;  %v3705_v42 = vpop.eup %3704 }
 0x3af   : > { %v1590_v12 = vpop.xlane.xlu1 %1589  ;;  %v1669_v23 = vmul.f32 %v3705_v42, %v4209_v49 }
 0x3b0   : > { %3718 = vrcp.f32 %v1590_v12  ;;  %v1592_v15 = vpop.xlane.xlu0 %1591  ;;  %v1699_v16 = vpack.c.bf16 %v1668_v9, %v1667_v7 }
 0x3b1   : > { %v3707_v19 = vpop.eup %3706  ;;  %3720 = vrcp.f32 %v1592_v15 }
 0x3b2   : > { %3439 = vmatprep.mubr.bf16.mxu0 %v1699_v16  ;;  %v1670_v47 = vmul.f32 %v3707_v19, %v4217_v56  ;;  %v3709_v25 = vpop.eup %3708 }
 0x3b3   : > { %v1594_v28 = vpop.xlane.xlu1 %1593  ;;  %v1671_v53 = vmul.f32 %v3709_v25, %v4221_v13 }
 0x3b4   : > { %3722 = vrcp.f32 %v1594_v28  ;;  %v1596_v58 = vpop.xlane.xlu0 %1595  ;;  %v1700_v29 = vpack.c.bf16 %v1670_v47, %v1669_v23 }
 0x3b5   : > { %v3711_v44 = vpop.eup %3710  ;;  %3724 = vrcp.f32 %v1596_v58 }
 0x3b6   : > { %3440 = vmatmul.mubr.bf16.vlgmr.msra.gmra.mxu0 %v1700_v29  ;;  %v1672_v59 = vmul.f32 %v3711_v44, %v4228_v17  ;;  %v3713_v50 = vpop.eup %3712 }
 0x3b7   : > { %v1598_v27 = vpop.xlane.xlu1 %1597  ;;  %3472 = vmatpush3.bf16.msra.mxu0 %v3631_v34  ;;  %v1673_v56 = vmul.f32 %v3713_v50, %v4230_v18 }
 0x3b8   : > { %3726 = vrcp.f32 %v1598_v27  ;;  %v1600_v33 = vpop.xlane.xlu0 %1599  ;;  %v1701_v49 = vpack.c.bf16 %v1672_v59, %v1671_v53 }
 0x3b9   : > { %v3715_v36 = vpop.eup %3714  ;;  %3728 = vrcp.f32 %v1600_v33 }
 0x3ba   : > { %3443 = vmatprep.mubr.bf16.mxu0 %v1701_v49  ;;  %v1674_v37 = vmul.f32 %v3715_v36, %v4236_v20  ;;  %v3717_v54 = vpop.eup %3716 }
 0x3bb   : > { %v1602_v35 = vpop.xlane.xlu1 %1601  ;;  %v1675_v17 = vmul.f32 %v3717_v54, %v4238_v24 }
 0x3bc   : > { %3730 = vrcp.f32 %v1602_v35  ;;  %v1604_v52 = vpop.xlane.xlu0 %1603  ;;  %v1702_v13 = vpack.c.bf16 %v1674_v37, %v1673_v56 }
 0x3bd   : > { %v3719_v10 = vpop.eup %3718  ;;  %3732 = vrcp.f32 %v1604_v52 }
 0x3be   : > { %3444 = vmatmul.mubr.bf16.gmra.mxu0 %v1702_v13  ;;  %v1676_v34 = vmul.f32 %v3719_v10, %v4244_v32  ;;  %v3721_v8 = vpop.eup %3720 }
 0x3bf   : > { %v1606_v60 = vpop.xlane.xlu1 %1605  ;;  %v1677_v20 = vmul.f32 %v3721_v8, %v4247_v61 }
 0x3c0   : > { %3734 = vrcp.f32 %v1606_v60  ;;  %v1608_v62 = vpop.xlane.xlu0 %1607  ;;  %v1703_v39 = vpack.c.bf16 %v1676_v34, %v1675_v17 }
 0x3c1   : > { %v3723_v18 = vpop.eup %3722  ;;  %3736 = vrcp.f32 %v1608_v62 }
 0x3c2   : > { %3447 = vmatprep.mubr.bf16.mxu0 %v1703_v39  ;;  %v1678_v38 = vmul.f32 %v3723_v18, %v4253_v40  ;;  %v3725_v1 = vpop.eup %3724 }
 0x3c3   : > { %v1610_v3 = vpop.xlane.xlu1 %1609  ;;  %v1679_v32 = vmul.f32 %v3725_v1, %v4255_v41 }
 0x3c4   : > { %3738 = vrcp.f32 %v1610_v3  ;;  %v1612_v4 = vpop.xlane.xlu0 %1611  ;;  %v1704_v7 = vpack.c.bf16 %v1678_v38, %v1677_v20 }
 0x3c5   : > { %v3727_v24 = vpop.eup %3726  ;;  %3740 = vrcp.f32 %v1612_v4 }
 0x3c6   : > { %3448 = vmatmul.mubr.bf16.gmra.mxu0 %v1704_v7  ;;  %v1680_v9 = vmul.f32 %v3727_v24, %v4261_v5  ;;  %v3729_v42 = vpop.eup %3728 }
 0x3c7   : > { %v1614_v12 = vpop.xlane.xlu1 %1613  ;;  %v1681_v40 = vmul.f32 %v3729_v42, %v4264_v22 }
 0x3c8   : > { %3742 = vrcp.f32 %v1614_v12  ;;  %v1616_v15 = vpop.xlane.xlu0 %1615  ;;  %v1705_v16 = vpack.c.bf16 %v1680_v9, %v1679_v32 }
 0x3c9   : > { %v3731_v61 = vpop.eup %3730  ;;  %3744 = vrcp.f32 %v1616_v15 }
 0x3ca   : > { %3451 = vmatprep.mubr.bf16.mxu0 %v1705_v16  ;;  %v1682_v19 = vmul.f32 %v3731_v61, %v4270_v14  ;;  %v3733_v23 = vpop.eup %3732 }
 0x3cb   : > { %v1618_v47 = vpop.xlane.xlu1 %1617  ;;  %v1683_v5 = vmul.f32 %v3733_v23, %v4272_v0 }
 0x3cc   : > { %3746 = vrcp.f32 %v1618_v47  ;;  %v1620_v25 = vpop.xlane.xlu0 %1619  ;;  %v1706_v28 = vpack.c.bf16 %v1682_v19, %v1681_v40 }
 0x3cd   : > { %v3735_v41 = vpop.eup %3734  ;;  %3748 = vrcp.f32 %v1620_v25 }
 0x3ce   : > { %3452 = vmatmul.mubr.bf16.gmra.mxu0 %v1706_v28  ;;  %v1684_v58 = vmul.f32 %v3735_v41, %v4278_v43  ;;  %v3737_v29 = vpop.eup %3736 }
 0x3cf   : > { %v1622_v44 = vpop.xlane.xlu1 %1621  ;;  %v1685_v14 = vmul.f32 %v3737_v29, %v4280_v11 }
 0x3d0   : > { %3750 = vrcp.f32 %v1622_v44  ;;  %v1624_v53 = vpop.xlane.xlu0 %1623  ;;  %v1707_v59 = vpack.c.bf16 %v1684_v58, %v1683_v5  ;;  %v3764_v44 = vld [vmem:[%s3906_s19] sm:$0xff]  }
 0x3d1   : > { %v3739_v22 = vpop.eup %3738  ;;  %3752 = vrcp.f32 %v1624_v53 }
 0x3d2   : > { %3455 = vmatprep.mubr.bf16.mxu0 %v1707_v59  ;;  %v1686_v50 = vmul.f32 %v3739_v22, %v4286_v21  ;;  %v3741_v27 = vpop.eup %3740 }
 0x3d3   : > { %v1626_v33 = vpop.xlane.xlu1 %1625  ;;  %v1687_v43 = vmul.f32 %v3741_v27, %v4288_v46  ;;  %v3634_v27 = vld [vmem:[%s4645_s10] sm:$0xff]  }
 0x3d4   : > { %3754 = vrcp.f32 %v1626_v33  ;;  %v1628_v49 = vpop.xlane.xlu0 %1627  ;;  %v1708_v36 = vpack.c.bf16 %v1686_v50, %v1685_v14 }
 0x3d5   : > { %v3743_v0 = vpop.eup %3742  ;;  %3756 = vrcp.f32 %v1628_v49 }
 0x3d6   : > { %3456 = vmatmul.mubr.bf16.gmra.mxu0 %v1708_v36  ;;  %v1688_v56 = vmul.f32 %v3743_v0, %v4294_v26  ;;  %v3745_v37 = vpop.eup %3744 }
 0x3d7   : > { %v1630_v54 = vpop.xlane.xlu1 %1629  ;;  %v1689_v21 = vmul.f32 %v3745_v37, %v4296_v51 }
 0x3d8   : > { %3758 = vrcp.f32 %v1630_v54  ;;  %v1632_v35 = vpop.xlane.xlu0 %1631  ;;  %v1709_v52 = vpack.c.bf16 %v1688_v56, %v1687_v43 }
 0x3d9   : > { %v3747_v11 = vpop.eup %3746  ;;  %3760 = vrcp.f32 %v1632_v35 }
 0x3da   : > { %3459 = vmatprep.mubr.bf16.mxu0 %v1709_v52  ;;  %v1690_v13 = vmul.f32 %v3747_v11, %v4301_v63  ;;  %v3749_v10 = vpop.eup %3748 }
 0x3db   : > { %v1634_v17 = vpop.xlane.xlu1 %1633  ;;  %v1691_v46 = vmul.f32 %v3749_v10, %v4303_v55 }
 0x3dc   : > { %3762 = vrcp.f32 %v1634_v17  ;;  %v1710_v34 = vpack.c.bf16 %v1690_v13, %v1689_v21 }
 0x3dd   : > { %v3751_v8 = vpop.eup %3750 }
 0x3de   : > { %3460 = vmatmul.mubr.bf16.gmra.mxu0 %v1710_v34  ;;  %v1692_v26 = vmul.f32 %v3751_v8, %v4307_v31  ;;  %v3753_v60 = vpop.eup %3752 }
 0x3df   : > { %v1693_v18 = vmul.f32 %v3753_v60, %v4309_v30  ;;  %v3632_v30 = vld [vmem:[%s4645_s10 + $0x8] sm:$0xff]  }
 0x3e0   : > { %v1711_v62 = vpack.c.bf16 %v1692_v26, %v1691_v46  ;;  %3541 = vmatprep.subr.bf16.mxu1 %v3632_v30 }
 0x3e1   : > { %v3755_v39 = vpop.eup %3754 }
 0x3e2   : > { %3463 = vmatprep.mubr.bf16.mxu0 %v1711_v62  ;;  %v1694_v51 = vmul.f32 %v3755_v39, %v4313_v57  ;;  %v3757_v20 = vpop.eup %3756  ;;  %v3633_v57 = vld [vmem:[%s4646_s11 + $0x8] sm:$0xff]  }
 0x3e3   : > { %v1695_v1 = vmul.f32 %v3757_v20, %v4315_v2  ;;  %3505 = vmatprep.subr.bf16.mxu0 %v3633_v57  ;;  %v3765_v20 = vld [vmem:[%s3906_s19 + $0x8] sm:$0xff]  }
 0x3e4   : > { %v1712_v63 = vpack.c.bf16 %v1694_v51, %v1693_v18  ;;  %v3635_v51 = vld [vmem:[%s4646_s11] sm:$0xff]  }
 0x3e5   : > { %v3759_v38 = vpop.eup %3758 }
 0x3e6   : > { %3464 = vmatmul.mubr.bf16.gmra.mxu0 %v1712_v63  ;;  %v1696_v3 = vmul.f32 %v3759_v38, %v4319_v45  ;;  %v3761_v4 = vpop.eup %3760  ;;  %v3766_v63 = vld [vmem:[%s3906_s19 + $0x10] sm:$0xff]   ;;  %v3767_v38 = vld [vmem:[%s3906_s19 + $0x18] sm:$0xff]  }
 0x3e7   : > { %v1697_v31 = vmul.f32 %v3761_v4, %v4321_v48  ;;  %v3770_v4 = vld [vmem:[%s3906_s19 + $0x30] sm:$0xff]  }
 0x3e8   : > { %v1713_v55 = vpack.c.bf16 %v1696_v3, %v1695_v1  ;;  %v3768_v1 = vld [vmem:[%s3906_s19 + $0x20] sm:$0xff]   ;;  %v3769_v3 = vld [vmem:[%s3906_s19 + $0x28] sm:$0xff]  }
 0x3e9   : > { %v3763_v7 = vpop.eup %3762 }
 0x3ea   : > { %3467 = vmatprep.mubr.bf16.mxu0 %v1713_v55  ;;  %v1698_v24 = vmul.f32 %v3763_v7, %v4325_v6  ;;  %v3771_v55 = vld [vmem:[%s3906_s19 + $0x38] sm:$0xff]   ;;  %v3772_v7 = vld [vmem:[%s3906_s19 + $0x40] sm:$0xff]  }
 0x3ec   : > { %v1714_v32 = vpack.c.bf16 %v1698_v24, %v1697_v31  ;;  %v3773_v31 = vld [vmem:[%s3906_s19 + $0x48] sm:$0xff]   ;;  %v3774_v24 = vld [vmem:[%s3906_s19 + $0x50] sm:$0xff]  }
 0x3ee   : > { %3468 = vmatmul.mubr.bf16.gmra.mxu0 %v1714_v32  ;;  %v3775_v32 = vld [vmem:[%s3906_s19 + $0x58] sm:$0xff]  }
 0x476   : > { %v3441_v2 = vpop.f32.mrf.mxu0 }
 0x478   : > { %v1813_v45 = vpop.f32.mrf.mxu0 }
 0x47a   : > { %v3442_v9 = vpop.f32.mrf.mxu0 }
 0x47b   : > { %v1941_v48 = vpack.c.bf16 %v3442_v9, %v3441_v2  ;;  %v3778_v2 = vld [vmem:[%s3906_s19 + $0x70] sm:$0xff]  }
 0x47c   : > { %v1816_v42 = vpop.f32.mrf.mxu0 }
 0x47d   : > { %v1940_v12 = vpack.c.bf16 %v1816_v42, %v1813_v45  ;;  %v3779_v45 = vld [vmem:[%s3906_s19 + $0x78] sm:$0xff]  }
 0x47e   : > { %v3445_v15 = vpop.f32.mrf.mxu0 }
 0x47f   : > { %3473 = vmatprep.mubr.msk.bf16.mxu0 %vm929_vm1, %v1940_v12  ;;  %v4426_v12 = vld [vmem:[%s4644_s9] ss:$0 sm:$0xff] }
 0x480   : > { %v1829_v6 = vpop.f32.mrf.mxu0  ;;  %3474 = vmatmul.mubr.msk.bf16.vlgmr.msra.gmra.mxu0 %vm929_vm1, %v1941_v48 }
 0x481   : > { %3506 = vmatpush3.bf16.msra.mxu0 %v3633_v57  ;;  %v3777_v57 = vld [vmem:[%s3906_s19 + $0x68] sm:$0xff]  }
 0x482   : > { %v3446_v16 = vpop.f32.mrf.mxu0  ;;  %3507 = vmatprep.subr.bf16.mxu0 %v3635_v51 }
 0x483   : > { %v1943_v19 = vpack.c.bf16 %v3446_v16, %v3445_v15 }
 0x484   : > { %v1832_v61 = vpop.f32.mrf.mxu0 }
 0x485   : > { %v1942_v40 = vpack.c.bf16 %v1832_v61, %v1829_v6  ;;  %3508 = vmatpush3.bf16.msra.mxu0 %v3635_v51 }
 0x486   : > { %v3449_v23 = vpop.f32.mrf.mxu0 }
 0x487   : > { %3477 = vmatprep.mubr.msk.bf16.mxu0 %vm929_vm1, %v1942_v40 }
 0x488   : > { %v1845_v47 = vpop.f32.mrf.mxu0  ;;  %3478 = vmatmul.mubr.msk.bf16.gmra.mxu0 %vm929_vm1, %v1943_v19 }
 0x48a   : > { %v3450_v25 = vpop.f32.mrf.mxu0 }
 0x48b   : > { %v1945_v5 = vpack.c.bf16 %v3450_v25, %v3449_v23 }
 0x48c   : > { %v1848_v28 = vpop.f32.mrf.mxu0 }
 0x48d   : > { %v1944_v41 = vpack.c.bf16 %v1848_v28, %v1845_v47 }
 0x48e   : > { %v3453_v58 = vpop.f32.mrf.mxu0 }
 0x48f   : > { %3481 = vmatprep.mubr.msk.bf16.mxu0 %vm929_vm1, %v1944_v41 }
 0x490   : > { %v1861_v29 = vpop.f32.mrf.mxu0  ;;  %3482 = vmatmul.mubr.msk.bf16.gmra.mxu0 %vm929_vm1, %v1945_v5 }
 0x491   : > { %3509 = vmatprep.mubr.msk.bf16.mxu0 %vm656_vm0, %v3764_v44 }
 0x492   : > { %v3454_v53 = vpop.f32.mrf.mxu0 }
 0x493   : > { %v1947_v14 = vpack.c.bf16 %v3454_v53, %v3453_v58 }
 0x494   : > { %v1864_v59 = vpop.f32.mrf.mxu0 }
 0x495   : > { %v1946_v22 = vpack.c.bf16 %v1864_v59, %v1861_v29 }
 0x496   : > { %v3457_v50 = vpop.f32.mrf.mxu0 }
 0x497   : > { %3485 = vmatprep.mubr.msk.bf16.mxu1 %vm929_vm1, %v1946_v22 }
 0x498   : > { %v1877_v33 = vpop.f32.mrf.mxu0  ;;  %3486 = vmatmul.mubr.msk.bf16.vlgmr.msra.gmra.mxu1 %vm929_vm1, %v1947_v14  ;;  %3510 = vmatmul.mubr.msk.bf16.vlgmr.msra.gmra.mxu0 %vm656_vm0, %v3765_v20 }
 0x499   : > { %3542 = vmatpush3.bf16.msra.mxu1 %v3632_v30  ;;  %3513 = vmatprep.mubr.msk.bf16.mxu0 %vm656_vm0, %v3766_v63  ;;  %v3776_v30 = vld [vmem:[%s3906_s19 + $0x60] sm:$0xff]  }
 0x49a   : > { %v3458_v49 = vpop.f32.mrf.mxu0  ;;  %3543 = vmatprep.subr.bf16.mxu1 %v3634_v27 }
 0x49b   : > { %v1949_v43 = vpack.c.bf16 %v3458_v49, %v3457_v50 }
 0x49c   : > { %v1880_v36 = vpop.f32.mrf.mxu0 }
 0x49d   : > { %v1948_v0 = vpack.c.bf16 %v1880_v36, %v1877_v33  ;;  %3544 = vmatpush3.bf16.msra.mxu1 %v3634_v27 }
 0x49e   : > { %v3461_v56 = vpop.f32.mrf.mxu0 }
 0x49f   : > { %3489 = vmatprep.mubr.msk.bf16.mxu1 %vm929_vm1, %v1948_v0 }
 0x4a0   : > { %v1893_v37 = vpop.f32.mrf.mxu0  ;;  %3490 = vmatmul.mubr.msk.bf16.gmra.mxu1 %vm929_vm1, %v1949_v43  ;;  %3514 = vmatmul.mubr.msk.bf16.gmra.mxu0 %vm656_vm0, %v3767_v38 }
 0x4a1   : > { %3517 = vmatprep.mubr.msk.bf16.mxu0 %vm656_vm0, %v3768_v1 }
 0x4a2   : > { %v3462_v54 = vpop.f32.mrf.mxu0 }
 0x4a3   : > { %v1951_v11 = vpack.c.bf16 %v3462_v54, %v3461_v56 }
 0x4a4   : > { %v1896_v35 = vpop.f32.mrf.mxu0 }
 0x4a5   : > { %v1950_v52 = vpack.c.bf16 %v1896_v35, %v1893_v37 }
 0x4a6   : > { %v3465_v21 = vpop.f32.mrf.mxu0 }
 0x4a7   : > { %3493 = vmatprep.mubr.msk.bf16.mxu1 %vm929_vm1, %v1950_v52 }
 0x4a8   : > { %v1909_v13 = vpop.f32.mrf.mxu0  ;;  %3494 = vmatmul.mubr.msk.bf16.gmra.mxu1 %vm929_vm1, %v1951_v11  ;;  %3518 = vmatmul.mubr.msk.bf16.gmra.mxu0 %vm656_vm0, %v3769_v3 }
 0x4a9   : > { %3521 = vmatprep.mubr.msk.bf16.mxu0 %vm656_vm0, %v3770_v4 }
 0x4aa   : > { %v3466_v10 = vpop.f32.mrf.mxu0 }
 0x4ab   : > { %v1953_v8 = vpack.c.bf16 %v3466_v10, %v3465_v21 }
 0x4ac   : > { %v1912_v17 = vpop.f32.mrf.mxu0 }
 0x4ad   : > { %v1952_v34 = vpack.c.bf16 %v1912_v17, %v1909_v13 }
 0x4ae   : > { %v3469_v46 = vpop.f32.mrf.mxu0 }
 0x4af   : > { %3497 = vmatprep.mubr.msk.bf16.mxu1 %vm929_vm1, %v1952_v34 }
 0x4b0   : > { %v1925_v26 = vpop.f32.mrf.mxu0  ;;  %3498 = vmatmul.mubr.msk.bf16.gmra.mxu1 %vm929_vm1, %v1953_v8  ;;  %3522 = vmatmul.mubr.msk.bf16.gmra.mxu0 %vm656_vm0, %v3771_v55 }
 0x4b1   : > { %3525 = vmatprep.mubr.msk.bf16.mxu0 %vm656_vm0, %v3772_v7 }
 0x4b2   : > { %v3470_v60 = vpop.f32.mrf.mxu0 }
 0x4b3   : > { %v1955_v18 = vpack.c.bf16 %v3470_v60, %v3469_v46 }
 0x4b4   : > { %v1928_v62 = vpop.f32.mrf.mxu0 }
 0x4b5   : > { %v1954_v39 = vpack.c.bf16 %v1928_v62, %v1925_v26 }
 0x4b7   : > { %3501 = vmatprep.mubr.msk.bf16.mxu1 %vm929_vm1, %v1954_v39 }
 0x4b8   : > { %3502 = vmatmul.mubr.msk.bf16.gmra.mxu1 %vm929_vm1, %v1955_v18  ;;  %3526 = vmatmul.mubr.msk.bf16.gmra.mxu0 %vm656_vm0, %v3773_v31 }
 0x4b9   : > { %3529 = vmatprep.mubr.msk.bf16.mxu0 %vm656_vm0, %v3774_v24 }
 0x4c0   : > { %3530 = vmatmul.mubr.msk.bf16.gmra.mxu0 %vm656_vm0, %v3775_v32 }
 0x4c1   : > { %3533 = vmatprep.mubr.msk.bf16.mxu0 %vm656_vm0, %v3776_v30 }
 0x4c8   : > { %3534 = vmatmul.mubr.msk.bf16.gmra.mxu0 %vm656_vm0, %v3777_v57 }
 0x4c9   : > { %3537 = vmatprep.mubr.msk.bf16.mxu0 %vm656_vm0, %v3778_v2 }
 0x4d0   : > { %3538 = vmatmul.mubr.msk.bf16.gmra.mxu0 %vm656_vm0, %v3779_v45 }
 0x540   : > { %v3475_v9 = vpop.f32.mrf.mxu0 }
 0x541   : > { %v2062_v16 = vadd.f32 %v3475_v9, %v4426_v12 }
 0x542   : > { %v2053_v42 = vpop.f32.mrf.mxu0 }
 0x543   : > { %v2054_v15 = vadd.f32 %v4426_v12, %v2053_v42  ;;  %v2182_v28 = vmax.f32 %v2062_v16, 0.0 }
 0x544   : > { %v3476_v48 = vpop.f32.mrf.mxu0 }
 0x545   : > { %v2065_v6 = vadd.f32 %v3476_v48, %v4426_v12  ;;  %v2180_v47 = vmax.f32 %v2054_v15, 0.0 }
 0x546   : > { %v2056_v61 = vpop.f32.mrf.mxu0 }
 0x547   : > { %v2057_v40 = vadd.f32 %v4426_v12, %v2056_v61  ;;  %v2183_v19 = vmax.f32 %v2065_v6, 0.0 }
 0x548   : > { %v3479_v23 = vpop.f32.mrf.mxu0 }
 0x549   : > { %v2181_v25 = vmax.f32 %v2057_v40, 0.0  ;;  %v2213_v58 = vpack.c.bf16 %v2183_v19, %v2182_v28  ;;  %v2078_v59 = vadd.f32 %v3479_v23, %v4426_v12 }
 0x54a   : > { %v2069_v41 = vpop.f32.mrf.mxu0 }
 0x54b   : > { %v2212_v5 = vpack.c.bf16 %v2181_v25, %v2180_v47  ;;  %v2070_v44 = vadd.f32 %v4426_v12, %v2069_v41  ;;  %v2186_v36 = vmax.f32 %v2078_v59, 0.0 }
 0x54c   : > { %v3480_v29 = vpop.f32.mrf.mxu0 }
 0x54d   : > { %v2081_v53 = vadd.f32 %v3480_v29, %v4426_v12  ;;  %3545 = vmatprep.mubr.msk.bf16.mxu1 %vm656_vm0, %v2212_v5  ;;  %v2184_v33 = vmax.f32 %v2070_v44, 0.0 }
 0x54e   : > { %v2072_v22 = vpop.f32.mrf.mxu0  ;;  %3546 = vmatmul.mubr.msk.bf16.vlgmr.msra.gmra.mxu1 %vm656_vm0, %v2213_v58 }
 0x54f   : > { %v2073_v14 = vadd.f32 %v4426_v12, %v2072_v22  ;;  %v2187_v50 = vmax.f32 %v2081_v53, 0.0 }
 0x550   : > { %v3483_v27 = vpop.f32.mrf.mxu0 }
 0x551   : > { %v2185_v49 = vmax.f32 %v2073_v14, 0.0  ;;  %v2215_v56 = vpack.c.bf16 %v2187_v50, %v2186_v36  ;;  %v2094_v52 = vadd.f32 %v3483_v27, %v4426_v12 }
 0x552   : > { %v2085_v0 = vpop.f32.mrf.mxu0 }
 0x553   : > { %v2214_v43 = vpack.c.bf16 %v2185_v49, %v2184_v33  ;;  %v2086_v54 = vadd.f32 %v4426_v12, %v2085_v0  ;;  %v2190_v8 = vmax.f32 %v2094_v52, 0.0 }
 0x554   : > { %v3484_v37 = vpop.f32.mrf.mxu0 }
 0x555   : > { %v2097_v35 = vadd.f32 %v3484_v37, %v4426_v12  ;;  %3549 = vmatprep.mubr.msk.bf16.mxu1 %vm656_vm0, %v2214_v43  ;;  %v2188_v17 = vmax.f32 %v2086_v54, 0.0 }
 0x556   : > { %v2088_v11 = vpop.f32.mrf.mxu0  ;;  %3550 = vmatmul.mubr.msk.bf16.gmra.mxu1 %vm656_vm0, %v2215_v56 }
 0x557   : > { %v2089_v21 = vadd.f32 %v4426_v12, %v2088_v11  ;;  %v2191_v13 = vmax.f32 %v2097_v35, 0.0 }
 0x558   : > { %v3487_v10 = vpop.f32.mrf.mxu1 }
 0x559   : > { %v2189_v34 = vmax.f32 %v2089_v21, 0.0  ;;  %v2217_v60 = vpack.c.bf16 %v2191_v13, %v2190_v8  ;;  %v2110_v51 = vadd.f32 %v3487_v10, %v4426_v12 }
 0x55a   : > { %v2101_v46 = vpop.f32.mrf.mxu1 }
 0x55b   : > { %v2216_v26 = vpack.c.bf16 %v2189_v34, %v2188_v17  ;;  %v2102_v39 = vadd.f32 %v4426_v12, %v2101_v46  ;;  %v2194_v55 = vmax.f32 %v2110_v51, 0.0 }
 0x55c   : > { %v3488_v62 = vpop.f32.mrf.mxu1 }
 0x55d   : > { %v2113_v18 = vadd.f32 %v3488_v62, %v4426_v12  ;;  %3553 = vmatprep.mubr.msk.bf16.mxu1 %vm656_vm0, %v2216_v26  ;;  %v2192_v3 = vmax.f32 %v2102_v39, 0.0 }
 0x55e   : > { %v2104_v20 = vpop.f32.mrf.mxu1  ;;  %3554 = vmatmul.mubr.msk.bf16.gmra.mxu1 %vm656_vm0, %v2217_v60 }
 0x55f   : > { %v2105_v63 = vadd.f32 %v4426_v12, %v2104_v20  ;;  %v2195_v38 = vmax.f32 %v2113_v18, 0.0 }
 0x560   : > { %v3491_v1 = vpop.f32.mrf.mxu1 }
 0x561   : > { %v2193_v4 = vmax.f32 %v2105_v63, 0.0  ;;  %v2219_v24 = vpack.c.bf16 %v2195_v38, %v2194_v55  ;;  %v2126_v2 = vadd.f32 %v3491_v1, %v4426_v12  ;;  %v3511_v63 = vpop.f32.mrf.mxu0 }
 0x562   : > { %v2117_v7 = vpop.f32.mrf.mxu1 }
 0x563   : > { %v2218_v31 = vpack.c.bf16 %v2193_v4, %v2192_v3  ;;  %v2118_v30 = vadd.f32 %v4426_v12, %v2117_v7  ;;  %v2198_v16 = vmax.f32 %v2126_v2, 0.0  ;;  %v2282_v38 = vpop.f32.mrf.mxu0 }
 0x564   : > { %v3492_v32 = vpop.f32.mrf.mxu1 }
 0x565   : > { %v2129_v57 = vadd.f32 %v3492_v32, %v4426_v12  ;;  %3557 = vmatprep.mubr.msk.bf16.mxu1 %vm656_vm0, %v2218_v31  ;;  %v2196_v15 = vmax.f32 %v2118_v30, 0.0  ;;  %v3512_v1 = vpop.f32.mrf.mxu0 }
 0x566   : > { %v2120_v45 = vpop.f32.mrf.mxu1  ;;  %3558 = vmatmul.mubr.msk.bf16.gmra.mxu1 %vm656_vm0, %v2219_v24 }
 0x567   : > { %v2121_v9 = vadd.f32 %v4426_v12, %v2120_v45  ;;  %v2199_v42 = vmax.f32 %v2129_v57, 0.0  ;;  %v2285_v3 = vpop.f32.mrf.mxu0 }
 0x568   : > { %v3495_v48 = vpop.f32.mrf.mxu1 }
 0x569   : > { %v2197_v6 = vmax.f32 %v2121_v9, 0.0  ;;  %v2221_v19 = vpack.c.bf16 %v2199_v42, %v2198_v16  ;;  %v2142_v28 = vadd.f32 %v3495_v48, %v4426_v12  ;;  %v3515_v4 = vpop.f32.mrf.mxu0  ;;  %v4493_v48 = vld [vmem:[%s4647_s12] ss:$0 sm:$0xff] }
 0x56a   : > { %v2133_v61 = vpop.f32.mrf.mxu1 }
 0x56b   : > { %v2220_v40 = vpack.c.bf16 %v2197_v6, %v2196_v15  ;;  %v2134_v47 = vadd.f32 %v4426_v12, %v2133_v61  ;;  %v2202_v59 = vmax.f32 %v2142_v28, 0.0  ;;  %v2298_v55 = vpop.f32.mrf.mxu0 }
 0x56c   : > { %v3496_v23 = vpop.f32.mrf.mxu1 }
 0x56d   : > { %v2145_v25 = vadd.f32 %v3496_v23, %v4426_v12  ;;  %3561 = vmatprep.mubr.msk.bf16.mxu1 %vm656_vm0, %v2220_v40  ;;  %v2200_v44 = vmax.f32 %v2134_v47, 0.0  ;;  %v3516_v7 = vpop.f32.mrf.mxu0 }
 0x56e   : > { %v2136_v41 = vpop.f32.mrf.mxu1  ;;  %3562 = vmatmul.mubr.msk.bf16.gmra.mxu1 %vm656_vm0, %v2221_v19 }
 0x56f   : > { %v2137_v5 = vadd.f32 %v4426_v12, %v2136_v41  ;;  %v2203_v58 = vmax.f32 %v2145_v25, 0.0  ;;  %v2301_v31 = vpop.f32.mrf.mxu0 }
 0x570   : > { %v3499_v29 = vpop.f32.mrf.mxu1 }
 0x571   : > { %v2201_v53 = vmax.f32 %v2137_v5, 0.0  ;;  %v2223_v50 = vpack.c.bf16 %v2203_v58, %v2202_v59  ;;  %v2158_v36 = vadd.f32 %v3499_v29, %v4426_v12  ;;  %v3519_v24 = vpop.f32.mrf.mxu0 }
 0x572   : > { %v2149_v22 = vpop.f32.mrf.mxu1 }
 0x573   : > { %v2222_v14 = vpack.c.bf16 %v2201_v53, %v2200_v44  ;;  %v2150_v33 = vadd.f32 %v4426_v12, %v2149_v22  ;;  %v2206_v52 = vmax.f32 %v2158_v36, 0.0 }
 0x574   : > { %v3500_v27 = vpop.f32.mrf.mxu1 }
 0x575   : > { %v2161_v49 = vadd.f32 %v3500_v27, %v4426_v12  ;;  %3565 = vmatprep.mubr.msk.bf16.mxu1 %vm656_vm0, %v2222_v14  ;;  %v2204_v54 = vmax.f32 %v2150_v33, 0.0 }
 0x576   : > { %v2152_v0 = vpop.f32.mrf.mxu1  ;;  %3566 = vmatmul.mubr.msk.bf16.gmra.mxu1 %vm656_vm0, %v2223_v50 }
 0x577   : > { %v2153_v43 = vadd.f32 %v4426_v12, %v2152_v0  ;;  %v2207_v56 = vmax.f32 %v2161_v49, 0.0 }
 0x578   : > { %v3503_v37 = vpop.f32.mrf.mxu1 }
 0x579   : > { %v2205_v35 = vmax.f32 %v2153_v43, 0.0  ;;  %v2225_v13 = vpack.c.bf16 %v2207_v56, %v2206_v52  ;;  %v2174_v8 = vadd.f32 %v3503_v37, %v4426_v12 }
 0x57a   : > { %v2165_v11 = vpop.f32.mrf.mxu1 }
 0x57b   : > { %v2224_v21 = vpack.c.bf16 %v2205_v35, %v2204_v54  ;;  %v2166_v17 = vadd.f32 %v4426_v12, %v2165_v11  ;;  %v2210_v18 = vmax.f32 %v2174_v8, 0.0 }
 0x57c   : > { %v3504_v10 = vpop.f32.mrf.mxu1 }
 0x57d   : > { %v2177_v34 = vadd.f32 %v3504_v10, %v4426_v12  ;;  %3569 = vmatprep.mubr.msk.bf16.mxu1 %vm656_vm0, %v2224_v21  ;;  %v2208_v62 = vmax.f32 %v2166_v17, 0.0 }
 0x57e   : > { %v2168_v46 = vpop.f32.mrf.mxu1  ;;  %3570 = vmatmul.mubr.msk.bf16.gmra.mxu1 %vm656_vm0, %v2225_v13 }
 0x57f   : > { %v2169_v26 = vadd.f32 %v4426_v12, %v2168_v46  ;;  %v2211_v60 = vmax.f32 %v2177_v34, 0.0  ;;  %v4476_v12 = vpop.f32.mrf.mxu0 }
 0x581   : > { %v2209_v39 = vmax.f32 %v2169_v26, 0.0  ;;  %v2227_v20 = vpack.c.bf16 %v2211_v60, %v2210_v18  ;;  %v4478_v32 = vpop.f32.mrf.mxu0 }
 0x583   : > { %v2226_v51 = vpack.c.bf16 %v2209_v39, %v2208_v62  ;;  %v4480_v30 = vpop.f32.mrf.mxu0 }
 0x585   : > { %3573 = vmatprep.mubr.msk.bf16.mxu1 %vm656_vm0, %v2226_v51  ;;  %v4482_v57 = vpop.f32.mrf.mxu0 }
 0x586   : > { %3574 = vmatmul.mubr.msk.bf16.gmra.mxu1 %vm656_vm0, %v2227_v20 }
 0x587   : > { %v4484_v2 = vpop.f32.mrf.mxu0 }
 0x589   : > { %v4486_v45 = vpop.f32.mrf.mxu0 }
 0x58b   : > { %v4488_v9 = vpop.f32.mrf.mxu0 }
 0x58d   : > { %v4495_v16 = vpop.f32.mrf.mxu0 }
 0x58f   : > { %v4506_v41 = vpop.f32.mrf.mxu0 }
 0x591   : > { %v4512_v33 = vpop.f32.mrf.mxu0 }
 0x593   : > { %v4520_v21 = vpop.f32.mrf.mxu0 }
 0x595   : > { %v4528_v18 = vpop.f32.mrf.mxu0 }
 0x60e   : > { %v3547_v42 = vpop.f32.mrf.mxu1 }
 0x60f   : > { %v2512_v15 = vadd.f32 %v3547_v42, %v3511_v63 }
 0x610   : > { %v2503_v6 = vpop.f32.mrf.mxu1 }
 0x611   : > { %v2639_v61 = vadd.f32 %v4493_v48, %v2512_v15  ;;  %v2504_v40 = vadd.f32 %v2503_v6, %v2282_v38 }
 0x612   : > { %v3548_v19 = vpop.f32.mrf.mxu1 }
 0x613   : > { %v2671_v23 = vmax.f32 %v2639_v61, 0.0  ;;  %v2637_v47 = vadd.f32 %v4493_v48, %v2504_v40  ;;  %v2515_v25 = vadd.f32 %v3548_v19, %v3512_v1 }
 0x614   : > { %v2506_v28 = vpop.f32.mrf.mxu1 }
 0x615   : > { %v3160_v5 = vpack.c.bf16 %v2671_v23, %v2671_v23  ;;  %v2669_v58 = vmax.f32 %v2637_v47, 0.0  ;;  %v2640_v29 = vadd.f32 %v4493_v48, %v2515_v25  ;;  %v2507_v44 = vadd.f32 %v2506_v28, %v2285_v3 }
 0x616   : > { %v3551_v53 = vpop.f32.mrf.mxu1 }
 0x617   : > { %2832 = vst.msk [vmem:[%s4504_s17 + $0x8] sm:$0xf] %vm2829_vm2, %v3160_v5  ;;  %v3158_v59 = vpack.c.bf16 %v2669_v58, %v2669_v58  ;;  %v2672_v22 = vmax.f32 %v2640_v29, 0.0  ;;  %v2638_v14 = vadd.f32 %v4493_v48, %v2507_v44  ;;  %v2528_v50 = vadd.f32 %v3551_v53, %v3515_v4 }
 0x618   : > { %v2519_v27 = vpop.f32.mrf.mxu1 }
 0x619   : > { %2830 = vst.msk [vmem:[%s4504_s17] sm:$0xf] %vm2829_vm2, %v3158_v59  ;;  %v3161_v49 = vpack.c.bf16 %v2672_v22, %v2672_v22  ;;  %v2670_v36 = vmax.f32 %v2638_v14, 0.0  ;;  %v2643_v0 = vadd.f32 %v4493_v48, %v2528_v50  ;;  %v2520_v43 = vadd.f32 %v2519_v27, %v2298_v55 }
 0x61a   : > { %v3552_v56 = vpop.f32.mrf.mxu1 }
 0x61b   : > { %2833 = vst.msk [vmem:[%s4504_s17 + $0xc] sm:$0xf] %vm2829_vm2, %v3161_v49  ;;  %v3159_v37 = vpack.c.bf16 %v2670_v36, %v2670_v36  ;;  %v2675_v54 = vmax.f32 %v2643_v0, 0.0  ;;  %v2641_v35 = vadd.f32 %v4493_v48, %v2520_v43  ;;  %v2531_v52 = vadd.f32 %v3552_v56, %v3516_v7 }
 0x61c   : > { %v2522_v11 = vpop.f32.mrf.mxu1 }
 0x61d   : > { %2831 = vst.msk [vmem:[%s4504_s17 + $0x4] sm:$0xf] %vm2829_vm2, %v3159_v37  ;;  %v3164_v13 = vpack.c.bf16 %v2675_v54, %v2675_v54  ;;  %v2673_v10 = vmax.f32 %v2641_v35, 0.0  ;;  %v2644_v17 = vadd.f32 %v4493_v48, %v2531_v52  ;;  %v2523_v34 = vadd.f32 %v2522_v11, %v2301_v31 }
 0x61e   : > { %v3555_v8 = vpop.f32.mrf.mxu1 }
 0x61f   : > { %2836 = vst.msk [vmem:[%s4504_s17 + $0x18] sm:$0xf] %vm2829_vm2, %v3164_v13  ;;  %v3162_v46 = vpack.c.bf16 %v2673_v10, %v2673_v10  ;;  %v2676_v26 = vmax.f32 %v2644_v17, 0.0  ;;  %v2642_v60 = vadd.f32 %v4493_v48, %v2523_v34  ;;  %v2544_v62 = vadd.f32 %v3555_v8, %v3519_v24  ;;  %v4538_v24 = vpop.f32.mrf.mxu0 }
 0x620   : > { %v2535_v39 = vpop.f32.mrf.mxu1 }
 0x621   : > { %2834 = vst.msk [vmem:[%s4504_s17 + $0x10] sm:$0xf] %vm2829_vm2, %v3162_v46  ;;  %v3165_v51 = vpack.c.bf16 %v2676_v26, %v2676_v26  ;;  %v2674_v20 = vmax.f32 %v2642_v60, 0.0  ;;  %v2647_v63 = vadd.f32 %v4493_v48, %v2544_v62  ;;  %v2536_v38 = vadd.f32 %v2535_v39, %v4476_v12  ;;  %v4548_v25 = vpop.f32.mrf.mxu0 }
 0x622   : > { %v3556_v1 = vpop.f32.mrf.mxu1 }
 0x623   : > { %2837 = vst.msk [vmem:[%s4504_s17 + $0x1c] sm:$0xf] %vm2829_vm2, %v3165_v51  ;;  %v3163_v3 = vpack.c.bf16 %v2674_v20, %v2674_v20  ;;  %v2679_v4 = vmax.f32 %v2647_v63, 0.0  ;;  %v2645_v55 = vadd.f32 %v4493_v48, %v2536_v38  ;;  %v2547_v7 = vadd.f32 %v3556_v1, %v4478_v32  ;;  %v2365_v14 = vpop.f32.mrf.mxu0 }
 0x624   : > { %v2538_v31 = vpop.f32.mrf.mxu1 }
 0x625   : > { %2835 = vst.msk [vmem:[%s4504_s17 + $0x14] sm:$0xf] %vm2829_vm2, %v3163_v3  ;;  %v3168_v42 = vpack.c.bf16 %v2679_v4, %v2679_v4  ;;  %v2677_v15 = vmax.f32 %v2645_v55, 0.0  ;;  %v2648_v6 = vadd.f32 %v4493_v48, %v2547_v7  ;;  %v2539_v12 = vadd.f32 %v2538_v31, %v4480_v30  ;;  %v3535_v54 = vpop.f32.mrf.mxu0 }
 0x626   : > { %v3559_v61 = vpop.f32.mrf.mxu1 }
 0x627   : > { %2840 = vst.msk [vmem:[%s4504_s17 + $0x28] sm:$0xf] %vm2829_vm2, %v3168_v42  ;;  %v3166_v40 = vpack.c.bf16 %v2677_v15, %v2677_v15  ;;  %v2680_v19 = vmax.f32 %v2648_v6, 0.0  ;;  %v2646_v32 = vadd.f32 %v4493_v48, %v2539_v12  ;;  %v2560_v23 = vadd.f32 %v3559_v61, %v4482_v57  ;;  %v2378_v46 = vpop.f32.mrf.mxu0 }
 0x628   : > { %v2551_v47 = vpop.f32.mrf.mxu1 }
 0x629   : > { %2838 = vst.msk [vmem:[%s4504_s17 + $0x20] sm:$0xf] %vm2829_vm2, %v3166_v40  ;;  %v3169_v28 = vpack.c.bf16 %v2680_v19, %v2680_v19  ;;  %v2678_v5 = vmax.f32 %v2646_v32, 0.0  ;;  %v2651_v58 = vadd.f32 %v4493_v48, %v2560_v23  ;;  %v2552_v30 = vadd.f32 %v2551_v47, %v4484_v2  ;;  %v3536_v1 = vpop.f32.mrf.mxu0 }
 0x62a   : > { %v3560_v29 = vpop.f32.mrf.mxu1 }
 0x62b   : > { %2841 = vst.msk [vmem:[%s4504_s17 + $0x2c] sm:$0xf] %vm2829_vm2, %v3169_v28  ;;  %v3167_v44 = vpack.c.bf16 %v2678_v5, %v2678_v5  ;;  %v2683_v53 = vmax.f32 %v2651_v58, 0.0  ;;  %v2649_v57 = vadd.f32 %v4493_v48, %v2552_v30  ;;  %v2563_v59 = vadd.f32 %v3560_v29, %v4486_v45  ;;  %v2381_v12 = vpop.f32.mrf.mxu0 }
 0x62c   : > { %v2554_v22 = vpop.f32.mrf.mxu1 }
 0x62d   : > { %2839 = vst.msk [vmem:[%s4504_s17 + $0x24] sm:$0xf] %vm2829_vm2, %v3167_v44  ;;  %v3172_v50 = vpack.c.bf16 %v2683_v53, %v2683_v53  ;;  %v2681_v27 = vmax.f32 %v2649_v57, 0.0  ;;  %v2652_v49 = vadd.f32 %v4493_v48, %v2563_v59  ;;  %v2555_v2 = vadd.f32 %v2554_v22, %v4488_v9 }
 0x62e   : > { %v3563_v36 = vpop.f32.mrf.mxu1 }
 0x62f   : > { %2844 = vst.msk [vmem:[%s4504_s17 + $0x38] sm:$0xf] %vm2829_vm2, %v3172_v50  ;;  %v3170_v0 = vpack.c.bf16 %v2681_v27, %v2681_v27  ;;  %v2684_v43 = vmax.f32 %v2652_v49, 0.0  ;;  %v2650_v56 = vadd.f32 %v4493_v48, %v2555_v2  ;;  %v2576_v45 = vadd.f32 %v3563_v36, %v4495_v16 }
 0x630   : > { %v2567_v37 = vpop.f32.mrf.mxu1 }
 0x631   : > { %2842 = vst.msk [vmem:[%s4504_s17 + $0x30] sm:$0xf] %vm2829_vm2, %v3170_v0  ;;  %v3173_v35 = vpack.c.bf16 %v2684_v43, %v2684_v43  ;;  %v2682_v52 = vmax.f32 %v2650_v56, 0.0  ;;  %v2655_v11 = vadd.f32 %v4493_v48, %v2576_v45  ;;  %v2568_v9 = vadd.f32 %v2567_v37, %v4506_v41 }
 0x632   : > { %v3564_v13 = vpop.f32.mrf.mxu1 }
 0x633   : > { %2845 = vst.msk [vmem:[%s4504_s17 + $0x3c] sm:$0xf] %vm2829_vm2, %v3173_v35  ;;  %v3171_v10 = vpack.c.bf16 %v2682_v52, %v2682_v52  ;;  %v2687_v17 = vmax.f32 %v2655_v11, 0.0  ;;  %v2653_v34 = vadd.f32 %v4493_v48, %v2568_v9  ;;  %v2579_v16 = vadd.f32 %v3564_v13, %v4512_v33 }
 0x634   : > { %v2570_v8 = vpop.f32.mrf.mxu1 }
 0x635   : > { %2843 = vst.msk [vmem:[%s4504_s17 + $0x34] sm:$0xf] %vm2829_vm2, %v3171_v10  ;;  %v3176_v26 = vpack.c.bf16 %v2687_v17, %v2687_v17  ;;  %v2685_v60 = vmax.f32 %v2653_v34, 0.0  ;;  %v2656_v62 = vadd.f32 %v4493_v48, %v2579_v16  ;;  %v2571_v41 = vadd.f32 %v2570_v8, %v4520_v21 }
 0x636   : > { %v3567_v39 = vpop.f32.mrf.mxu1 }
 0x637   : > { %2848 = vst.msk [vmem:[%s4504_s17 + $0x48] sm:$0xf] %vm2829_vm2, %v3176_v26  ;;  %v3174_v51 = vpack.c.bf16 %v2685_v60, %v2685_v60  ;;  %v2688_v20 = vmax.f32 %v2656_v62, 0.0  ;;  %v2654_v63 = vadd.f32 %v4493_v48, %v2571_v41  ;;  %v2592_v33 = vadd.f32 %v3567_v39, %v4528_v18 }
 0x638   : > { %v2583_v38 = vpop.f32.mrf.mxu1 }
 0x639   : > { %2846 = vst.msk [vmem:[%s4504_s17 + $0x40] sm:$0xf] %vm2829_vm2, %v3174_v51  ;;  %v3177_v3 = vpack.c.bf16 %v2688_v20, %v2688_v20  ;;  %v2686_v4 = vmax.f32 %v2654_v63, 0.0  ;;  %v2659_v55 = vadd.f32 %v4493_v48, %v2592_v33  ;;  %v2584_v21 = vadd.f32 %v2583_v38, %v4538_v24 }
 0x63a   : > { %v3568_v7 = vpop.f32.mrf.mxu1 }
 0x63b   : > { %2849 = vst.msk [vmem:[%s4504_s17 + $0x4c] sm:$0xf] %vm2829_vm2, %v3177_v3  ;;  %v3175_v31 = vpack.c.bf16 %v2686_v4, %v2686_v4  ;;  %v2691_v42 = vmax.f32 %v2659_v55, 0.0  ;;  %v2657_v15 = vadd.f32 %v4493_v48, %v2584_v21  ;;  %v2595_v18 = vadd.f32 %v3568_v7, %v4548_v25  ;;  %v3539_v25 = vpop.f32.mrf.mxu0 }
 0x63c   : > { %v2586_v6 = vpop.f32.mrf.mxu1 }
 0x63d   : > { %2847 = vst.msk [vmem:[%s4504_s17 + $0x44] sm:$0xf] %vm2829_vm2, %v3175_v31  ;;  %v3180_v61 = vpack.c.bf16 %v2691_v42, %v2691_v42  ;;  %v2689_v40 = vmax.f32 %v2657_v15, 0.0  ;;  %v2660_v19 = vadd.f32 %v4493_v48, %v2595_v18  ;;  %v2587_v24 = vadd.f32 %v2586_v6, %v2365_v14  ;;  %v2394_v27 = vpop.f32.mrf.mxu0 }
 0x63e   : > { %v3571_v32 = vpop.f32.mrf.mxu1 }
 0x63f   : > { %2852 = vst.msk [vmem:[%s4504_s17 + $0x58] sm:$0xf] %vm2829_vm2, %v3180_v61  ;;  %v3178_v23 = vpack.c.bf16 %v2689_v40, %v2689_v40  ;;  %v2692_v47 = vmax.f32 %v2660_v19, 0.0  ;;  %v2658_v28 = vadd.f32 %v4493_v48, %v2587_v24  ;;  %v2608_v5 = vadd.f32 %v3571_v32, %v3535_v54  ;;  %v3540_v52 = vpop.f32.mrf.mxu0 }
 0x640   : > { %v2599_v58 = vpop.f32.mrf.mxu1 }
 0x641   : > { %2850 = vst.msk [vmem:[%s4504_s17 + $0x50] sm:$0xf] %vm2829_vm2, %v3178_v23  ;;  %v3181_v30 = vpack.c.bf16 %v2692_v47, %v2692_v47  ;;  %v2690_v29 = vmax.f32 %v2658_v28, 0.0  ;;  %v2663_v44 = vadd.f32 %v4493_v48, %v2608_v5  ;;  %v2600_v53 = vadd.f32 %v2599_v58, %v2378_v46  ;;  %v2397_v60 = vpop.f32.mrf.mxu0 }
 0x642   : > { %v3572_v57 = vpop.f32.mrf.mxu1 }
 0x643   : > { %2853 = vst.msk [vmem:[%s4504_s17 + $0x5c] sm:$0xf] %vm2829_vm2, %v3181_v30  ;;  %v3179_v59 = vpack.c.bf16 %v2690_v29, %v2690_v29  ;;  %v2695_v22 = vmax.f32 %v2663_v44, 0.0  ;;  %v2661_v14 = vadd.f32 %v4493_v48, %v2600_v53  ;;  %v2611_v50 = vadd.f32 %v3572_v57, %v3536_v1 }
 0x644   : > { %v2602_v49 = vpop.f32.mrf.mxu1 }
 0x645   : > { %2851 = vst.msk [vmem:[%s4504_s17 + $0x54] sm:$0xf] %vm2829_vm2, %v3179_v59  ;;  %v3184_v2 = vpack.c.bf16 %v2695_v22, %v2695_v22  ;;  %v2693_v36 = vmax.f32 %v2661_v14, 0.0  ;;  %v2664_v0 = vadd.f32 %v4493_v48, %v2611_v50  ;;  %v2603_v43 = vadd.f32 %v2602_v49, %v2381_v12 }
 0x646   : > { %v3575_v56 = vpop.f32.mrf.mxu1 }
 0x647   : > { %2856 = vst.msk [vmem:[%s4504_s17 + $0x68] sm:$0xf] %vm2829_vm2, %v3184_v2  ;;  %v3182_v45 = vpack.c.bf16 %v2693_v36, %v2693_v36  ;;  %v2696_v37 = vmax.f32 %v2664_v0, 0.0  ;;  %v2662_v54 = vadd.f32 %v4493_v48, %v2603_v43  ;;  %v2624_v35 = vadd.f32 %v3575_v56, %v3539_v25 }
 0x648   : > { %v2615_v11 = vpop.f32.mrf.mxu1 }
 0x649   : > { %2854 = vst.msk [vmem:[%s4504_s17 + $0x60] sm:$0xf] %vm2829_vm2, %v3182_v45  ;;  %v3185_v9 = vpack.c.bf16 %v2696_v37, %v2696_v37  ;;  %v2694_v13 = vmax.f32 %v2662_v54, 0.0  ;;  %v2667_v10 = vadd.f32 %v4493_v48, %v2624_v35  ;;  %v2616_v17 = vadd.f32 %v2615_v11, %v2394_v27 }
 0x64a   : > { %v3576_v34 = vpop.f32.mrf.mxu1 }
 0x64b   : > { %2857 = vst.msk [vmem:[%s4504_s17 + $0x6c] sm:$0xf] %vm2829_vm2, %v3185_v9  ;;  %v3183_v16 = vpack.c.bf16 %v2694_v13, %v2694_v13  ;;  %v2699_v8 = vmax.f32 %v2667_v10, 0.0  ;;  %v2665_v46 = vadd.f32 %v4493_v48, %v2616_v17  ;;  %v2627_v26 = vadd.f32 %v3576_v34, %v3540_v52 }
 0x64c   : > { %v2618_v62 = vpop.f32.mrf.mxu1 }
 0x64d   : > { %2855 = vst.msk [vmem:[%s4504_s17 + $0x64] sm:$0xf] %vm2829_vm2, %v3183_v16  ;;  %v3188_v41 = vpack.c.bf16 %v2699_v8, %v2699_v8  ;;  %v2697_v39 = vmax.f32 %v2665_v46, 0.0  ;;  %v2668_v51 = vadd.f32 %v4493_v48, %v2627_v26  ;;  %v2619_v20 = vadd.f32 %v2618_v62, %v2397_v60 }
 0x64f   : > { %2860 = vst.msk [vmem:[%s4504_s17 + $0x78] sm:$0xf] %vm2829_vm2, %v3188_v41  ;;  %v3186_v63 = vpack.c.bf16 %v2697_v39, %v2697_v39  ;;  %v2700_v33 = vmax.f32 %v2668_v51, 0.0  ;;  %v2666_v38 = vadd.f32 %v4493_v48, %v2619_v20 }
 0x651   : > { %2858 = vst.msk [vmem:[%s4504_s17 + $0x70] sm:$0xf] %vm2829_vm2, %v3186_v63  ;;  %v3189_v1 = vpack.c.bf16 %v2700_v33, %v2700_v33  ;;  %v2698_v3 = vmax.f32 %v2666_v38, 0.0 }
 0x653   : > { %2861 = vst.msk [vmem:[%s4504_s17 + $0x7c] sm:$0xf] %vm2829_vm2, %v3189_v1  ;;  %v3187_v4 = vpack.c.bf16 %v2698_v3, %v2698_v3 }
 0x655   : > { %2859 = vst.msk [vmem:[%s4504_s17 + $0x74] sm:$0xf] %vm2829_vm2, %v3187_v4 }
 0x656 PF: > { %s23_s27 = sadd.s32 1, %s3802_s27   ;;  %s4649_s25 = smov %s3798_s26 }
 0x657   : > { %p20_p5 = scmp.ge.s32.totalorder %s23_s27, 4   ;;  %s4650_s26 = smov %s4652_s28 }
 0x659   :  { %22 = sbr.rel (!%p20_p5) target bundleno = 2 (0x2), region = 108 }

</bundles_post_ra>
